<compile_context>
chip_gen: v6e
topology: v6e:2x2x1
jax: 0.10.0
libtpu: 0.0.40
codegen_flags: <defaults>
</compile_context>

<pallas_src>
import functools
import math

import jax
import jax.numpy as jnp
from jax.experimental import pallas as pl
from jax.experimental.pallas import tpu as pltpu


_INV_SQRT2 = 1.0 / math.sqrt(2.0)


def _erf(x):
    """erf via A&S 7.1.26 (|err| < 1.5e-7), built from lowering-safe primitives.

    The 1/(1 + p|x|) divide is an EUP approximate reciprocal refined with one
    Newton step, so it stays off the VALU slot without losing f32 accuracy.
    """
    p = 0.3275911
    a1, a2, a3, a4, a5 = (0.254829592, -0.284496736, 1.421413741,
                          -1.453152027, 1.061405429)
    ax = jnp.abs(x)
    d = 1.0 + p * ax
    t = pl.reciprocal(d, approx=True)
    t = t * (2.0 - d * t)                       # one Newton step: ~f32 accuracy
    poly = ((((a5 * t + a4) * t + a3) * t + a2) * t + a1) * t
    y = 1.0 - poly * jnp.exp(-ax * ax)
    return jnp.where(x < 0, -y, y)


def _gelu_exact(x):
    """torch.nn.GELU() default (erf formulation)."""
    return 0.5 * x * (1.0 + _erf(x * _INV_SQRT2))


def _fc1_gelu(x_ref, w1_ref, b1_ref, precision):
    h = jnp.dot(x_ref[...], w1_ref[...],
                preferred_element_type=jnp.float32, precision=precision)
    return _gelu_exact(h + b1_ref[...].astype(jnp.float32))


def _mlp_kernel_single(x_ref, w1_ref, b1_ref, w2_ref, b2_ref, o_ref, *, precision):
    """Whole hidden dim in one tile: no accumulator round-trip / phases needed."""
    h = _fc1_gelu(x_ref, w1_ref, b1_ref, precision)
    out = jnp.dot(h.astype(w2_ref.dtype), w2_ref[...],
                  preferred_element_type=jnp.float32, precision=precision)
    o_ref[...] = (out + b2_ref[...].astype(jnp.float32)).astype(o_ref.dtype)


def _mlp_kernel_acc(x_ref, w1_ref, b1_ref, w2_ref, b2_ref, o_ref, acc_ref, *,
                    precision):
    """Hidden dim split into tiles: fc2 reduction accumulated in f32 VMEM scratch."""
    k = pl.program_id(1)

    @pl.when(k == 0)
    def _init():
        acc_ref[...] = jnp.zeros_like(acc_ref)

    h = _fc1_gelu(x_ref, w1_ref, b1_ref, precision)
    acc_ref[...] += jnp.dot(h.astype(w2_ref.dtype), w2_ref[...],
                            preferred_element_type=jnp.float32,
                            precision=precision)

    @pl.when(k == pl.num_programs(1) - 1)
    def _finalize():
        o_ref[...] = (acc_ref[...]
                      + b2_ref[...].astype(jnp.float32)).astype(o_ref.dtype)


def _round_up(v, m):
    return (v + m - 1) // m * m


def _is_multicore_tensorcore():
    # v4 / v5p / v7x have 2 TensorCores per chip; v5e / v6e have 1.
    try:
        kind = jax.devices()[0].device_kind.lower()
    except Exception:
        return False
    return any(t in kind for t in ("v7", "v4", "v5p"))


def _default_vmem_limit():
    try:
        phys = pltpu.get_tpu_info().vmem_capacity_bytes
    except Exception:
        phys = 128 * 1024 * 1024
    # ~3/4 of physical VMEM, capped: ~48 MiB on v7x (64 MiB/TC), ~96 MiB on v5e/v6e.
    return int(min(phys * 3 // 4, 100 * 1024 * 1024))


def _vmem_bytes(bm, bh, c_in, c_out_p, x_itemsize, w_itemsize, single_k):
    total = 2 * bm * c_in * x_itemsize          # x tile (double-buffered)
    total += 2 * c_in * bh * w_itemsize         # W1 tile
    total += 2 * 8 * bh * w_itemsize            # b1 tile (sublane-padded)
    total += 2 * bh * c_out_p * w_itemsize      # W2 tile
    total += 2 * 8 * c_out_p * w_itemsize       # b2 tile
    total += 2 * bm * c_out_p * x_itemsize      # output tile
    total += bm * bh * 4                        # fc1/GELU intermediate (f32)
    if not single_k:
        total += bm * c_out_p * 4               # f32 accumulator scratch
    return total


def mlp_forward(x, w1, b1, w2, b2, *, block_m=1024, block_h=256,
                precision=None, vmem_limit_bytes=None):
    """Fused fc2(gelu(fc1(x))); x has shape (..., in_features).

    Weights use the JAX layout: w1 (in, hidden), w2 (hidden, out)
    (i.e. the transpose of torch.nn.Linear.weight).
    """
    *lead, c_in = x.shape
    c_in_w, hidden = w1.shape
    hidden_w2, c_out = w2.shape
    assert c_in_w == c_in and hidden_w2 == hidden
    assert b1.shape == (hidden,) and b2.shape == (c_out,)

    if precision is None:
        # f32 callers get reference-grade matmuls; bf16 callers get one MXU pass.
        precision = (jax.lax.Precision.HIGHEST if x.dtype == jnp.float32
                     else jax.lax.Precision.DEFAULT)
    if vmem_limit_bytes is None:
        vmem_limit_bytes = _default_vmem_limit()

    x2 = x.reshape(-1, c_in)
    m = x2.shape[0]

    # --- token-axis tile: multiple of 8, and of 128 once large enough -------
    bm = min(block_m, m)
    bm = _round_up(bm, 128) if bm >= 128 else _round_up(bm, 8)

    # --- hidden-axis tile: multiple of 128 dividing the 128-padded hidden ---
    h128 = _round_up(hidden, 128)
    bh = _round_up(min(block_h, h128), 128)
    while bh > 128 and h128 % bh != 0:
        bh -= 128

    # Keep >= 2 token tiles so the "parallel" axis shards across 2 TensorCores.
    if _is_multicore_tensorcore() and m >= 256 and _round_up(m, bm) // bm < 2:
        bm = _round_up(pl.cdiv(m, 2), 128)

    # --- lane-dense output: pad c_out up to a multiple of 128 ---------------
    c_out_p = _round_up(c_out, 128)

    # --- shrink tiles if the working set would blow the VMEM budget ---------
    budget = int(vmem_limit_bytes * 0.8)
    x_is = jnp.dtype(x.dtype).itemsize
    w_is = jnp.dtype(w1.dtype).itemsize
    while (_vmem_bytes(bm, bh, c_in, c_out_p, x_is, w_is,
                       _round_up(hidden, bh) == bh) > budget
           and (bm > 128 or bh > 128)):
        if bm > 128:
            bm = max(128, _round_up(bm // 2, 128))
        else:
            bh = max(128, _round_up(bh // 2, 128))

    m_pad = _round_up(m, bm)
    h_pad = _round_up(hidden, bh)

    # Zero padding: padded hidden units give gelu(0)=0 with zero W2 rows -> no
    # contribution; padded tokens / output columns are sliced away afterwards.
    if m_pad != m:
        x2 = jnp.pad(x2, ((0, m_pad - m), (0, 0)))
    if h_pad != hidden:
        w1 = jnp.pad(w1, ((0, 0), (0, h_pad - hidden)))
        b1 = jnp.pad(b1, (0, h_pad - hidden))
        w2 = jnp.pad(w2, ((0, h_pad - hidden), (0, 0)))
    if c_out_p != c_out:
        w2 = jnp.pad(w2, ((0, 0), (0, c_out_p - c_out)))
        b2 = jnp.pad(b2, (0, c_out_p - c_out))

    b1_2d = b1.reshape(1, h_pad)
    b2_2d = b2.reshape(1, c_out_p)

    out_shape = jax.ShapeDtypeStruct((m_pad, c_out_p), x.dtype)

    if h_pad == bh:
        # Single hidden tile: write straight to the output block.
        kernel = functools.partial(_mlp_kernel_single, precision=precision)
        out = pl.pallas_call(
            kernel,
            out_shape=out_shape,
            grid_spec=pltpu.PrefetchScalarGridSpec(
                num_scalar_prefetch=0,
                grid=(m_pad // bm,),
                in_specs=[
                    pl.BlockSpec((bm, c_in), lambda i: (i, 0)),      # x tile
                    pl.BlockSpec((c_in, bh), lambda i: (0, 0)),      # W1
                    pl.BlockSpec((1, bh), lambda i: (0, 0)),         # b1
                    pl.BlockSpec((bh, c_out_p), lambda i: (0, 0)),   # W2
                    pl.BlockSpec((1, c_out_p), lambda i: (0, 0)),    # b2
                ],
                out_specs=pl.BlockSpec((bm, c_out_p), lambda i: (i, 0)),
            ),
            compiler_params=pltpu.CompilerParams(
                dimension_semantics=("parallel",),
                vmem_limit_bytes=int(vmem_limit_bytes)),
        )(x2, w1, b1_2d, w2, b2_2d)
    else:
        kernel = functools.partial(_mlp_kernel_acc, precision=precision)
        out = pl.pallas_call(
            kernel,
            out_shape=out_shape,
            grid_spec=pltpu.PrefetchScalarGridSpec(
                num_scalar_prefetch=0,
                grid=(m_pad // bm, h_pad // bh),
                in_specs=[
                    pl.BlockSpec((bm, c_in), lambda i, k: (i, 0)),    # x (resident over k)
                    pl.BlockSpec((c_in, bh), lambda i, k: (0, k)),    # W1 hidden-col tile
                    pl.BlockSpec((1, bh), lambda i, k: (0, k)),       # b1 tile
                    pl.BlockSpec((bh, c_out_p), lambda i, k: (k, 0)), # W2 hidden-row tile
                    pl.BlockSpec((1, c_out_p), lambda i, k: (0, 0)),  # b2 (constant)
                ],
                out_specs=pl.BlockSpec((bm, c_out_p), lambda i, k: (i, 0)),
                scratch_shapes=[pltpu.VMEM((bm, c_out_p), jnp.float32)],
            ),
            compiler_params=pltpu.CompilerParams(
                dimension_semantics=("parallel", "arbitrary"),
                vmem_limit_bytes=int(vmem_limit_bytes)),
        )(x2, w1, b1_2d, w2, b2_2d)

    out = out[:m, :c_out]
    return out.reshape(*lead, c_out)


def _reference(x, w1, b1, w2, b2):
    """Pure-JAX mirror of the PyTorch Mlp forward (exact GELU, full-f32 matmuls)."""
    dot = functools.partial(jnp.dot, precision=jax.lax.Precision.HIGHEST)
    h = dot(x, w1) + b1
    h = 0.5 * h * (1.0 + jax.scipy.special.erf(h * _INV_SQRT2))
    return dot(h, w2) + b2


if __name__ == "__main__":
    key = jax.random.PRNGKey(0)
    B, N = 2, 64                        # batch, tokens (e.g. one 8x8 window)
    C_IN, C_HID, C_OUT = 32, 256, 32
    ks = jax.random.split(key, 5)

    x = jax.random.normal(ks[0], (B, N, C_IN), dtype=jnp.float32)
    lim1 = 1.0 / math.sqrt(C_IN)
    w1 = jax.random.uniform(ks[1], (C_IN, C_HID), jnp.float32, -lim1, lim1)
    b1 = jax.random.uniform(ks[2], (C_HID,), jnp.float32, -lim1, lim1)
    lim2 = 1.0 / math.sqrt(C_HID)
    w2 = jax.random.uniform(ks[3], (C_HID, C_OUT), jnp.float32, -lim2, lim2)
    b2 = jax.random.uniform(ks[4], (C_HID // C_HID * C_OUT,), jnp.float32, -lim2, lim2)

    ref = _reference(x, w1, b1, w2, b2)

    # Path 1: defaults -> single hidden tile (bh=256), lane-dense padded c_out.
    out1 = jax.block_until_ready(mlp_forward(x, w1, b1, w2, b2))
    # Path 2: forced multi-tile hidden reduction (grid (2, 2)) -> accumulator path.
    out2 = jax.block_until_ready(
        mlp_forward(x, w1, b1, w2, b2, block_m=64, block_h=128))

    assert out1.shape == (B, N, C_OUT) and out2.shape == (B, N, C_OUT)
    for out in (out1, out2):
        max_err = float(jnp.max(jnp.abs(out - ref)))
        assert bool(jnp.allclose(out, ref, atol=1e-2, rtol=1e-2)), f"max err {max_err}"
    print("KERNEL_OK")
</pallas_src>

<mosaic_0001>
module attributes {stable_mosaic.version = 11 : i64} {
  func.func @_mlp_kernel_single(%arg0: i32, %arg1: memref<128x32xf32, #tpu.memory_space<vmem>>, %arg2: memref<32x256xf32, #tpu.memory_space<vmem>>, %arg3: memref<1x256xf32, #tpu.memory_space<vmem>>, %arg4: memref<256x128xf32, #tpu.memory_space<vmem>>, %arg5: memref<1x128xf32, #tpu.memory_space<vmem>>, %arg6: memref<128x128xf32, #tpu.memory_space<vmem>>) attributes {dimension_semantics = [#tpu.dimension_semantics<parallel>], iteration_bounds = array<i64: 1>, scalar_prefetch = 0 : i64, scratch_operands = 0 : i64, tpu.core_type = #tpu.core_type<tc>, window_params = [{transform_indices = @transform_0, window_bounds = array<i64: 128, 32>}, {pipeline_mode = #tpu.pipeline_mode<synchronous>, transform_indices = @transform_1, window_bounds = array<i64: 32, 256>}, {pipeline_mode = #tpu.pipeline_mode<synchronous>, transform_indices = @transform_2, window_bounds = array<i64: 1, 256>}, {pipeline_mode = #tpu.pipeline_mode<synchronous>, transform_indices = @transform_3, window_bounds = array<i64: 256, 128>}, {pipeline_mode = #tpu.pipeline_mode<synchronous>, transform_indices = @transform_4, window_bounds = array<i64: 1, 128>}, {transform_indices = @transform_5, window_bounds = array<i64: 128, 128>}]} {
    %c0 = arith.constant 0 : index
    %c0_0 = arith.constant 0 : index
    %0 = vector.load %arg1[%c0, %c0_0] : memref<128x32xf32, #tpu.memory_space<vmem>>, vector<128x32xf32>
    %c0_1 = arith.constant 0 : index
    %c0_2 = arith.constant 0 : index
    %1 = vector.load %arg2[%c0_1, %c0_2] : memref<32x256xf32, #tpu.memory_space<vmem>>, vector<32x256xf32>
    %cst = arith.constant dense<0.000000e+00> : vector<128x256xf32>
    %2 = tpu.matmul %0, %1, %cst {dimension_numbers = #tpu.dot_dimension_numbers<[1], [0], [0], [1], [0, 0, 1, 1], [], []>, precision = #tpu.contract_precision<fp32>} : vector<128x32xf32>, vector<32x256xf32>, vector<128x256xf32> -> vector<128x256xf32>
    %c0_3 = arith.constant 0 : index
    %c0_4 = arith.constant 0 : index
    %3 = vector.load %arg3[%c0_3, %c0_4] : memref<1x256xf32, #tpu.memory_space<vmem>>, vector<1x256xf32>
    %4 = vector.broadcast %3 : vector<1x256xf32> to vector<128x256xf32>
    %5 = arith.addf %2, %4 : vector<128x256xf32>
    %cst_5 = arith.constant 5.000000e-01 : f32
    %6 = vector.broadcast %cst_5 : f32 to vector<128x256xf32>
    %7 = arith.mulf %6, %5 : vector<128x256xf32>
    %cst_6 = arith.constant 0.707106769 : f32
    %8 = vector.broadcast %cst_6 : f32 to vector<128x256xf32>
    %9 = arith.mulf %5, %8 : vector<128x256xf32>
    %10 = math.absf %9 : vector<128x256xf32>
    %cst_7 = arith.constant 0.327591091 : f32
    %11 = vector.broadcast %cst_7 : f32 to vector<128x256xf32>
    %12 = arith.mulf %11, %10 : vector<128x256xf32>
    %cst_8 = arith.constant 1.000000e+00 : f32
    %13 = vector.broadcast %cst_8 : f32 to vector<128x256xf32>
    %14 = arith.addf %13, %12 : vector<128x256xf32>
    %15 = tpu.reciprocal %14 {approx = true} : vector<128x256xf32> -> vector<128x256xf32>
    %16 = arith.mulf %14, %15 : vector<128x256xf32>
    %cst_9 = arith.constant 2.000000e+00 : f32
    %17 = vector.broadcast %cst_9 : f32 to vector<128x256xf32>
    %18 = arith.subf %17, %16 : vector<128x256xf32>
    %19 = arith.mulf %15, %18 : vector<128x256xf32>
    %cst_10 = arith.constant 1.06140542 : f32
    %20 = vector.broadcast %cst_10 : f32 to vector<128x256xf32>
    %21 = arith.mulf %20, %19 : vector<128x256xf32>
    %cst_11 = arith.constant -1.45315206 : f32
    %22 = vector.broadcast %cst_11 : f32 to vector<128x256xf32>
    %23 = arith.addf %21, %22 : vector<128x256xf32>
    %24 = arith.mulf %23, %19 : vector<128x256xf32>
    %cst_12 = arith.constant 1.42141378 : f32
    %25 = vector.broadcast %cst_12 : f32 to vector<128x256xf32>
    %26 = arith.addf %24, %25 : vector<128x256xf32>
    %27 = arith.mulf %26, %19 : vector<128x256xf32>
    %cst_13 = arith.constant -0.284496725 : f32
    %28 = vector.broadcast %cst_13 : f32 to vector<128x256xf32>
    %29 = arith.addf %27, %28 : vector<128x256xf32>
    %30 = arith.mulf %29, %19 : vector<128x256xf32>
    %cst_14 = arith.constant 0.254829586 : f32
    %31 = vector.broadcast %cst_14 : f32 to vector<128x256xf32>
    %32 = arith.addf %30, %31 : vector<128x256xf32>
    %33 = arith.mulf %32, %19 : vector<128x256xf32>
    %cst_15 = arith.constant 0.000000e+00 : f32
    %34 = vector.broadcast %cst_15 : f32 to vector<128x256xf32>
    %35 = arith.subf %34, %10 : vector<128x256xf32>
    %36 = arith.mulf %35, %10 : vector<128x256xf32>
    %37 = math.exp %36 : vector<128x256xf32>
    %38 = arith.mulf %33, %37 : vector<128x256xf32>
    %cst_16 = arith.constant 1.000000e+00 : f32
    %39 = vector.broadcast %cst_16 : f32 to vector<128x256xf32>
    %40 = arith.subf %39, %38 : vector<128x256xf32>
    %cst_17 = arith.constant 0.000000e+00 : f32
    %41 = vector.broadcast %cst_17 : f32 to vector<128x256xf32>
    %42 = arith.cmpf olt, %9, %41 : vector<128x256xf32>
    %cst_18 = arith.constant 0.000000e+00 : f32
    %43 = vector.broadcast %cst_18 : f32 to vector<128x256xf32>
    %44 = arith.subf %43, %40 : vector<128x256xf32>
    %45 = arith.select %42, %44, %40 : vector<128x256xi1>, vector<128x256xf32>
    %cst_19 = arith.constant 1.000000e+00 : f32
    %46 = vector.broadcast %cst_19 : f32 to vector<128x256xf32>
    %47 = arith.addf %46, %45 : vector<128x256xf32>
    %48 = arith.mulf %7, %47 : vector<128x256xf32>
    %c0_20 = arith.constant 0 : index
    %c0_21 = arith.constant 0 : index
    %49 = vector.load %arg4[%c0_20, %c0_21] : memref<256x128xf32, #tpu.memory_space<vmem>>, vector<256x128xf32>
    %cst_22 = arith.constant dense<0.000000e+00> : vector<128x128xf32>
    %50 = tpu.matmul %48, %49, %cst_22 {dimension_numbers = #tpu.dot_dimension_numbers<[1], [0], [0], [1], [0, 0, 1, 1], [], []>, precision = #tpu.contract_precision<fp32>} : vector<128x256xf32>, vector<256x128xf32>, vector<128x128xf32> -> vector<128x128xf32>
    %c0_23 = arith.constant 0 : index
    %c0_24 = arith.constant 0 : index
    %51 = vector.load %arg5[%c0_23, %c0_24] : memref<1x128xf32, #tpu.memory_space<vmem>>, vector<1x128xf32>
    %52 = vector.broadcast %51 : vector<1x128xf32> to vector<128x128xf32>
    %53 = arith.addf %50, %52 : vector<128x128xf32>
    %c0_25 = arith.constant 0 : index
    %c0_26 = arith.constant 0 : index
    %54 = vector.load %arg6[%c0_25, %c0_26] : memref<128x128xf32, #tpu.memory_space<vmem>>, vector<128x128xf32>
    tpu.vector_store %arg6[%c0_25, %c0_26], %53 {strides = array<i32>} : memref<128x128xf32, #tpu.memory_space<vmem>>, vector<128x128xf32>,
    return
  }
  func.func @transform_0(%arg0: i32) -> (i32, i32) {
    %c0_i32 = arith.constant 0 : i32
    %c0_i32_0 = arith.constant 0 : i32
    return %arg0, %c0_i32 : i32, i32
  }
  func.func @transform_1(%arg0: i32) -> (i32, i32) {
    %c0_i32 = arith.constant 0 : i32
    %c0_i32_0 = arith.constant 0 : i32
    %c0_i32_1 = arith.constant 0 : i32
    return %c0_i32, %c0_i32_0 : i32, i32
  }
  func.func @transform_2(%arg0: i32) -> (i32, i32) {
    %c0_i32 = arith.constant 0 : i32
    %c0_i32_0 = arith.constant 0 : i32
    %c0_i32_1 = arith.constant 0 : i32
    return %c0_i32, %c0_i32_0 : i32, i32
  }
  func.func @transform_3(%arg0: i32) -> (i32, i32) {
    %c0_i32 = arith.constant 0 : i32
    %c0_i32_0 = arith.constant 0 : i32
    %c0_i32_1 = arith.constant 0 : i32
    return %c0_i32, %c0_i32_0 : i32, i32
  }
  func.func @transform_4(%arg0: i32) -> (i32, i32) {
    %c0_i32 = arith.constant 0 : i32
    %c0_i32_0 = arith.constant 0 : i32
    %c0_i32_1 = arith.constant 0 : i32
    return %c0_i32, %c0_i32_0 : i32, i32
  }
  func.func @transform_5(%arg0: i32) -> (i32, i32) {
    %c0_i32 = arith.constant 0 : i32
    %c0_i32_0 = arith.constant 0 : i32
    return %arg0, %c0_i32 : i32, i32
  }
}

</mosaic_0001>

<bundles_post_ra>
// kernel: tpu_custom_call.1
= control target key start
LH: loop header
LB: loop body
LE: loop exit
PB: predicated region body
PF: predicated region fallthrough
CT: control target
= control target key end

     0   :  { %10 = vsyncpa [#allocation3], 0  ;;  %s7996_s0 = inlined_call_operand.vmem [shape: f32[128,32], index: 0, kind: input, shape index: {}]   ;;  %s7997_s1 = inlined_call_operand.vmem [shape: f32[32,256], index: 1, kind: input, shape index: {}]   ;;  %s7998_s2 = inlined_call_operand.vmem [shape: f32[1,256], index: 2, kind: input, shape index: {}]   ;;  %s7999_s3 = inlined_call_operand.hbm [shape: f32[256,128], index: 3, kind: input, shape index: {}]   ;;  %s8000_s4 = inlined_call_operand.vmem [shape: f32[1,128], index: 4, kind: input, shape index: {}]   ;;  %s8001_s5 = inlined_call_operand.hbm [shape: f32[128,128], index: 5, kind: output, shape index: {}]  }
   0x1   :  { %11 = vsyncpa [#allocation4], 0  ;;  %s4758_s18 = smov [#allocation2]  }
   0x2   :  { %s23_s19 = sshll.u32 %s4758_s18, 4  ;;  %s24_s19 = int_to_ptr.vmem [resolvable:$true] %s23_s19 }
   0x3   :  { %s4722_s20 = scalar_lea.vmem %s24_s19, 4096  ;;  %p4727_p1 = scmp.lt.s32.totalorder %s24_s19, %s24_s19 }
   0x4   :  { %p4723_p0 = scmp.ne.s32.totalorder %s24_s19, %s4722_s20  ;;  %p4728_p2 = scmp.lt.s32.totalorder %s4722_s20, %s4722_s20 }
   0x6   :  { %p4729_p3 = por %p4728_p2, %p4727_p1 }
   0x8   :  { %p4730_p4 = pnand %p4729_p3, %p4723_p0 }
   0xa   :  { %4733 = shalt.err (!%p4730_p4)
}
   0xb   :  { %s4759_s21 = smov 128   ;;  %s4760_s22 = smov 8  }
   0xc   :  { %29 = dma.hbm_to_vmem [thread:$0]  %s7999_s3, 4096, %s24_s19, [#allocation3], %s4759_s21, %s4759_s21, %s4760_s22  }
   0xd   :  { %4754 = dma.done.wait [#allocation3], 4096  }
   0xe   :  { %4755 = vsyncadd [#allocation3], 4294963200  ;;  %v4761_v0 = vmov 0.0   ;;  %v58_v1 = vld [vmem:[%s7997_s1 + $0x38] sm:$0xff]  ;;  %v57_v2 = vld [vmem:[%s7997_s1 + $0x30] sm:$0xff]  ;;  %vm71_vm0 = vcmask 261120  }
   0xf   :  { %192 = vmatprep.mubr.f32.mxu0 %v4761_v0  ;;  %473 = vmatprep.mubr.f32.mxu1 %v4761_v0  ;;  %v56_v3 = vld [vmem:[%s7997_s1 + $0x28] sm:$0xff]  ;;  %v4810_v4 = vand.u32 4294901760, %v58_v1  ;;  %v4812_v5 = vand.u32 4294901760, %v57_v2  ;;  %v55_v7 = vld [vmem:[%s7997_s1 + $0x20] sm:$0xff]  ;;  %v54_v8 = vld [vmem:[%s7997_s1 + $0x18] sm:$0xff] }
  0x10   :  { %v4814_v6 = vand.u32 4294901760, %v56_v3  ;;  %v53_v9 = vld [vmem:[%s7997_s1 + $0x10] sm:$0xff]  ;;  %v4825_v10 = vand.u32 4294901760, %v55_v7  ;;  %v4827_v11 = vand.u32 4294901760, %v54_v8  ;;  %v52_v13 = vld [vmem:[%s7997_s1 + $0x8] sm:$0xff]  ;;  %v51_v14 = vld [vmem:[%s7997_s1] sm:$0xff] }
  0x11   :  { %v4829_v12 = vand.u32 4294901760, %v53_v9  ;;  %v35_v15 = vld [vmem:[%s7996_s0] sm:$0xff]  ;;  %145 = vmatprep.subr.mxu0 %v4810_v4  ;;  %v4841_v16 = vand.u32 4294901760, %v52_v13  ;;  %v4843_v17 = vand.u32 4294901760, %v51_v14  ;;  %v4846_v18 = vsub.f32 %v58_v1, %v4810_v4  ;;  %v36_v20 = vld [vmem:[%s7996_s0 + $0x8] sm:$0xff]  ;;  %v37_v45 = vld [vmem:[%s7996_s0 + $0x10] sm:$0xff] }
  0x12   :  { %v73_v19 = vsel %vm71_vm0, %v35_v15, 0  ;;  %147 = vmatpush1.msra.mxu0 %v4812_v5  ;;  %v4856_v22 = vsub.f32 %v57_v2, %v4812_v5  ;;  %v4859_v23 = vsub.f32 %v56_v3, %v4814_v6  ;;  %v4862_v24 = vsub.f32 %v55_v7, %v4825_v10  ;;  %v38_v46 = vld [vmem:[%s7996_s0 + $0x18] sm:$0xff]  ;;  %v39_v55 = vld [vmem:[%s7996_s0 + $0x20] sm:$0xff]  ;;  %v40_v56 = vld [vmem:[%s7996_s0 + $0x28] sm:$0xff] }
  0x13   :  { %v4853_v21 = vand.u32 4294901760, %v73_v19  ;;  %149 = vmatprep.subr.mxu0 %v4814_v6  ;;  %v395_v25 = vand.u32 4294901760, %v4846_v18  ;;  %v4867_v26 = vsub.f32 %v54_v8, %v4827_v11  ;;  %v76_v27 = vsel %vm71_vm0, %v36_v20, 0  ;;  %v41_v57 = vld [vmem:[%s7996_s0 + $0x30] sm:$0xff] }
  0x14   :  { %v4871_v28 = vsub.f32 %v53_v9, %v4829_v12  ;;  %151 = vmatpush1.msra.mxu0 %v4825_v10  ;;  %v401_v30 = vand.u32 4294901760, %v4856_v22  ;;  %v407_v31 = vand.u32 4294901760, %v4859_v23  ;;  %v413_v32 = vand.u32 4294901760, %v4862_v24 }
  0x15   :  { %v4875_v29 = vsub.f32 %v73_v19, %v4853_v21  ;;  %153 = vmatprep.subr.mxu0 %v4827_v11  ;;  %v396_v33 = vsub.f32 %v4846_v18, %v395_v25  ;;  %v419_v34 = vand.u32 4294901760, %v4867_v26  ;;  %v4885_v35 = vand.u32 4294901760, %v76_v27 }
  0x16   :  { %v425_v36 = vand.u32 4294901760, %v4871_v28  ;;  %155 = vmatpush1.msra.mxu0 %v4829_v12  ;;  %v402_v38 = vsub.f32 %v4856_v22, %v401_v30  ;;  %v408_v39 = vsub.f32 %v4859_v23, %v407_v31  ;;  %v414_v40 = vsub.f32 %v4862_v24, %v413_v32 }
  0x17   :  { %v195_v37 = vand.u32 4294901760, %v4875_v29  ;;  %157 = vmatprep.subr.mxu0 %v4841_v16  ;;  %v397_v41 = vand.u32 4294901760, %v396_v33  ;;  %v420_v42 = vsub.f32 %v4867_v26, %v419_v34  ;;  %v4904_v43 = vsub.f32 %v76_v27, %v4885_v35 }
  0x18   :  { %v426_v44 = vsub.f32 %v4871_v28, %v425_v36  ;;  %159 = vmatpush1.msra.mxu0 %v4843_v17  ;;  %v403_v48 = vand.u32 4294901760, %v402_v38  ;;  %v409_v49 = vand.u32 4294901760, %v408_v39  ;;  %v415_v50 = vand.u32 4294901760, %v414_v40 }
  0x19   :  { %v196_v47 = vsub.f32 %v4875_v29, %v195_v37  ;;  %398 = vmatprep.subr.mxu1 %v397_v41  ;;  %v421_v51 = vand.u32 4294901760, %v420_v42  ;;  %v206_v52 = vand.u32 4294901760, %v4904_v43  ;;  %v4921_v54 = vsub.f32 %v52_v13, %v4841_v16  ;;  %612 = vmatprep.subr.mxu0 %v4846_v18  ;;  %v42_v41 = vld [vmem:[%s7996_s0 + $0x38] sm:$0xff] }
  0x1a   :  { %v427_v53 = vand.u32 4294901760, %v426_v44  ;;  %404 = vmatpush1.msra.mxu1 %v403_v48  ;;  %v4934_v59 = vsub.f32 %v51_v14, %v4843_v17  ;;  %v79_v60 = vsel %vm71_vm0, %v37_v45, 0  ;;  %v82_v61 = vsel %vm71_vm0, %v38_v46, 0 }
  0x1b   :  { %v197_v58 = vand.u32 4294901760, %v196_v47  ;;  %410 = vmatprep.subr.mxu1 %v409_v49  ;;  %v207_v62 = vsub.f32 %v4904_v43, %v206_v52  ;;  %v431_v63 = vand.u32 4294901760, %v4921_v54  ;;  %v4942_v1 = vand.u32 4294901760, %v79_v60 }
  0x1c   :  { %v4944_v2 = vand.u32 4294901760, %v82_v61  ;;  %416 = vmatpush1.msra.mxu1 %v415_v50  ;;  %v437_v3 = vand.u32 4294901760, %v4934_v59  ;;  %v85_v7 = vsel %vm71_vm0, %v39_v55, 0  ;;  %v88_v8 = vsel %vm71_vm0, %v40_v56, 0 }
  0x1d   :  { %198 = vmatmul.mubr.f32.vlgmr.msra.gmra.mxu0 %v197_v58  ;;  %v91_v9 = vsel %vm71_vm0, %v41_v57, 0  ;;  %422 = vmatprep.subr.mxu1 %v421_v51  ;;  %v208_v13 = vand.u32 4294901760, %v207_v62  ;;  %v432_v14 = vsub.f32 %v4921_v54, %v431_v63  ;;  %v4955_v15 = vsub.f32 %v79_v60, %v4942_v1  ;;  %v44_v62 = vld [vmem:[%s7996_s0 + $0x48] sm:$0xff] }
  0x1e   :  { %203 = vmatprep.mubr.f32.mxu0 %v4761_v0  ;;  %v4958_v19 = vsub.f32 %v82_v61, %v4944_v2  ;;  %428 = vmatpush1.msra.mxu1 %v427_v53  ;;  %v438_v20 = vsub.f32 %v4934_v59, %v437_v3  ;;  %v4964_v27 = vand.u32 4294901760, %v85_v7  ;;  %v4966_v33 = vand.u32 4294901760, %v88_v8  ;;  %v43_v53 = vld [vmem:[%s7996_s0 + $0x40] sm:$0xff] }
  0x1f   :  { %615 = vmatpush1.msra.mxu0 %v4856_v22  ;;  %v433_v38 = vand.u32 4294901760, %v432_v14  ;;  %v8011_v39 = vand.u32 4294901760, %v4955_v15  ;;  %v4977_v45 = vand.u32 4294901760, %v91_v9  ;;  %v94_v50 = vsel %vm71_vm0, %v42_v41, 0 }
  0x20   :  { %v8009_v40 = vand.u32 4294901760, %v4958_v19  ;;  %618 = vmatprep.subr.mxu0 %v4859_v23  ;;  %v439_v42 = vand.u32 4294901760, %v438_v20  ;;  %v4975_v44 = vsub.f32 %v85_v7, %v4964_v27  ;;  %v4987_v48 = vsub.f32 %v88_v8, %v4966_v33 }
  0x21   :  { %209 = vmatmul.mubr.f32.gmra.mxu0 %v208_v13  ;;  %434 = vmatprep.subr.mxu1 %v433_v38  ;;  %v218_v46 = vsub.f32 %v4955_v15, %v8011_v39  ;;  %v5000_v55 = vsub.f32 %v91_v9, %v4977_v45  ;;  %v5007_v60 = vand.u32 4294901760, %v94_v50  ;;  %v97_v61 = vsel %vm71_vm0, %v43_v53, 0  ;;  %v45_v38 = vld [vmem:[%s7996_s0 + $0x50] sm:$0xff] }
  0x22   :  { %214 = vmatprep.mubr.f32.mxu0 %v4761_v0  ;;  %v229_v47 = vsub.f32 %v4958_v19, %v8009_v40  ;;  %440 = vmatpush1.msra.mxu1 %v439_v42  ;;  %v8007_v49 = vand.u32 4294901760, %v4975_v44  ;;  %v8006_v58 = vand.u32 4294901760, %v4987_v48  ;;  %v5026_v14 = vand.u32 4294901760, %v97_v61 }
  0x23   :  { %621 = vmatpush1.msra.mxu0 %v4862_v24  ;;  %475 = vmatmul.mubr.f32.vlgmr.msra.gmra.mxu1 %v4853_v21  ;;  %v219_v51 = vand.u32 4294901760, %v218_v46  ;;  %v8004_v7 = vand.u32 4294901760, %v5000_v55  ;;  %v5024_v13 = vsub.f32 %v94_v50, %v5007_v60  ;;  %v100_v20 = vsel %vm71_vm0, %v44_v62, 0 }
  0x24   :  { %820 = vmatprep.subr.mxu1 %v4810_v4  ;;  %480 = vmatprep.mubr.f32.mxu1 %v4761_v0  ;;  %v230_v56 = vand.u32 4294901760, %v229_v47  ;;  %v240_v57 = vsub.f32 %v4975_v44, %v8007_v49  ;;  %v251_v9 = vsub.f32 %v4987_v48, %v8006_v58  ;;  %v5044_v47 = vsub.f32 %v97_v61, %v5026_v14  ;;  %v50_v49 = vld [vmem:[%s7996_s0 + $0x78] sm:$0xff] }
  0x25   :  { %822 = vmatpush1.msra.mxu1 %v4812_v5  ;;  %220 = vmatmul.mubr.f32.gmra.mxu0 %v219_v51  ;;  %v262_v41 = vsub.f32 %v5000_v55, %v8004_v7  ;;  %v8003_v46 = vand.u32 4294901760, %v5024_v13  ;;  %v5046_v50 = vand.u32 4294901760, %v100_v20  ;;  %v46_v51 = vld [vmem:[%s7996_s0 + $0x58] sm:$0xff]  ;;  %v103_v53 = vsel %vm71_vm0, %v45_v38, 0 }
  0x26   :  { %824 = vmatprep.subr.mxu1 %v4814_v6  ;;  %225 = vmatprep.mubr.f32.mxu0 %v4761_v0  ;;  %v241_v8 = vand.u32 4294901760, %v240_v57  ;;  %v252_v42 = vand.u32 4294901760, %v251_v9  ;;  %v106_v57 = vsel %vm71_vm0, %v46_v51, 0  ;;  %v8002_v62 = vand.u32 4294901760, %v5044_v47 }
  0x27   :  { %826 = vmatpush1.msra.mxu1 %v4825_v10  ;;  %624 = vmatprep.subr.mxu0 %v4867_v26  ;;  %v273_v61 = vsub.f32 %v5024_v13, %v8003_v46  ;;  %v5068_v9 = vand.u32 4294901760, %v103_v53  ;;  %v5076_v18 = vand.u32 4294901760, %v106_v57  ;;  %v118_v40 = vsel %vm71_vm0, %v50_v49, 0 }
  0x28   :  { %482 = vmatmul.mubr.f32.gmra.mxu1 %v4885_v35  ;;  %627 = vmatpush1.msra.mxu0 %v4871_v28  ;;  %v5144_v39 = vand.u32 4294901760, %v118_v40 }
  0x29   :  { %487 = vmatprep.mubr.f32.mxu1 %v4761_v0  ;;  %231 = vmatmul.mubr.f32.gmra.mxu0 %v230_v56  ;;  %v263_v56 = vand.u32 4294901760, %v262_v41  ;;  %v5083_v41 = vsub.f32 %v103_v53, %v5068_v9 }
  0x2a   :  { %828 = vmatprep.subr.mxu1 %v4827_v11  ;;  %236 = vmatprep.mubr.f32.mxu0 %v4761_v0 }
  0x2b   :  { %830 = vmatpush1.msra.mxu1 %v4829_v12  ;;  %630 = vmatprep.subr.mxu0 %v4921_v54  ;;  %v8008_v46 = vand.u32 4294901760, %v5083_v41  ;;  %v8325_v23 = vand.u32 4294901760, %v5083_v41 }
  0x2c   :  { %489 = vmatmul.mubr.f32.gmra.mxu1 %v4942_v1  ;;  %633 = vmatpush1.msra.mxu0 %v4934_v59 }
  0x2d   :  { %494 = vmatprep.mubr.f32.mxu1 %v4761_v0  ;;  %242 = vmatmul.mubr.f32.gmra.mxu0 %v241_v8  ;;  %v5066_v8 = vsub.f32 %v100_v20, %v5046_v50  ;;  %v284_v20 = vsub.f32 %v5044_v47, %v8002_v62 }
  0x2e   :  { %832 = vmatprep.subr.mxu1 %v4841_v16  ;;  %247 = vmatprep.mubr.f32.mxu0 %v4761_v0 }
  0x2f   :  { %834 = vmatpush1.msra.mxu1 %v4843_v17  ;;  %1039 = vmatprep.subr.mxu0 %v395_v25  ;;  %v274_v25 = vand.u32 4294901760, %v273_v61  ;;  %v8005_v38 = vand.u32 4294901760, %v5066_v8  ;;  %v285_v53 = vand.u32 4294901760, %v284_v20  ;;  %v8324_v22 = vand.u32 4294901760, %v5066_v8 }
  0x30   :  { %496 = vmatmul.mubr.f32.gmra.mxu1 %v4944_v2  ;;  %1238 = vmatprep.subr.mxu1 %v4810_v4  ;;  %v47_v4 = vld [vmem:[%s7996_s0 + $0x60] sm:$0xff] }
  0x31   :  { %501 = vmatprep.mubr.f32.mxu1 %v4761_v0  ;;  %253 = vmatmul.mubr.f32.gmra.mxu0 %v252_v42  ;;  %v48_v42 = vld [vmem:[%s7996_s0 + $0x68] sm:$0xff]  ;;  %v109_v51 = vsel %vm71_vm0, %v47_v4, 0  ;;  %v295_v62 = vsub.f32 %v5066_v8, %v8005_v38  ;;  %v49_v4 = vld [vmem:[%s7996_s0 + $0x70] sm:$0xff] }
  0x32   :  { %258 = vmatprep.mubr.f32.mxu0 %v4761_v0  ;;  %v112_v61 = vsel %vm71_vm0, %v48_v42, 0  ;;  %v5100_v7 = vand.u32 4294901760, %v109_v51  ;;  %v306_v42 = vsub.f32 %v5083_v41, %v8008_v46 }
  0x33   :  { %v296_v20 = vand.u32 4294901760, %v295_v62 }
  0x34   :  { %503 = vmatmul.mubr.f32.gmra.mxu1 %v4964_v27  ;;  %v5116_v58 = vsub.f32 %v109_v51, %v5100_v7 }
  0x35   :  { %508 = vmatprep.mubr.f32.mxu1 %v4761_v0  ;;  %264 = vmatmul.mubr.f32.gmra.mxu0 %v263_v56  ;;  %v5093_v56 = vsub.f32 %v106_v57, %v5076_v18  ;;  %v5108_v57 = vand.u32 4294901760, %v112_v61 }
  0x36   :  { %269 = vmatprep.mubr.f32.mxu0 %v4761_v0  ;;  %v8012_v51 = vand.u32 4294901760, %v5116_v58  ;;  %v8327_v26 = vand.u32 4294901760, %v5116_v58 }
  0x37   :  { %v8010_v38 = vand.u32 4294901760, %v5093_v56  ;;  %v5131_v46 = vsub.f32 %v112_v61, %v5108_v57  ;;  %v8326_v24 = vand.u32 4294901760, %v5093_v56 }
  0x38   :  { %510 = vmatmul.mubr.f32.gmra.mxu1 %v4966_v33 }
  0x39   :  { %515 = vmatprep.mubr.f32.mxu1 %v4761_v0  ;;  %275 = vmatmul.mubr.f32.gmra.mxu0 %v274_v25  ;;  %v115_v25 = vsel %vm71_vm0, %v49_v4, 0  ;;  %v317_v4 = vsub.f32 %v5093_v56, %v8010_v38  ;;  %v328_v38 = vsub.f32 %v5116_v58, %v8012_v51  ;;  %v8013_v61 = vand.u32 4294901760, %v5131_v46 }
  0x3a   :  { %280 = vmatprep.mubr.f32.mxu0 %v4761_v0  ;;  %v5124_v62 = vand.u32 4294901760, %v115_v25  ;;  %v8328_v28 = vand.u32 4294901760, %v5131_v46 }
  0x3b   :  { %v329_v49 = vand.u32 4294901760, %v328_v38 }
  0x3c   :  { %517 = vmatmul.mubr.f32.gmra.mxu1 %v4977_v45 }
  0x3d   :  { %522 = vmatprep.mubr.f32.mxu1 %v4761_v0  ;;  %286 = vmatmul.mubr.f32.gmra.mxu0 %v285_v53  ;;  %v307_v53 = vand.u32 4294901760, %v306_v42  ;;  %v318_v42 = vand.u32 4294901760, %v317_v4  ;;  %v5154_v4 = vsub.f32 %v118_v40, %v5144_v39 }
  0x3e   :  { %291 = vmatprep.mubr.f32.mxu0 %v4761_v0 }
  0x40   :  { %524 = vmatmul.mubr.f32.gmra.mxu1 %v5007_v60 }
  0x41   :  { %529 = vmatprep.mubr.f32.mxu1 %v4761_v0  ;;  %297 = vmatmul.mubr.f32.gmra.mxu0 %v296_v20  ;;  %v5138_v20 = vsub.f32 %v115_v25, %v5124_v62  ;;  %v339_v25 = vsub.f32 %v5131_v46, %v8013_v61 }
  0x42   :  { %302 = vmatprep.mubr.f32.mxu0 %v4761_v0 }
  0x43   :  { %v340_v51 = vand.u32 4294901760, %v339_v25 }
  0x44   :  { %531 = vmatmul.mubr.f32.gmra.mxu1 %v5026_v14 }
  0x45   :  { %536 = vmatprep.mubr.f32.mxu1 %v4761_v0  ;;  %308 = vmatmul.mubr.f32.gmra.mxu0 %v307_v53  ;;  %v349_v53 = vand.u32 4294901760, %v5138_v20 }
  0x46   :  { %313 = vmatprep.mubr.f32.mxu0 %v4761_v0 }
  0x47   :  { %v350_v38 = vsub.f32 %v5138_v20, %v349_v53 }
  0x48   :  { %538 = vmatmul.mubr.f32.gmra.mxu1 %v5046_v50 }
  0x49   :  { %543 = vmatprep.mubr.f32.mxu1 %v4761_v0  ;;  %319 = vmatmul.mubr.f32.gmra.mxu0 %v318_v42  ;;  %v360_v42 = vand.u32 4294901760, %v5154_v4  ;;  %v351_v40 = vand.u32 4294901760, %v350_v38 }
  0x4a   :  { %324 = vmatprep.mubr.f32.mxu0 %v4761_v0 }
  0x4b   :  { %v361_v61 = vsub.f32 %v5154_v4, %v360_v42 }
  0x4c   :  { %545 = vmatmul.mubr.f32.gmra.mxu1 %v5068_v9 }
  0x4d   :  { %550 = vmatprep.mubr.f32.mxu1 %v4761_v0  ;;  %330 = vmatmul.mubr.f32.gmra.mxu0 %v329_v49  ;;  %v362_v49 = vand.u32 4294901760, %v361_v61 }
  0x4e   :  { %335 = vmatprep.mubr.f32.mxu0 %v4761_v0 }
  0x50   :  { %552 = vmatmul.mubr.f32.gmra.mxu1 %v5076_v18 }
  0x51   :  { %557 = vmatprep.mubr.f32.mxu1 %v4761_v0  ;;  %341 = vmatmul.mubr.f32.gmra.mxu0 %v340_v51 }
  0x52   :  { %346 = vmatprep.mubr.f32.mxu0 %v4761_v0 }
  0x54   :  { %559 = vmatmul.mubr.f32.gmra.mxu1 %v5100_v7 }
  0x55   :  { %564 = vmatprep.mubr.f32.mxu1 %v4761_v0  ;;  %352 = vmatmul.mubr.f32.gmra.mxu0 %v351_v40 }
  0x56   :  { %357 = vmatprep.mubr.f32.mxu0 %v4761_v0 }
  0x58   :  { %566 = vmatmul.mubr.f32.gmra.mxu1 %v5108_v57 }
  0x59   :  { %571 = vmatprep.mubr.f32.mxu1 %v4761_v0  ;;  %363 = vmatmul.mubr.f32.gmra.mxu0 %v362_v49 }
  0x5a   :  { %666 = vmatprep.mubr.f32.mxu0 %v4761_v0 }
  0x5c   :  { %573 = vmatmul.mubr.f32.gmra.mxu1 %v5124_v62 }
  0x5d   :  { %578 = vmatprep.mubr.f32.mxu1 %v4761_v0  ;;  %669 = vmatmul.mubr.f32.vlgmr.msra.gmra.mxu0 %v4875_v29 }
  0x5e   :  { %674 = vmatprep.mubr.f32.mxu0 %v4761_v0  ;;  %1043 = vmatpush1.msra.mxu0 %v401_v30 }
  0x5f   :  { %1047 = vmatprep.subr.mxu0 %v407_v31  ;;  %v5346_v31 = vld [vmem:[%s7998_s2] sm:$0x3] }
  0x60   :  { %580 = vmatmul.mubr.f32.gmra.mxu1 %v5144_v39  ;;  %1051 = vmatpush1.msra.mxu0 %v413_v32 }
  0x61   :  { %867 = vmatprep.mubr.f32.mxu1 %v4761_v0  ;;  %677 = vmatmul.mubr.f32.gmra.mxu0 %v4904_v43 }
  0x62   :  { %1055 = vmatprep.subr.mxu0 %v419_v34  ;;  %682 = vmatprep.mubr.f32.mxu0 %v4761_v0 }
  0x63   :  { %1059 = vmatpush1.msra.mxu0 %v425_v36 }
  0x64   :  { %871 = vmatmul.mubr.f32.vlgmr.msra.gmra.mxu1 %v195_v37  ;;  %1063 = vmatprep.subr.mxu0 %v431_v63 }
  0x65   :  { %1240 = vmatpush1.msra.mxu1 %v4812_v5  ;;  %876 = vmatprep.mubr.f32.mxu1 %v4761_v0  ;;  %v8317_v5 = vand.u32 4294901760, %v4955_v15 }
  0x66   :  { %685 = vmatmul.mubr.f32.gmra.mxu0 %v4955_v15  ;;  %1242 = vmatprep.subr.mxu1 %v4814_v6  ;;  %v8318_v6 = vand.u32 4294901760, %v4958_v19 }
  0x67   :  { %690 = vmatprep.mubr.f32.mxu0 %v4761_v0  ;;  %1244 = vmatpush1.msra.mxu1 %v4825_v10  ;;  %v8319_v10 = vand.u32 4294901760, %v4975_v44 }
  0x68   :  { %880 = vmatmul.mubr.f32.gmra.mxu1 %v206_v52  ;;  %1246 = vmatprep.subr.mxu1 %v4827_v11  ;;  %v8320_v11 = vand.u32 4294901760, %v4987_v48 }
  0x69   :  { %885 = vmatprep.mubr.f32.mxu1 %v4761_v0  ;;  %1248 = vmatpush1.msra.mxu1 %v4829_v12  ;;  %v8321_v12 = vand.u32 4294901760, %v5000_v55 }
  0x6a   :  { %693 = vmatmul.mubr.f32.gmra.mxu0 %v4958_v19  ;;  %1250 = vmatprep.subr.mxu1 %v4841_v16  ;;  %v8322_v16 = vand.u32 4294901760, %v5024_v13 }
  0x6b   :  { %698 = vmatprep.mubr.f32.mxu0 %v4761_v0  ;;  %1067 = vmatpush1.msra.mxu0 %v437_v3 }
  0x6c   :  { %889 = vmatmul.mubr.f32.gmra.mxu1 %v8317_v5 }
  0x6d   :  { %894 = vmatprep.mubr.f32.mxu1 %v4761_v0  ;;  %1252 = vmatpush1.msra.mxu1 %v4843_v17  ;;  %v8323_v17 = vand.u32 4294901760, %v5044_v47 }
  0x6e   :  { %701 = vmatmul.mubr.f32.gmra.mxu0 %v4975_v44 }
  0x6f   :  { %706 = vmatprep.mubr.f32.mxu0 %v4761_v0 }
  0x70   :  { %898 = vmatmul.mubr.f32.gmra.mxu1 %v8318_v6  ;;  %v2357_v6 = vld [vmem:[#allocation2 + $0xf8] sm:$0xff] }
  0x71   :  { %903 = vmatprep.mubr.f32.mxu1 %v4761_v0 }
  0x72   :  { %709 = vmatmul.mubr.f32.gmra.mxu0 %v4987_v48 }
  0x73   :  { %714 = vmatprep.mubr.f32.mxu0 %v4761_v0 }
  0x74   :  { %907 = vmatmul.mubr.f32.gmra.mxu1 %v8319_v10 }
  0x75   :  { %912 = vmatprep.mubr.f32.mxu1 %v4761_v0 }
  0x76   :  { %717 = vmatmul.mubr.f32.gmra.mxu0 %v5000_v55 }
  0x77   :  { %722 = vmatprep.mubr.f32.mxu0 %v4761_v0 }
  0x78   :  { %916 = vmatmul.mubr.f32.gmra.mxu1 %v8320_v11 }
  0x79   :  { %921 = vmatprep.mubr.f32.mxu1 %v4761_v0 }
  0x7a   :  { %725 = vmatmul.mubr.f32.gmra.mxu0 %v5024_v13 }
  0x7b   :  { %730 = vmatprep.mubr.f32.mxu0 %v4761_v0 }
  0x7c   :  { %925 = vmatmul.mubr.f32.gmra.mxu1 %v8321_v12  ;;  %v5411_v12 = vand.u32 4294901760, %v2357_v6 }
  0x7d   :  { %930 = vmatprep.mubr.f32.mxu1 %v4761_v0 }
  0x7e   :  { %733 = vmatmul.mubr.f32.gmra.mxu0 %v5044_v47  ;;  %8329 = vst [vmem:[#allocation8_spill] sm:$0xff] %v5411_v12  ;;  %4101 = vmatprep.subr.mxu0 %v5411_v12 }
  0x7f   :  { %738 = vmatprep.mubr.f32.mxu0 %v4761_v0 }
  0x80   :  { %934 = vmatmul.mubr.f32.gmra.mxu1 %v8322_v16 }
  0x81   :  { %939 = vmatprep.mubr.f32.mxu1 %v4761_v0 }
  0x82   :  { %741 = vmatmul.mubr.f32.gmra.mxu0 %v5066_v8 }
  0x83   :  { %746 = vmatprep.mubr.f32.mxu0 %v4761_v0 }
  0x84   :  { %943 = vmatmul.mubr.f32.gmra.mxu1 %v8323_v17 }
  0x85   :  { %948 = vmatprep.mubr.f32.mxu1 %v4761_v0 }
  0x86   :  { %749 = vmatmul.mubr.f32.gmra.mxu0 %v5083_v41 }
  0x87   :  { %754 = vmatprep.mubr.f32.mxu0 %v4761_v0 }
  0x88   :  { %952 = vmatmul.mubr.f32.gmra.mxu1 %v8324_v22  ;;  %v2341_v22 = vld [vmem:[#allocation2 + $0x78] sm:$0xff] }
  0x89   :  { %957 = vmatprep.mubr.f32.mxu1 %v4761_v0 }
  0x8a   :  { %757 = vmatmul.mubr.f32.gmra.mxu0 %v5093_v56 }
  0x8b   :  { %762 = vmatprep.mubr.f32.mxu0 %v4761_v0 }
  0x8c   :  { %961 = vmatmul.mubr.f32.gmra.mxu1 %v8325_v23  ;;  %v5416_v23 = vand.u32 4294901760, %v2341_v22 }
  0x8d   :  { %966 = vmatprep.mubr.f32.mxu1 %v4761_v0 }
  0x8e   :  { %765 = vmatmul.mubr.f32.gmra.mxu0 %v5116_v58  ;;  %8330 = vst [vmem:[#allocation9_spill] sm:$0xff] %v5416_v23 }
  0x8f   :  { %770 = vmatprep.mubr.f32.mxu0 %v4761_v0 }
  0x90   :  { %970 = vmatmul.mubr.f32.gmra.mxu1 %v8326_v24 }
  0x91   :  { %975 = vmatprep.mubr.f32.mxu1 %v4761_v0 }
  0x92   :  { %773 = vmatmul.mubr.f32.gmra.mxu0 %v5131_v46 }
  0x93   :  { %778 = vmatprep.mubr.f32.mxu0 %v4761_v0 }
  0x94   :  { %979 = vmatmul.mubr.f32.gmra.mxu1 %v8327_v26 }
  0x95   :  { %984 = vmatprep.mubr.f32.mxu1 %v4761_v0 }
  0x96   :  { %781 = vmatmul.mubr.f32.gmra.mxu0 %v5138_v20 }
  0x97   :  { %786 = vmatprep.mubr.f32.mxu0 %v4761_v0 }
  0x98   :  { %988 = vmatmul.mubr.f32.gmra.mxu1 %v8328_v28  ;;  %v5421_v28 = vsub.f32 %v2357_v6, %v5411_v12 }
  0x99   :  { %993 = vmatprep.mubr.f32.mxu1 %v4761_v0 }
  0x9a   :  { %789 = vmatmul.mubr.f32.gmra.mxu0 %v5154_v4  ;;  %8331 = vst [vmem:[#allocation10_spill] sm:$0xff] %v5421_v28 }
  0x9b   :  { %1100 = vmatprep.mubr.f32.mxu0 %v4761_v0 }
  0x9c   :  { %997 = vmatmul.mubr.f32.gmra.mxu1 %v349_v53 }
  0x9d   :  { %1002 = vmatprep.mubr.f32.mxu1 %v4761_v0 }
  0x9e   :  { %1102 = vmatmul.mubr.f32.vlgmr.msra.gmra.mxu0 %v4853_v21 }
  0x9f   :  { %1107 = vmatprep.mubr.f32.mxu0 %v4761_v0  ;;  %4102 = vmatpush3.msra.mxu0 %v5416_v23 }
  0xa0   :  { %1006 = vmatmul.mubr.f32.gmra.mxu1 %v360_v42 }
  0xa1   :  { %1285 = vmatprep.mubr.f32.mxu1 %v4761_v0 }
  0xa2   :  { %1109 = vmatmul.mubr.f32.gmra.mxu0 %v4885_v35 }
  0xa3   :  { %1114 = vmatprep.mubr.f32.mxu0 %v4761_v0 }
  0xa4   :  { %1287 = vmatmul.mubr.f32.vlgmr.msra.gmra.mxu1 %v4853_v21  ;;  %v61_v21 = vlaneseq }
  0xa5   :  { %1292 = vmatprep.mubr.f32.mxu1 %v4761_v0 }
  0xa6   :  { %1116 = vmatmul.mubr.f32.gmra.mxu0 %v4942_v1  ;;  %v5335_v29 = vshrl.u32 %v61_v21, 7 }
  0xa7   :  { %1121 = vmatprep.mubr.f32.mxu0 %v4761_v0 }
  0xa8   :  { %1294 = vmatmul.mubr.f32.gmra.mxu1 %v4885_v35  ;;  %v63_v30 = vsub.s32 0, %v5335_v29 }
  0xa9   :  { %1299 = vmatprep.mubr.f32.mxu1 %v4761_v0 }
  0xaa   :  { %1123 = vmatmul.mubr.f32.gmra.mxu0 %v4944_v2  ;;  %v5350_v32 = vrot.slane %v5346_v31, %v63_v30 }
  0xab   :  { %1128 = vmatprep.mubr.f32.mxu0 %v4761_v0 }
  0xac   :  { %1301 = vmatmul.mubr.f32.gmra.mxu1 %v4942_v1 }
  0xad   :  { %1306 = vmatprep.mubr.f32.mxu1 %v4761_v0 }
  0xae   :  { %1130 = vmatmul.mubr.f32.gmra.mxu0 %v4964_v27 }
  0xaf   :  { %1135 = vmatprep.mubr.f32.mxu0 %v4761_v0 }
  0xb0   :  { %1308 = vmatmul.mubr.f32.gmra.mxu1 %v4944_v2 }
  0xb1   :  { %1313 = vmatprep.mubr.f32.mxu1 %v4761_v0 }
  0xb2   :  { %1137 = vmatmul.mubr.f32.gmra.mxu0 %v4966_v33 }
  0xb3   :  { %1142 = vmatprep.mubr.f32.mxu0 %v4761_v0 }
  0xb4   :  { %1315 = vmatmul.mubr.f32.gmra.mxu1 %v4964_v27 }
  0xb5   :  { %1320 = vmatprep.mubr.f32.mxu1 %v4761_v0 }
  0xb6   :  { %1144 = vmatmul.mubr.f32.gmra.mxu0 %v4977_v45 }
  0xb7   :  { %1149 = vmatprep.mubr.f32.mxu0 %v4761_v0 }
  0xb8   :  { %1322 = vmatmul.mubr.f32.gmra.mxu1 %v4966_v33 }
  0xb9   :  { %1327 = vmatprep.mubr.f32.mxu1 %v4761_v0 }
  0xba   :  { %1151 = vmatmul.mubr.f32.gmra.mxu0 %v5007_v60 }
  0xbb   :  { %1156 = vmatprep.mubr.f32.mxu0 %v4761_v0 }
  0xbc   :  { %1329 = vmatmul.mubr.f32.gmra.mxu1 %v4977_v45 }
  0xbd   :  { %1334 = vmatprep.mubr.f32.mxu1 %v4761_v0 }
  0xbe   :  { %1158 = vmatmul.mubr.f32.gmra.mxu0 %v5026_v14 }
  0xbf   :  { %1163 = vmatprep.mubr.f32.mxu0 %v4761_v0 }
  0xc0   :  { %1336 = vmatmul.mubr.f32.gmra.mxu1 %v5007_v60 }
  0xc1   :  { %1341 = vmatprep.mubr.f32.mxu1 %v4761_v0 }
  0xc2   :  { %1165 = vmatmul.mubr.f32.gmra.mxu0 %v5046_v50 }
  0xc3   :  { %1170 = vmatprep.mubr.f32.mxu0 %v4761_v0 }
  0xc4   :  { %1343 = vmatmul.mubr.f32.gmra.mxu1 %v5026_v14 }
  0xc5   :  { %1348 = vmatprep.mubr.f32.mxu1 %v4761_v0 }
  0xc6   :  { %1172 = vmatmul.mubr.f32.gmra.mxu0 %v5068_v9 }
  0xc7   :  { %1177 = vmatprep.mubr.f32.mxu0 %v4761_v0 }
  0xc8   :  { %1350 = vmatmul.mubr.f32.gmra.mxu1 %v5046_v50 }
  0xc9   :  { %1355 = vmatprep.mubr.f32.mxu1 %v4761_v0 }
  0xca   :  { %1179 = vmatmul.mubr.f32.gmra.mxu0 %v5076_v18 }
  0xcb   :  { %1184 = vmatprep.mubr.f32.mxu0 %v4761_v0 }
  0xcc   :  { %1357 = vmatmul.mubr.f32.gmra.mxu1 %v5068_v9 }
  0xcd   :  { %1362 = vmatprep.mubr.f32.mxu1 %v4761_v0 }
  0xce   :  { %1186 = vmatmul.mubr.f32.gmra.mxu0 %v5100_v7 }
  0xcf   :  { %1191 = vmatprep.mubr.f32.mxu0 %v4761_v0 }
  0xd0   :  { %1364 = vmatmul.mubr.f32.gmra.mxu1 %v5076_v18 }
  0xd1   :  { %1369 = vmatprep.mubr.f32.mxu1 %v4761_v0 }
  0xd2   :  { %1193 = vmatmul.mubr.f32.gmra.mxu0 %v5108_v57 }
  0xd3   :  { %1198 = vmatprep.mubr.f32.mxu0 %v4761_v0 }
  0xd4   :  { %1371 = vmatmul.mubr.f32.gmra.mxu1 %v5100_v7 }
  0xd5   :  { %1376 = vmatprep.mubr.f32.mxu1 %v4761_v0 }
  0xd6   :  { %1200 = vmatmul.mubr.f32.gmra.mxu0 %v5124_v62 }
  0xd7   :  { %1205 = vmatprep.mubr.f32.mxu0 %v4761_v0 }
  0xd8   :  { %1378 = vmatmul.mubr.f32.gmra.mxu1 %v5108_v57 }
  0xd9   :  { %1383 = vmatprep.mubr.f32.mxu1 %v4761_v0 }
  0xda   :  { %1207 = vmatmul.mubr.f32.gmra.mxu0 %v5144_v39 }
  0xdc   :  { %1385 = vmatmul.mubr.f32.gmra.mxu1 %v5124_v62 }
  0xdd   :  { %v199_v34 = vpop.f32.mrf.mxu0  ;;  %1390 = vmatprep.mubr.f32.mxu1 %v4761_v0 }
  0xde   :  { %v200_v36 = vadd.f32 %v199_v34, %v5350_v32  ;;  %v5428_v34 = vsub.f32 %v2341_v22, %v5416_v23 }
  0xdf   :  { %v5353_v35 = vpop.f32.mrf.mxu0 }
  0xe0   :  { %1392 = vmatmul.mubr.f32.gmra.mxu1 %v5144_v39  ;;  %8332 = vst [vmem:[#allocation11_spill] sm:$0xff] %v5428_v34 }
  0xe1   :  { %v210_v37 = vpop.f32.mrf.mxu0 }
  0xe2   :  { %v211_v54 = vadd.f32 %v210_v37, %v5350_v32 }
  0xe3   :  { %v5357_v43 = vpop.f32.mrf.mxu0  ;;  %v476_v52 = vpop.f32.mrf.mxu1 }
  0xe4   :  { %v5360_v59 = vadd.f32 %v476_v52, %v200_v36  ;;  %v2356_v36 = vld [vmem:[#allocation2 + $0xf0] sm:$0xff] }
  0xe5   :  { %v221_v63 = vpop.f32.mrf.mxu0  ;;  %v5362_v1 = vpop.f32.mrf.mxu1 }
  0xe6   :  { %v222_v3 = vadd.f32 %v221_v63, %v5350_v32  ;;  %v5433_v63 = vand.u32 4294901760, %v2356_v36 }
  0xe7   :  { %v5364_v2 = vpop.f32.mrf.mxu0 }
  0xe8   :  { %v483_v0 = vpop.f32.mrf.mxu1  ;;  %8333 = vst [vmem:[#allocation12_spill] sm:$0xff] %v5433_v63  ;;  %4103 = vmatprep.subr.mxu0 %v5433_v63 }
  0xe9   :  { %v5367_v15 = vadd.f32 %v483_v0, %v211_v54  ;;  %v232_v19 = vpop.f32.mrf.mxu0  ;;  %v8016_v54 = vand.u32 4294901760, %v5421_v28 }
  0xea   :  { %v5369_v27 = vpop.f32.mrf.mxu1  ;;  %v233_v44 = vadd.f32 %v232_v19, %v5350_v32 }
  0xeb   :  { %v5371_v33 = vpop.f32.mrf.mxu0  ;;  %v2818_v19 = vsub.f32 %v5421_v28, %v8016_v54 }
  0xec   :  { %v490_v39 = vpop.f32.mrf.mxu1 }
  0xed   :  { %v5374_v45 = vadd.f32 %v490_v39, %v222_v3  ;;  %v243_v48 = vpop.f32.mrf.mxu0 }
  0xee   :  { %v5376_v55 = vpop.f32.mrf.mxu1  ;;  %v244_v7 = vadd.f32 %v243_v48, %v5350_v32  ;;  %v8015_v48 = vand.u32 4294901760, %v5428_v34 }
  0xef   :  { %v5378_v58 = vpop.f32.mrf.mxu0 }
  0xf0   :  { %v497_v60 = vpop.f32.mrf.mxu1 }
  0xf1   :  { %v5381_v13 = vadd.f32 %v497_v60, %v233_v44  ;;  %v254_v14 = vpop.f32.mrf.mxu0  ;;  %v2340_v60 = vld [vmem:[#allocation2 + $0x70] sm:$0xff] }
  0xf2   :  { %v5383_v46 = vpop.f32.mrf.mxu1  ;;  %v255_v8 = vadd.f32 %v254_v14, %v5350_v32 }
  0xf3   :  { %v5385_v47 = vpop.f32.mrf.mxu0 }
  0xf4   :  { %v504_v50 = vpop.f32.mrf.mxu1 }
  0xf5   :  { %v5388_v9 = vadd.f32 %v504_v50, %v244_v7  ;;  %v265_v18 = vpop.f32.mrf.mxu0  ;;  %v2819_v50 = vand.u32 4294901760, %v2818_v19 }
  0xf6   :  { %v5390_v41 = vpop.f32.mrf.mxu1  ;;  %v266_v62 = vadd.f32 %v265_v18, %v5350_v32  ;;  %v2706_v18 = vsub.f32 %v5428_v34, %v8015_v48 }
  0xf7   :  { %v5392_v56 = vpop.f32.mrf.mxu0  ;;  %4181 = vmatprep.subr.mxu1 %v2819_v50 }
  0xf8   :  { %v511_v57 = vpop.f32.mrf.mxu1 }
  0xf9   :  { %v5395_v51 = vadd.f32 %v511_v57, %v255_v8  ;;  %v276_v20 = vpop.f32.mrf.mxu0  ;;  %v5447_v8 = vand.u32 4294901760, %v2340_v60  ;;  %v5453_v57 = vsub.f32 %v2356_v36, %v5433_v63 }
  0xfa   :  { %v5397_v61 = vpop.f32.mrf.mxu1  ;;  %v277_v4 = vadd.f32 %v276_v20, %v5350_v32 }
  0xfb   :  { %v5399_v25 = vpop.f32.mrf.mxu0  ;;  %8334 = vst [vmem:[#allocation13_spill] sm:$0xff] %v5447_v8  ;;  %8335 = vst [vmem:[#allocation14_spill] sm:$0xff] %v5453_v57  ;;  %4104 = vmatpush3.msra.mxu0 %v5447_v8  ;;  %v5477_v50 = vsub.f32 %v2340_v60, %v5447_v8 }
  0xfc   :  { %v518_v53 = vpop.f32.mrf.mxu1 }
  0xfd   :  { %v5402_v38 = vadd.f32 %v518_v53, %v266_v62  ;;  %v287_v42 = vpop.f32.mrf.mxu0  ;;  %8340 = vst [vmem:[#allocation19_spill] sm:$0xff] %v5477_v50 }
  0xfe   :  { %v5404_v40 = vpop.f32.mrf.mxu1  ;;  %v288_v10 = vadd.f32 %v287_v42, %v5350_v32  ;;  %v2707_v42 = vand.u32 4294901760, %v2706_v18  ;;  %v2355_v18 = vld [vmem:[#allocation2 + $0xe8] sm:$0xff] }
  0xff   :  { %v5406_v49 = vpop.f32.mrf.mxu0 }
 0x100   :  { %v525_v5 = vpop.f32.mrf.mxu1  ;;  %4182 = vmatpush3.msra.mxu1 %v2707_v42 }
 0x101   :  { %v5409_v11 = vadd.f32 %v525_v5, %v277_v4  ;;  %v298_v16 = vpop.f32.mrf.mxu0  ;;  %v8014_v5 = vand.u32 4294901760, %v5453_v57 }
 0x102   :  { %v5413_v17 = vpop.f32.mrf.mxu1  ;;  %v299_v21 = vadd.f32 %v298_v16, %v5350_v32 }
 0x103   :  { %v5418_v24 = vpop.f32.mrf.mxu0  ;;  %v2825_v16 = vsub.f32 %v5453_v57, %v8014_v5  ;;  %v5482_v5 = vand.u32 4294901760, %v2355_v18 }
 0x104   :  { %v532_v26 = vpop.f32.mrf.mxu1 }
 0x105   :  { %v5424_v30 = vadd.f32 %v532_v26, %v288_v10  ;;  %v309_v37 = vpop.f32.mrf.mxu0  ;;  %8341 = vst [vmem:[#allocation20_spill] sm:$0xff] %v5482_v5  ;;  %4105 = vmatprep.subr.mxu0 %v5482_v5 }
 0x106   :  { %v5430_v52 = vpop.f32.mrf.mxu1  ;;  %v310_v39 = vadd.f32 %v309_v37, %v5350_v32  ;;  %v2826_v37 = vand.u32 4294901760, %v2825_v16 }
 0x107   :  { %v5435_v0 = vpop.f32.mrf.mxu0 }
 0x108   :  { %v539_v3 = vpop.f32.mrf.mxu1  ;;  %4183 = vmatprep.subr.mxu1 %v2826_v37  ;;  %v8031_v37 = vand.u32 4294901760, %v5477_v50 }
 0x109   :  { %v5442_v44 = vadd.f32 %v539_v3, %v299_v21  ;;  %v320_v7 = vpop.f32.mrf.mxu0 }
 0x10a   :  { %v5445_v14 = vpop.f32.mrf.mxu1  ;;  %v321_v53 = vadd.f32 %v320_v7, %v5350_v32 }
 0x10b   :  { %v5455_v62 = vpop.f32.mrf.mxu0 }
 0x10c   :  { %v546_v20 = vpop.f32.mrf.mxu1 }
 0x10d   :  { %v5459_v4 = vadd.f32 %v546_v20, %v310_v39  ;;  %v331_v6 = vpop.f32.mrf.mxu0 }
 0x10e   :  { %v5462_v10 = vpop.f32.mrf.mxu1  ;;  %v332_v21 = vadd.f32 %v331_v6, %v5350_v32 }
 0x10f   :  { %8336 = vst [vmem:[#allocation15_spill] sm:$0xff] %v5462_v10  ;;  %v5467_v22 = vpop.f32.mrf.mxu0 }
 0x110   :  { %8337 = vst [vmem:[#allocation16_spill] sm:$0xff] %v5467_v22  ;;  %v553_v26 = vpop.f32.mrf.mxu1 }
 0x111   :  { %v5470_v36 = vadd.f32 %v553_v26, %v321_v53  ;;  %v342_v3 = vpop.f32.mrf.mxu0 }
 0x112   :  { %v5472_v19 = vpop.f32.mrf.mxu1  ;;  %v343_v20 = vadd.f32 %v342_v3, %v5350_v32 }
 0x113   :  { %8338 = vst [vmem:[#allocation17_spill] sm:$0xff] %v5472_v19  ;;  %v5474_v39 = vpop.f32.mrf.mxu0 }
 0x114   :  { %8339 = vst [vmem:[#allocation18_spill] sm:$0xff] %v5474_v39  ;;  %v560_v7 = vpop.f32.mrf.mxu1 }
 0x115   :  { %v5480_v42 = vadd.f32 %v560_v7, %v332_v21  ;;  %v353_v53 = vpop.f32.mrf.mxu0  ;;  %v2713_v21 = vsub.f32 %v5477_v50, %v8031_v37 }
 0x116   :  { %v5484_v6 = vpop.f32.mrf.mxu1  ;;  %v354_v60 = vadd.f32 %v353_v53, %v5350_v32 }
 0x117   :  { %8342 = vst [vmem:[#allocation21_spill] sm:$0xff] %v5484_v6  ;;  %v5487_v16 = vpop.f32.mrf.mxu0  ;;  %v2714_v57 = vand.u32 4294901760, %v2713_v21  ;;  %v5539_v6 = vsub.f32 %v2355_v18, %v5482_v5 }
 0x118   :  { %8343 = vst [vmem:[#allocation22_spill] sm:$0xff] %v5487_v16  ;;  %v567_v26 = vpop.f32.mrf.mxu1  ;;  %v2339_v16 = vld [vmem:[#allocation2 + $0x68] sm:$0xff] }
 0x119   :  { %v5491_v48 = vadd.f32 %v567_v26, %v343_v20  ;;  %v364_v54 = vpop.f32.mrf.mxu0  ;;  %4184 = vmatpush3.msra.mxu1 %v2714_v57  ;;  %8350 = vst [vmem:[#allocation29_spill] sm:$0xff] %v5539_v6 }
 0x11a   :  { %v5493_v3 = vpop.f32.mrf.mxu1  ;;  %v365_v34 = vadd.f32 %v364_v54, %v5350_v32 }
 0x11b   :  { %8344 = vst [vmem:[#allocation23_spill] sm:$0xff] %v5493_v3  ;;  %v5498_v7 = vpop.f32.mrf.mxu0 }
 0x11c   :  { %8345 = vst [vmem:[#allocation24_spill] sm:$0xff] %v5498_v7  ;;  %v574_v8 = vpop.f32.mrf.mxu1 }
 0x11d   :  { %v5501_v63 = vadd.f32 %v574_v8, %v354_v60  ;;  %v670_v23 = vpop.f32.mrf.mxu0 }
 0x11e   :  { %v5503_v12 = vpop.f32.mrf.mxu1  ;;  %v671_v20 = vadd.f32 %v670_v23, %v5360_v59 }
 0x11f   :  { %8346 = vst [vmem:[#allocation25_spill] sm:$0xff] %v5503_v12  ;;  %v5506_v53 = vpop.f32.mrf.mxu0 }
 0x120   :  { %v581_v26 = vpop.f32.mrf.mxu1 }
 0x121   :  { %v5508_v28 = vadd.f32 %v581_v26, %v365_v34  ;;  %v678_v37 = vpop.f32.mrf.mxu0 }
 0x122   :  { %v5510_v50 = vpop.f32.mrf.mxu1  ;;  %v679_v21 = vadd.f32 %v678_v37, %v5367_v15 }
 0x123   :  { %8347 = vst [vmem:[#allocation26_spill] sm:$0xff] %v5510_v50  ;;  %v5513_v7 = vpop.f32.mrf.mxu0 }
 0x124   :  { %v872_v32 = vpop.f32.mrf.mxu1 }
 0x125   :  { %v5515_v54 = vadd.f32 %v872_v32, %v671_v20 }
 0x126   :  { %v686_v8 = vpop.f32.mrf.mxu0  ;;  %v5517_v60 = vpop.f32.mrf.mxu1 }
 0x127   :  { %v687_v59 = vadd.f32 %v686_v8, %v5374_v45  ;;  %v5534_v8 = vand.u32 4294901760, %v2339_v16 }
 0x128   :  { %v5520_v23 = vpop.f32.mrf.mxu0  ;;  %v881_v57 = vpop.f32.mrf.mxu1 }
 0x129   :  { %v5522_v34 = vadd.f32 %v881_v57, %v679_v21  ;;  %8348 = vst [vmem:[#allocation27_spill] sm:$0xff] %v5534_v8  ;;  %4106 = vmatpush3.msra.mxu0 %v5534_v8 }
 0x12a   :  { %v694_v26 = vpop.f32.mrf.mxu0  ;;  %v5524_v12 = vpop.f32.mrf.mxu1 }
 0x12b   :  { %v695_v15 = vadd.f32 %v694_v26, %v5381_v13  ;;  %v8038_v26 = vand.u32 4294901760, %v5539_v6 }
 0x12c   :  { %v5527_v37 = vpop.f32.mrf.mxu0  ;;  %v890_v50 = vpop.f32.mrf.mxu1 }
 0x12d   :  { %v5529_v20 = vadd.f32 %v890_v50, %v687_v59  ;;  %v2832_v18 = vsub.f32 %v5539_v6, %v8038_v26 }
 0x12e   :  { %v702_v32 = vpop.f32.mrf.mxu0  ;;  %v5531_v3 = vpop.f32.mrf.mxu1 }
 0x12f   :  { %v703_v45 = vadd.f32 %v702_v32, %v5388_v9  ;;  %v5549_v9 = vsub.f32 %v2339_v16, %v5534_v8  ;;  %v2354_v32 = vld [vmem:[#allocation2 + $0xe0] sm:$0xff]  ;;  %v2833_v10 = vand.u32 4294901760, %v2832_v18 }
 0x130   :  { %v5536_v21 = vpop.f32.mrf.mxu0  ;;  %v899_v57 = vpop.f32.mrf.mxu1 }
 0x131   :  { %8349 = vst [vmem:[#allocation28_spill] sm:$0xff] %v5536_v21  ;;  %v5541_v13 = vadd.f32 %v899_v57, %v695_v15  ;;  %8351 = vst [vmem:[#allocation30_spill] sm:$0xff] %v5549_v9  ;;  %v5556_v15 = vand.u32 4294901760, %v2354_v32  ;;  %v8041_v16 = vand.u32 4294901760, %v5549_v9  ;;  %4185 = vmatprep.subr.mxu1 %v2833_v10 }
 0x132   :  { %v710_v50 = vpop.f32.mrf.mxu0  ;;  %v5544_v59 = vpop.f32.mrf.mxu1 }
 0x133   :  { %v711_v39 = vadd.f32 %v710_v50, %v5395_v51  ;;  %8353 = vst [vmem:[#allocation32_spill] sm:$0xff] %v5556_v15  ;;  %4107 = vmatprep.subr.mxu0 %v5556_v15  ;;  %v2338_v50 = vld [vmem:[#allocation2 + $0x60] sm:$0xff] }
 0x134   :  { %v5551_v21 = vpop.f32.mrf.mxu0  ;;  %v908_v19 = vpop.f32.mrf.mxu1  ;;  %v5567_v26 = vand.u32 4294901760, %v2338_v50 }
 0x135   :  { %8352 = vst [vmem:[#allocation31_spill] sm:$0xff] %v5551_v21  ;;  %v5558_v57 = vadd.f32 %v908_v19, %v703_v45  ;;  %v2720_v19 = vsub.f32 %v5549_v9, %v8041_v16  ;;  %v5575_v45 = vsub.f32 %v2354_v32, %v5556_v15 }
 0x136   :  { %v718_v5 = vpop.f32.mrf.mxu0  ;;  %v5560_v22 = vpop.f32.mrf.mxu1  ;;  %8355 = vst [vmem:[#allocation34_spill] sm:$0xff] %v5567_v26  ;;  %4108 = vmatpush3.msra.mxu0 %v5567_v26  ;;  %v5582_v10 = vsub.f32 %v2338_v50, %v5567_v26 }
 0x137   :  { %8354 = vst [vmem:[#allocation33_spill] sm:$0xff] %v5558_v57  ;;  %v719_v51 = vadd.f32 %v718_v5, %v5402_v38  ;;  %8357 = vst [vmem:[#allocation36_spill] sm:$0xff] %v5575_v45  ;;  %v2721_v57 = vand.u32 4294901760, %v2720_v19 }
 0x138   :  { %v5565_v8 = vpop.f32.mrf.mxu0  ;;  %v917_v21 = vpop.f32.mrf.mxu1  ;;  %8359 = vst [vmem:[#allocation38_spill] sm:$0xff] %v5582_v10 }
 0x139   :  { %v5569_v6 = vadd.f32 %v917_v21, %v711_v39  ;;  %v8048_v39 = vand.u32 4294901760, %v5575_v45  ;;  %v2353_v21 = vld [vmem:[#allocation2 + $0xd8] sm:$0xff]  ;;  %4186 = vmatpush3.msra.mxu1 %v2721_v57 }
 0x13a   :  { %v726_v18 = vpop.f32.mrf.mxu0  ;;  %v5577_v38 = vpop.f32.mrf.mxu1  ;;  %v5587_v9 = vand.u32 4294901760, %v2353_v21 }
 0x13b   :  { %8356 = vst [vmem:[#allocation35_spill] sm:$0xff] %v5569_v6  ;;  %8358 = vst [vmem:[#allocation37_spill] sm:$0xff] %v5577_v38  ;;  %v727_v5 = vadd.f32 %v726_v18, %v5409_v11  ;;  %v2839_v15 = vsub.f32 %v5575_v45, %v8048_v39  ;;  %v2337_v11 = vld [vmem:[#allocation2 + $0x58] sm:$0xff]  ;;  %v8053_v38 = vand.u32 4294901760, %v5582_v10 }
 0x13c   :  { %v5585_v6 = vpop.f32.mrf.mxu0  ;;  %v926_v16 = vpop.f32.mrf.mxu1  ;;  %8361 = vst [vmem:[#allocation40_spill] sm:$0xff] %v5587_v9  ;;  %4109 = vmatprep.subr.mxu0 %v5587_v9  ;;  %v5597_v50 = vand.u32 4294901760, %v2337_v11 }
 0x13d   :  { %8360 = vst [vmem:[#allocation39_spill] sm:$0xff] %v5585_v6  ;;  %v5589_v32 = vadd.f32 %v926_v16, %v719_v51  ;;  %v2840_v6 = vand.u32 4294901760, %v2839_v15  ;;  %v5605_v16 = vsub.f32 %v2353_v21, %v5587_v9  ;;  %v2727_v45 = vsub.f32 %v5582_v10, %v8053_v38 }
 0x13e   :  { %v734_v19 = vpop.f32.mrf.mxu0  ;;  %v5594_v18 = vpop.f32.mrf.mxu1  ;;  %8364 = vst [vmem:[#allocation43_spill] sm:$0xff] %v5597_v50  ;;  %4110 = vmatpush3.msra.mxu0 %v5597_v50 }
 0x13f   :  { %8362 = vst [vmem:[#allocation41_spill] sm:$0xff] %v5589_v32  ;;  %8363 = vst [vmem:[#allocation42_spill] sm:$0xff] %v5594_v18  ;;  %v735_v26 = vadd.f32 %v734_v19, %v5424_v30  ;;  %4187 = vmatprep.subr.mxu1 %v2840_v6  ;;  %v5613_v30 = vsub.f32 %v2337_v11, %v5597_v50  ;;  %v8058_v32 = vand.u32 4294901760, %v5605_v16  ;;  %v2728_v21 = vand.u32 4294901760, %v2727_v45  ;;  %v2336_v45 = vld [vmem:[#allocation2 + $0x50] sm:$0xff] }
 0x140   :  { %v5601_v51 = vpop.f32.mrf.mxu0  ;;  %v935_v57 = vpop.f32.mrf.mxu1  ;;  %8366 = vst [vmem:[#allocation45_spill] sm:$0xff] %v5605_v16 }
 0x141   :  { %8365 = vst [vmem:[#allocation44_spill] sm:$0xff] %v5601_v51  ;;  %v5607_v39 = vadd.f32 %v935_v57, %v727_v5  ;;  %8368 = vst [vmem:[#allocation47_spill] sm:$0xff] %v5613_v30  ;;  %v2352_v51 = vld [vmem:[#allocation2 + $0xd0] sm:$0xff]  ;;  %v2846_v57 = vsub.f32 %v5605_v16, %v8058_v32  ;;  %4188 = vmatpush3.msra.mxu1 %v2728_v21  ;;  %v8061_v38 = vand.u32 4294901760, %v5613_v30 }
 0x142   :  { %v742_v15 = vpop.f32.mrf.mxu0  ;;  %v5615_v19 = vpop.f32.mrf.mxu1  ;;  %v5619_v9 = vand.u32 4294901760, %v2352_v51 }
 0x143   :  { %8367 = vst [vmem:[#allocation46_spill] sm:$0xff] %v5607_v39  ;;  %v743_v18 = vadd.f32 %v742_v15, %v5442_v44  ;;  %v2847_v44 = vand.u32 4294901760, %v2846_v57  ;;  %v2734_v39 = vsub.f32 %v5613_v30, %v8061_v38  ;;  %v2351_v30 = vld [vmem:[#allocation2 + $0xc8] sm:$0xff] }
 0x144   :  { %8369 = vst [vmem:[#allocation48_spill] sm:$0xff] %v5619_v9  ;;  %v5621_v5 = vpop.f32.mrf.mxu0  ;;  %v944_v6 = vpop.f32.mrf.mxu1  ;;  %4111 = vmatprep.subr.mxu0 %v5619_v9 }
 0x145   :  { %8370 = vst [vmem:[#allocation49_spill] sm:$0xff] %v5621_v5  ;;  %v5626_v11 = vadd.f32 %v944_v6, %v735_v26  ;;  %v5636_v5 = vand.u32 4294901760, %v2336_v45  ;;  %4189 = vmatprep.subr.mxu1 %v2847_v44  ;;  %v2735_v32 = vand.u32 4294901760, %v2734_v39  ;;  %v5655_v44 = vand.u32 4294901760, %v2351_v30 }
 0x146   :  { %v750_v50 = vpop.f32.mrf.mxu0  ;;  %v5630_v10 = vpop.f32.mrf.mxu1 }
 0x147   :  { %8371 = vst [vmem:[#allocation50_spill] sm:$0xff] %v5626_v11  ;;  %v751_v15 = vadd.f32 %v750_v50, %v5459_v4  ;;  %8372 = vst [vmem:[#allocation51_spill] sm:$0xff] %v5636_v5  ;;  %4112 = vmatpush3.msra.mxu0 %v5636_v5  ;;  %v5646_v4 = vsub.f32 %v2336_v45, %v5636_v5  ;;  %v5649_v50 = vsub.f32 %v2352_v51, %v5619_v9 }
 0x148   :  { %v5638_v26 = vpop.f32.mrf.mxu0  ;;  %v953_v21 = vpop.f32.mrf.mxu1  ;;  %4190 = vmatpush3.msra.mxu1 %v2735_v32  ;;  %8378 = vst [vmem:[#allocation57_spill] sm:$0xff] %v5655_v44  ;;  %4113 = vmatprep.subr.mxu0 %v5655_v44 }
 0x149   :  { %v5640_v6 = vadd.f32 %v953_v21, %v743_v18  ;;  %8375 = vst [vmem:[#allocation54_spill] sm:$0xff] %v5646_v4  ;;  %8376 = vst [vmem:[#allocation55_spill] sm:$0xff] %v5649_v50  ;;  %v8068_v39 = vand.u32 4294901760, %v5649_v50 }
 0x14a   :  { %v758_v16 = vpop.f32.mrf.mxu0  ;;  %v5643_v57 = vpop.f32.mrf.mxu1 }
 0x14b   :  { %8373 = vst [vmem:[#allocation52_spill] sm:$0xff] %v5640_v6  ;;  %8374 = vst [vmem:[#allocation53_spill] sm:$0xff] %v5643_v57  ;;  %v759_v38 = vadd.f32 %v758_v16, %v5470_v36  ;;  %v2853_v51 = vsub.f32 %v5649_v50, %v8068_v39  ;;  %v8071_v36 = vand.u32 4294901760, %v5646_v4 }
 0x14c   :  { %v5652_v11 = vpop.f32.mrf.mxu0  ;;  %v962_v18 = vpop.f32.mrf.mxu1 }
 0x14d   :  { %8377 = vst [vmem:[#allocation56_spill] sm:$0xff] %v5652_v11  ;;  %v5657_v21 = vadd.f32 %v962_v18, %v751_v15  ;;  %v2854_v5 = vand.u32 4294901760, %v2853_v51  ;;  %v2741_v15 = vsub.f32 %v5646_v4, %v8071_v36 }
 0x14e   :  { %v766_v6 = vpop.f32.mrf.mxu0  ;;  %v5659_v57 = vpop.f32.mrf.mxu1 }
 0x14f   :  { %8379 = vst [vmem:[#allocation58_spill] sm:$0xff] %v5657_v21  ;;  %8380 = vst [vmem:[#allocation59_spill] sm:$0xff] %v5659_v57  ;;  %v767_v32 = vadd.f32 %v766_v6, %v5480_v42  ;;  %4191 = vmatprep.subr.mxu1 %v2854_v5  ;;  %v2742_v39 = vand.u32 4294901760, %v2741_v15  ;;  %v67_v6 = vsub.s32 1, %v5335_v29 }
 0x150   :  { %v5667_v16 = vpop.f32.mrf.mxu0  ;;  %v971_v45 = vpop.f32.mrf.mxu1 }
 0x151   :  { %8381 = vst [vmem:[#allocation60_spill] sm:$0xff] %v5667_v16  ;;  %v5672_v18 = vadd.f32 %v971_v45, %v759_v38  ;;  %4192 = vmatpush3.msra.mxu1 %v2742_v39  ;;  %v5688_v5 = vrot.slane %v5346_v31, %v67_v6  ;;  %v5694_v39 = vld [vmem:[#allocation2 + $0x48] sm:$0xff] }
 0x152   :  { %v774_v9 = vpop.f32.mrf.mxu0  ;;  %v5674_v21 = vpop.f32.mrf.mxu1  ;;  %8385 = vst [vmem:[#allocation64_spill] sm:$0xff] %v5694_v39 }
 0x153   :  { %8382 = vst [vmem:[#allocation61_spill] sm:$0xff] %v5672_v18  ;;  %v775_v50 = vadd.f32 %v774_v9, %v5491_v48  ;;  %v202_v31 = vadd.f32 %v5353_v35, %v5688_v5 }
 0x154   :  { %v5677_v57 = vpop.f32.mrf.mxu0  ;;  %v980_v42 = vpop.f32.mrf.mxu1 }
 0x155   :  { %v5680_v51 = vadd.f32 %v980_v42, %v767_v32  ;;  %v5698_v32 = vand.u32 4294901760, %v5694_v39 }
 0x156   :  { %v782_v16 = vpop.f32.mrf.mxu0  ;;  %v5682_v11 = vpop.f32.mrf.mxu1 }
 0x157   :  { %8383 = vst [vmem:[#allocation62_spill] sm:$0xff] %v5680_v51  ;;  %v783_v38 = vadd.f32 %v782_v16, %v5501_v63  ;;  %8386 = vst [vmem:[#allocation65_spill] sm:$0xff] %v5698_v32  ;;  %v5703_v16 = vsub.f32 %v2351_v30, %v5655_v44  ;;  %4114 = vmatpush3.msra.mxu0 %v5698_v32 }
 0x158   :  { %v5685_v45 = vpop.f32.mrf.mxu0  ;;  %v989_v36 = vpop.f32.mrf.mxu1 }
 0x159   :  { %v5690_v48 = vadd.f32 %v989_v36, %v775_v50  ;;  %8387 = vst [vmem:[#allocation66_spill] sm:$0xff] %v5703_v16 }
 0x15a   :  { %v790_v9 = vpop.f32.mrf.mxu0  ;;  %v5692_v15 = vpop.f32.mrf.mxu1 }
 0x15b   :  { %8384 = vst [vmem:[#allocation63_spill] sm:$0xff] %v5690_v48  ;;  %v791_v29 = vadd.f32 %v790_v9, %v5508_v28  ;;  %v8079_v28 = vand.u32 4294901760, %v5703_v16  ;;  %v479_v9 = vadd.f32 %v5362_v1, %v202_v31 }
 0x15c   :  { %v5700_v42 = vpop.f32.mrf.mxu0  ;;  %v998_v63 = vpop.f32.mrf.mxu1 }
 0x15d   :  { %v5707_v50 = vadd.f32 %v998_v63, %v783_v38  ;;  %v2860_v30 = vsub.f32 %v5703_v16, %v8079_v28  ;;  %v673_v44 = vadd.f32 %v5506_v53, %v479_v9  ;;  %v213_v38 = vadd.f32 %v5357_v43, %v5688_v5 }
 0x15e   :  { %v1103_v36 = vpop.f32.mrf.mxu0  ;;  %v5710_v6 = vpop.f32.mrf.mxu1 }
 0x15f   :  { %8388 = vst [vmem:[#allocation67_spill] sm:$0xff] %v5707_v50  ;;  %v2861_v51 = vand.u32 4294901760, %v2860_v30  ;;  %v875_v18 = vadd.f32 %v5517_v60, %v673_v44  ;;  %v1104_v1 = vadd.f32 %v1103_v36, %v5515_v54  ;;  %v486_v31 = vadd.f32 %v5369_v27, %v213_v38 }
 0x160   :  { %v1105_v4 = vpop.f32.mrf.mxu0  ;;  %v1007_v48 = vpop.f32.mrf.mxu1 }
 0x161   :  { %v5718_v35 = vadd.f32 %v1007_v48, %v791_v29  ;;  %4193 = vmatprep.subr.mxu1 %v2861_v51  ;;  %v1106_v28 = vadd.f32 %v1105_v4, %v875_v18  ;;  %v681_v48 = vadd.f32 %v5513_v7, %v486_v31 }
 0x162   :  { %v1110_v63 = vpop.f32.mrf.mxu0  ;;  %v5722_v50 = vpop.f32.mrf.mxu1 }
 0x163   :  { %8389 = vst [vmem:[#allocation68_spill] sm:$0xff] %v5718_v35  ;;  %v884_v60 = vadd.f32 %v5524_v12, %v681_v48  ;;  %v1111_v54 = vadd.f32 %v1110_v63, %v5522_v34  ;;  %v246_v48 = vadd.f32 %v5378_v58, %v5688_v5  ;;  %v257_v58 = vadd.f32 %v5385_v47, %v5688_v5 }
 0x164   :  { %v1112_v39 = vpop.f32.mrf.mxu0  ;;  %v1288_v32 = vpop.f32.mrf.mxu1 }
 0x165   :  { %v5727_v53 = vadd.f32 %v1288_v32, %v1104_v1  ;;  %v1113_v18 = vadd.f32 %v1112_v39, %v884_v60  ;;  %v224_v32 = vadd.f32 %v5364_v2, %v5688_v5  ;;  %v235_v2 = vadd.f32 %v5371_v33, %v5688_v5 }
 0x166   :  { %v1290_v29 = vpop.f32.mrf.mxu1  ;;  %v1117_v44 = vpop.f32.mrf.mxu0  ;;  %v507_v16 = vadd.f32 %v5390_v41, %v246_v48 }
 0x167   :  { %v5731_v43 = vmul.f32 0.70710677, %v5727_v53  ;;  %v5733_v9 = vadd.f32 %v1290_v29, %v1106_v28  ;;  %v493_v39 = vadd.f32 %v5376_v55, %v224_v32  ;;  %v1118_v55 = vadd.f32 %v1117_v44, %v5529_v20 }
 0x168   :  { %v1295_v27 = vpop.f32.mrf.mxu1  ;;  %v1119_v34 = vpop.f32.mrf.mxu0  ;;  %v500_v33 = vadd.f32 %v5383_v46, %v235_v2  ;;  %v514_v46 = vadd.f32 %v5397_v61, %v257_v58  ;;  %v279_v2 = vadd.f32 %v5399_v25, %v5688_v5 }
 0x169   :  { %v5738_v36 = vand.u32 2147483647, %v5731_v43  ;;  %v5741_v4 = vmul.f32 0.70710677, %v5733_v9  ;;  %v5743_v7 = vadd.f32 %v1295_v27, %v1111_v54  ;;  %v689_v27 = vadd.f32 %v5520_v23, %v493_v39 }
 0x16a   :  { %v1297_v51 = vpop.f32.mrf.mxu1  ;;  %v1124_v32 = vpop.f32.mrf.mxu0  ;;  %v268_v23 = vadd.f32 %v5392_v56, %v5688_v5  ;;  %v697_v41 = vadd.f32 %v5527_v37, %v500_v33  ;;  %v528_v33 = vadd.f32 %v5413_v17, %v279_v2  ;;  %v323_v17 = vadd.f32 %v5455_v62, %v5688_v5  ;;  %v8401_v62 = vld [vmem:[#allocation18_spill] sm:$0xff] }
 0x16b   :  { %8390 = vst [vmem:[#allocation69_spill] sm:$0xff] %v5741_v4  ;;  %v1494_v28 = vmul.f32 0.3275911, %v5738_v36  ;;  %v5749_v12 = vand.u32 2147483647, %v5741_v4  ;;  %v5754_v38 = vadd.f32 %v1297_v51, %v1113_v18  ;;  %v893_v20 = vadd.f32 %v5531_v3, %v689_v27 }
 0x16c   :  { %v5752_v30 = vmul.f32 0.70710677, %v5743_v7  ;;  %v1302_v63 = vpop.f32.mrf.mxu1  ;;  %v290_v3 = vadd.f32 %v5406_v49, %v5688_v5  ;;  %v1125_v61 = vadd.f32 %v1124_v32, %v5541_v13  ;;  %v1126_v27 = vpop.f32.mrf.mxu0  ;;  %v902_v25 = vadd.f32 %v5544_v59, %v697_v41  ;;  %v8400_v41 = vld [vmem:[#allocation17_spill] sm:$0xff] }
 0x16d   :  { %v5757_v1 = vadd.f32 1.0, %v1494_v28  ;;  %v1495_v31 = vmul.f32 0.3275911, %v5749_v12  ;;  %v5768_v60 = vmul.f32 0.70710677, %v5754_v38  ;;  %v5786_v44 = vadd.f32 %v1302_v63, %v1118_v55 }
 0x16e   :  { %8391 = vst [vmem:[#allocation70_spill] sm:$0xff] %v5752_v30  ;;  %v5765_v29 = vand.u32 2147483647, %v5752_v30  ;;  %v1304_v54 = vpop.f32.mrf.mxu1  ;;  %v1120_v48 = vadd.f32 %v1119_v34, %v893_v20  ;;  %v521_v55 = vadd.f32 %v5404_v40, %v268_v23  ;;  %v301_v49 = vadd.f32 %v5418_v24, %v5688_v5  ;;  %v8397_v23 = vld [vmem:[#allocation15_spill] sm:$0xff] }
 0x16f   :  { %8392 = vst [vmem:[#allocation71_spill] sm:$0xff] %v5768_v60  ;;  %4586 = vrcp.f32 %v5757_v1  ;;  %v5773_v18 = vadd.f32 1.0, %v1495_v31  ;;  %v5780_v28 = vand.u32 2147483647, %v5768_v60  ;;  %v5797_v56 = vmul.f32 0.70710677, %v5786_v44 }
 0x170   :  { %v1496_v51 = vmul.f32 0.3275911, %v5765_v29  ;;  %v1309_v31 = vpop.f32.mrf.mxu1  ;;  %v5810_v34 = vadd.f32 %v1304_v54, %v1120_v48  ;;  %v535_v58 = vadd.f32 %v5430_v52, %v290_v3  ;;  %v312_v40 = vadd.f32 %v5435_v0, %v5688_v5  ;;  %v8398_v0 = vld [vmem:[#allocation16_spill] sm:$0xff]  ;;  %v8411_v60 = vld [vmem:[#allocation31_spill] sm:$0xff] }
 0x171   :  { %4588 = vrcp.f32 %v5773_v18  ;;  %v1497_v39 = vmul.f32 0.3275911, %v5780_v28  ;;  %8393 = vst [vmem:[#allocation72_spill] sm:$0xff] %v5797_v56  ;;  %v5808_v37 = vand.u32 2147483647, %v5797_v56  ;;  %v5816_v13 = vadd.f32 %v1309_v31, %v1125_v61 }
 0x172   :  { %v5790_v47 = vadd.f32 1.0, %v1496_v51  ;;  %v1311_v51 = vpop.f32.mrf.mxu1  ;;  %v1127_v59 = vadd.f32 %v1126_v27, %v902_v25  ;;  %v542_v54 = vadd.f32 %v5445_v14, %v301_v49  ;;  %v5826_v24 = vmul.f32 0.70710677, %v5810_v34  ;;  %v8402_v27 = vld [vmem:[#allocation21_spill] sm:$0xff]  ;;  %v8403_v49 = vld [vmem:[#allocation22_spill] sm:$0xff] }
 0x173   :  { %v5803_v63 = vadd.f32 1.0, %v1497_v39  ;;  %8394 = vst [vmem:[#allocation73_spill] sm:$0xff] %v5816_v13  ;;  %v1498_v32 = vmul.f32 0.3275911, %v5808_v37  ;;  %v5829_v52 = vmul.f32 0.70710677, %v5816_v13  ;;  %v549_v20 = vadd.f32 %v8397_v23, %v312_v40 }
 0x174   :  { %4590 = vrcp.f32 %v5790_v47  ;;  %8395 = vst [vmem:[#allocation74_spill] sm:$0xff] %v5826_v24  ;;  %v334_v39 = vadd.f32 %v8398_v0, %v5688_v5  ;;  %v5836_v2 = vadd.f32 %v1311_v51, %v1127_v59  ;;  %v5839_v14 = vadd.f32 %v8400_v41, %v323_v17  ;;  %v8406_v23 = vld [vmem:[#allocation24_spill] sm:$0xff] }
 0x175   :  { %4592 = vrcp.f32 %v5803_v63  ;;  %8396 = vst [vmem:[#allocation75_spill] sm:$0xff] %v5829_v52  ;;  %v5834_v31 = vadd.f32 1.0, %v1498_v32  ;;  %v345_v48 = vadd.f32 %v8401_v62, %v5688_v5  ;;  %v5844_v3 = vand.u32 2147483647, %v5826_v24  ;;  %v8405_v32 = vld [vmem:[#allocation23_spill] sm:$0xff]  ;;  %v8407_v62 = vld [vmem:[#allocation25_spill] sm:$0xff]  ;;  %v1131_v24 = vpop.f32.mrf.mxu0 }
 0x176   :  { %8399 = vst [vmem:[#allocation15_spill] sm:$0xff] %v5836_v2  ;;  %v5847_v61 = vand.u32 2147483647, %v5829_v52  ;;  %v5850_v25 = vadd.f32 %v8402_v27, %v334_v39  ;;  %v356_v40 = vadd.f32 %v8403_v49, %v5688_v5  ;;  %v5856_v51 = vmul.f32 0.70710677, %v5836_v2  ;;  %v8408_v49 = vld [vmem:[#allocation28_spill] sm:$0xff] }
 0x177   :  { %4594 = vrcp.f32 %v5834_v31  ;;  %v5859_v17 = vadd.f32 %v8405_v32, %v345_v48  ;;  %v367_v0 = vadd.f32 %v8406_v23, %v5688_v5  ;;  %v1499_v41 = vmul.f32 0.3275911, %v5844_v3  ;;  %v8410_v48 = vld [vmem:[#allocation26_spill] sm:$0xff] }
 0x178   :  { %8404 = vst [vmem:[#allocation16_spill] sm:$0xff] %v5856_v51  ;;  %v1500_v39 = vmul.f32 0.3275911, %v5847_v61  ;;  %v5866_v27 = vadd.f32 %v8407_v62, %v356_v40  ;;  %v705_v35 = vadd.f32 %v8408_v49, %v507_v16  ;;  %v5871_v56 = vand.u32 2147483647, %v5856_v51  ;;  %v1316_v49 = vpop.f32.mrf.mxu1 }
 0x179   :  { %v5874_v32 = vadd.f32 %v8410_v48, %v367_v0  ;;  %v713_v5 = vadd.f32 %v8411_v60, %v514_v46  ;;  %v5877_v23 = vadd.f32 1.0, %v1499_v41  ;;  %v721_v16 = vadd.f32 %v5565_v8, %v521_v55  ;;  %v8412_v48 = vld [vmem:[#allocation33_spill] sm:$0xff]  ;;  %v8415_v8 = vld [vmem:[#allocation42_spill] sm:$0xff] }
 0x17a   :  { %8409 = vst [vmem:[#allocation17_spill] sm:$0xff] %v5871_v56  ;;  %v5879_v4 = vadd.f32 1.0, %v1500_v39  ;;  %v5882_v40 = vadd.f32 %v5560_v22, %v705_v35  ;;  %v1501_v62 = vmul.f32 0.3275911, %v5871_v56  ;;  %v1974_v51 = vsub.f32 0.0, %v5738_v36  ;;  %v8413_v41 = vld [vmem:[#allocation37_spill] sm:$0xff] }
 0x17b   :  { %v1132_v60 = vadd.f32 %v1131_v24, %v8412_v48  ;;  %4596 = vrcp.f32 %v5877_v23  ;;  %v5891_v39 = vadd.f32 %v8413_v41, %v713_v5  ;;  %v8414_v22 = vld [vmem:[#allocation39_spill] sm:$0xff]  ;;  %v5898_v55 = vadd.f32 %v8415_v8, %v721_v16  ;;  %v8416_v24 = vld [vmem:[#allocation44_spill] sm:$0xff] }
 0x17c   :  { %v4587_v59 = vpop.eup %4586  ;;  %v729_v35 = vadd.f32 %v8414_v22, %v528_v33  ;;  %4598 = vrcp.f32 %v5879_v4  ;;  %v737_v48 = vadd.f32 %v8416_v24, %v535_v58  ;;  %v5908_v33 = vadd.f32 1.0, %v1501_v62  ;;  %v8419_v8 = vld [vmem:[#allocation56_spill] sm:$0xff]  ;;  %v8420_v24 = vld [vmem:[#allocation59_spill] sm:$0xff] }
 0x17d   :  { %v1590_v52 = vmul.f32 %v4587_v59, %v5757_v1  ;;  %v5901_v13 = vadd.f32 %v1316_v49, %v1132_v60  ;;  %v2006_v16 = vmul.f32 %v1974_v51, %v5738_v36  ;;  %v753_v62 = vadd.f32 %v5638_v26, %v549_v20  ;;  %v8418_v60 = vld [vmem:[#allocation53_spill] sm:$0xff] }
 0x17e   :  { %v4589_v30 = vpop.eup %4588  ;;  %v5905_v56 = vadd.f32 %v5615_v19, %v729_v35  ;;  %4600 = vrcp.f32 %v5908_v33  ;;  %vm2166_vm1 = vcmp.lt.f32.partialorder %v5731_v43, 0.0 }
 0x17f   :  { %v1622_v1 = vsub.f32 2.0, %v1590_v52  ;;  %v1591_v0 = vmul.f32 %v4589_v30, %v5773_v18  ;;  %v5919_v19 = vmul.f32 0.70710677, %v5901_v13  ;;  %v2038_v26 = vmul.f32 1.442695, %v2006_v16 }
 0x181   :  { %v4591_v46 = vpop.eup %4590  ;;  %v5894_v2 = vmul.f32 %v4587_v59, %v1622_v1  ;;  %v1623_v52 = vsub.f32 2.0, %v1591_v0  ;;  %v8417_v1 = vld [vmem:[#allocation49_spill] sm:$0xff]  ;;  %4602 = vpow2.f32 %v2038_v26  ;;  %vm2174_vm9 = vcmp.lt.f32.partialorder %v5919_v19, 0.0 }
 0x182   :  { %v1592_v18 = vmul.f32 %v4591_v46, %v5790_v47  ;;  %v4593_v59 = vpop.eup %4592  ;;  %v745_v41 = vadd.f32 %v8417_v1, %v542_v54  ;;  %v5915_v47 = vadd.f32 %v5630_v10, %v737_v48  ;;  %v5931_v10 = vand.u32 2147483647, %v5919_v19 }
 0x183   :  { %v1686_v5 = vmul.f32 1.0614054, %v5894_v2  ;;  %v5912_v22 = vmul.f32 %v4589_v30, %v1623_v52  ;;  %v1593_v58 = vmul.f32 %v4593_v59, %v5803_v63  ;;  %v761_v52 = vadd.f32 %v8419_v8, %v5839_v14 }
 0x184   :  { %v1624_v0 = vsub.f32 2.0, %v1592_v18  ;;  %v5923_v35 = vadd.f32 %v8418_v60, %v745_v41  ;;  %v4595_v63 = vpop.eup %4594  ;;  %v5937_v48 = vadd.f32 %v8420_v24, %v753_v62  ;;  %v8421_v41 = vld [vmem:[#allocation60_spill] sm:$0xff]  ;;  %v1976_v14 = vsub.f32 0.0, %v5765_v29 }
 0x185   :  { %v1718_v49 = vadd.f32 -1.4531521, %v1686_v5  ;;  %v1687_v54 = vmul.f32 1.0614054, %v5912_v22  ;;  %v1625_v51 = vsub.f32 2.0, %v1593_v58  ;;  %v1594_v1 = vmul.f32 %v4595_v63, %v5834_v31 }
 0x186   :  { %v5926_v36 = vmul.f32 %v4591_v46, %v1624_v0  ;;  %v769_v0 = vadd.f32 %v8421_v41, %v5850_v25  ;;  %v1975_v24 = vsub.f32 0.0, %v5749_v12 }
 0x187   :  { %v1750_v30 = vmul.f32 %v1718_v49, %v5894_v2  ;;  %v1719_v20 = vadd.f32 -1.4531521, %v1687_v54  ;;  %v5939_v5 = vmul.f32 %v4593_v59, %v1625_v51  ;;  %v5945_v49 = vadd.f32 %v5674_v21, %v761_v52 }
 0x188   :  { %v1688_v18 = vmul.f32 1.0614054, %v5926_v36  ;;  %v1626_v62 = vsub.f32 2.0, %v1594_v1  ;;  %v1502_v54 = vmul.f32 0.3275911, %v5931_v10  ;;  %v777_v59 = vadd.f32 %v5677_v57, %v5859_v17  ;;  %v4597_v21 = vpop.eup %4596 }
 0x189   :  { %v1782_v46 = vadd.f32 1.4214138, %v1750_v30  ;;  %v1689_v60 = vmul.f32 1.0614054, %v5939_v5  ;;  %v1751_v31 = vmul.f32 %v1719_v20, %v5912_v22  ;;  %v5956_v30 = vadd.f32 %v5682_v11, %v769_v0 }
 0x18a   :  { %v1720_v58 = vadd.f32 -1.4531521, %v1688_v18  ;;  %v5958_v52 = vmul.f32 %v4595_v63, %v1626_v62  ;;  %v4599_v18 = vpop.eup %4598  ;;  %v2008_v1 = vmul.f32 %v1976_v14, %v5765_v29  ;;  %v1595_v57 = vmul.f32 %v4597_v21, %v5877_v23 }
 0x18b   :  { %v1814_v16 = vmul.f32 %v1782_v46, %v5894_v2  ;;  %8422 = vst [vmem:[#allocation18_spill] sm:$0xff] %v5956_v30  ;;  %v1721_v8 = vadd.f32 -1.4531521, %v1689_v60  ;;  %v1596_v20 = vmul.f32 %v4599_v18, %v5879_v4  ;;  %v5966_v11 = vadd.f32 1.0, %v1502_v54 }
 0x18c   :  { %v1752_v25 = vmul.f32 %v1720_v58, %v5926_v36  ;;  %v1690_v26 = vmul.f32 1.0614054, %v5958_v52  ;;  %v785_v63 = vadd.f32 %v5685_v45, %v5866_v27  ;;  %v5971_v41 = vadd.f32 %v5692_v15, %v777_v59  ;;  %v4601_v59 = vpop.eup %4600 }
 0x18d   :  { %v1846_v51 = vadd.f32 -0.28449672, %v1814_v16  ;;  %v1783_v0 = vadd.f32 1.4214138, %v1751_v31  ;;  %v1627_v58 = vsub.f32 2.0, %v1595_v57  ;;  %v793_v29 = vadd.f32 %v5700_v42, %v5874_v32 }
 0x18e   :  { %v1784_v46 = vadd.f32 1.4214138, %v1752_v25  ;;  %8423 = vst [vmem:[#allocation21_spill] sm:$0xff] %v5971_v41  ;;  %v1753_v14 = vmul.f32 %v1721_v8, %v5939_v5  ;;  %v1722_v16 = vadd.f32 -1.4531521, %v1690_v26  ;;  %v2007_v4 = vmul.f32 %v1975_v24, %v5749_v12  ;;  %v8425_v25 = vld [vmem:[#allocation65_spill] sm:$0xff] }
 0x18f   :  { %v1878_v17 = vmul.f32 %v1846_v51, %v5894_v2  ;;  %v5978_v62 = vmul.f32 %v4597_v21, %v1627_v58  ;;  %v1628_v54 = vsub.f32 2.0, %v1596_v20  ;;  %v2042_v45 = vmul.f32 1.442695, %v2008_v1  ;;  %v8426_v12 = vld [vmem:[#allocation64_spill] sm:$0xff] }
 0x190   :  { %v1816_v23 = vmul.f32 %v1784_v46, %v5926_v36  ;;  %v1977_v15 = vsub.f32 0.0, %v5780_v28  ;;  %v1754_v27 = vmul.f32 %v1722_v16, %v5958_v52  ;;  %4604 = vrcp.f32 %v5966_v11 }
 0x191   :  { %v1910_v60 = vadd.f32 0.2548296, %v1878_v17  ;;  %v5984_v42 = vadd.f32 %v5710_v6, %v785_v63  ;;  %v1815_v32 = vmul.f32 %v1783_v0, %v5912_v22  ;;  %v5987_v31 = vmul.f32 %v4599_v18, %v1628_v54  ;;  %v1133_v0 = vpop.f32.mrf.mxu0 }
 0x192   :  { %v5991_v21 = vsub.f32 %v8426_v12, %v8425_v25  ;;  %v5994_v51 = vadd.f32 %v5722_v50, %v793_v29  ;;  %v1848_v8 = vadd.f32 -0.28449672, %v1816_v23  ;;  %v1785_v24 = vadd.f32 1.4214138, %v1753_v14  ;;  %v4603_v29 = vpop.eup %4602 }
 0x193   :  { %8424 = vst [vmem:[#allocation22_spill] sm:$0xff] %v5984_v42  ;;  %v1978_v46 = vsub.f32 0.0, %v5808_v37  ;;  %v5998_v1 = vmul.f32 0.5, %v5727_v53  ;;  %v1942_v6 = vmul.f32 %v1910_v60, %v5894_v2  ;;  %v2040_v57 = vmul.f32 1.442695, %v2007_v4  ;;  %v1318_v60 = vpop.f32.mrf.mxu1  ;;  %v1138_v12 = vpop.f32.mrf.mxu0 }
 0x194   :  { %8427 = vst [vmem:[#allocation23_spill] sm:$0xff] %v5991_v21  ;;  %8428 = vst [vmem:[#allocation24_spill] sm:$0xff] %v5994_v51  ;;  %v1691_v18 = vmul.f32 1.0614054, %v5978_v62  ;;  %4606 = vpow2.f32 %v2042_v45  ;;  %v2009_v17 = vmul.f32 %v1977_v15, %v5780_v28  ;;  %v1786_v26 = vadd.f32 1.4214138, %v1754_v27 }
 0x195   :  { %v1597_v20 = vmul.f32 %v4601_v59, %v5908_v33  ;;  %v6005_v50 = vmul.f32 0.5, %v5733_v9  ;;  %v1847_v63 = vadd.f32 -0.28449672, %v1815_v32  ;;  %v1692_v58 = vmul.f32 1.0614054, %v5987_v31 }
 0x196   :  { %v6010_v2 = vmul.f32 0.5, %v5743_v7  ;;  %v1880_v23 = vmul.f32 %v1848_v8, %v5926_v36  ;;  %v1817_v28 = vmul.f32 %v1785_v24, %v5939_v5  ;;  %v2010_v14 = vmul.f32 %v1978_v46, %v5808_v37 }
 0x197   :  { %v2102_v33 = vmul.f32 %v4603_v29, %v1942_v6  ;;  %4608 = vpow2.f32 %v2040_v57  ;;  %v1723_v9 = vadd.f32 -1.4531521, %v1691_v18  ;;  %v1979_v16 = vsub.f32 0.0, %v5844_v3 }
 0x198   :  { %v2044_v4 = vmul.f32 1.442695, %v2009_v17  ;;  %v1818_v54 = vmul.f32 %v1786_v26, %v5958_v52  ;;  %v1134_v45 = vadd.f32 %v1133_v0, %v5882_v40  ;;  %v1629_v15 = vsub.f32 2.0, %v1597_v20  ;;  %v8429_v26 = vld [vmem:[#allocation35_spill] sm:$0xff] }
 0x199   :  { %v1879_v7 = vmul.f32 %v1847_v63, %v5912_v22  ;;  %v6020_v27 = vmul.f32 0.5, %v5754_v38  ;;  %v1724_v32 = vadd.f32 -1.4531521, %v1692_v58  ;;  %v1980_v37 = vsub.f32 0.0, %v5847_v61 }
 0x19a   :  { %v1912_v8 = vadd.f32 0.2548296, %v1880_v23  ;;  %v1849_v24 = vadd.f32 -0.28449672, %v1817_v28  ;;  %v2046_v46 = vmul.f32 1.442695, %v2010_v14  ;;  %v6024_v6 = vadd.f32 %v1318_v60, %v1134_v45 }
 0x19b   :  { %v2134_v57 = vsub.f32 1.0, %v2102_v33  ;;  %v6027_v40 = vmul.f32 0.5, %v5786_v44  ;;  %v1755_v18 = vmul.f32 %v1723_v9, %v5978_v62  ;;  %v2011_v38 = vmul.f32 %v1979_v16, %v5844_v3  ;;  %v8430_v16 = vld [vmem:[#allocation17_spill] sm:$0xff] }
 0x19c   :  { %4610 = vpow2.f32 %v2044_v4  ;;  %v1850_v17 = vadd.f32 -0.28449672, %v1818_v54  ;;  %v1139_v20 = vadd.f32 %v1138_v12, %v8429_v26  ;;  %v6032_v63 = vmul.f32 %v4601_v59, %v1629_v15  ;;  %v8431_v4 = vld [vmem:[#allocation73_spill] sm:$0xff] }
 0x19d   :  { %v4605_v0 = vpop.eup %4604  ;;  %v1911_v58 = vadd.f32 0.2548296, %v1879_v7  ;;  %v6035_v29 = vmul.f32 0.5, %v5810_v34  ;;  %v1756_v23 = vmul.f32 %v1724_v32, %v5987_v31  ;;  %v2012_v44 = vmul.f32 %v1980_v37, %v5847_v61  ;;  %v8432_v37 = vld [vmem:[#allocation15_spill] sm:$0xff] }
 0x19e   :  { %v1944_v28 = vmul.f32 %v1912_v8, %v5926_v36  ;;  %v1881_v14 = vmul.f32 %v1849_v24, %v5939_v5  ;;  %4612 = vpow2.f32 %v2046_v46  ;;  %v6042_v3 = vmul.f32 0.70710677, %v6024_v6  ;;  %v1140_v46 = vpop.f32.mrf.mxu0 }
 0x19f   :  { %v2198_v33 = vsub.f32 0.0, %v2134_v57  ;;  %v1787_v59 = vadd.f32 1.4214138, %v1755_v18  ;;  %v2048_v9 = vmul.f32 1.442695, %v2011_v38  ;;  %v1981_v60 = vsub.f32 0.0, %v8430_v16 }
 0x1a0   :  { %v1882_v34 = vmul.f32 %v1850_v17, %v5958_v52  ;;  %v6047_v54 = vmul.f32 0.5, %v8431_v4  ;;  %v1693_v61 = vmul.f32 1.0614054, %v6032_v63  ;;  %v1598_v36 = vmul.f32 %v4605_v0, %v5966_v11 }
 0x1a1   :  { %v4607_v45 = vpop.eup %4606  ;;  %v1943_v15 = vmul.f32 %v1911_v58, %v5912_v22  ;;  %v1788_v7 = vadd.f32 1.4214138, %v1756_v23  ;;  %v2050_v32 = vmul.f32 1.442695, %v2012_v44  ;;  %v6053_v12 = vmul.f32 0.5, %v8432_v37 }
 0x1a2   :  { %v6055_v8 = vmul.f32 %v4607_v45, %v1944_v28  ;;  %v1913_v24 = vadd.f32 0.2548296, %v1881_v14  ;;  %v1630_v18 = vsub.f32 2.0, %v1598_v36  ;;  %v6058_v38 = vand.u32 2147483647, %v6042_v3  ;;  %v1323_v14 = vpop.f32.mrf.mxu1  ;;  %v8433_v36 = vld [vmem:[#allocation70_spill] sm:$0xff] }
 0x1a3   :  { %v2230_v17 = vsel %vm2166_vm1, %v2198_v33, %v2134_v57  ;;  %v1819_v11 = vmul.f32 %v1787_v59, %v5978_v62  ;;  %4614 = vpow2.f32 %v2048_v9  ;;  %v2013_v22 = vmul.f32 %v1981_v60, %v8430_v16  ;;  %v1145_v16 = vpop.f32.mrf.mxu0 }
 0x1a4   :  { %v4609_v26 = vpop.eup %4608  ;;  %v1914_v58 = vadd.f32 0.2548296, %v1882_v34  ;;  %v1725_v23 = vadd.f32 -1.4531521, %v1693_v61  ;;  %v6064_v44 = vmul.f32 %v4605_v0, %v1630_v18  ;;  %v1982_v28 = vsub.f32 0.0, %v5931_v10  ;;  %v8435_v18 = vld [vmem:[#allocation41_spill] sm:$0xff] }
 0x1a5   :  { %v6067_v4 = vmul.f32 %v4609_v26, %v1943_v15  ;;  %vm2168_vm2 = vcmp.lt.f32.partialorder %v8433_v36, 0.0  ;;  %v1820_v43 = vmul.f32 %v1788_v7, %v5987_v31  ;;  %4616 = vpow2.f32 %v2050_v32 }
 0x1a6   :  { %v1141_v57 = vadd.f32 %v1140_v46, %v5891_v39  ;;  %v2262_v33 = vadd.f32 1.0, %v2230_v17  ;;  %v2136_v59 = vsub.f32 1.0, %v6055_v8  ;;  %v1945_v9 = vmul.f32 %v1913_v24, %v5939_v5  ;;  %v8434_v8 = vld [vmem:[#allocation69_spill] sm:$0xff]  ;;  %v1325_v17 = vpop.f32.mrf.mxu1 }
 0x1a7   :  { %v1503_v0 = vmul.f32 0.3275911, %v6058_v38  ;;  %v1851_v60 = vadd.f32 -0.28449672, %v1819_v11  ;;  %v2052_v34 = vmul.f32 1.442695, %v2013_v22  ;;  %v6076_v45 = vadd.f32 %v1323_v14, %v1139_v20 }
 0x1a8   :  { %v1694_v61 = vmul.f32 1.0614054, %v6064_v44  ;;  %v1946_v15 = vmul.f32 %v1914_v58, %v5958_v52  ;;  %v1757_v7 = vmul.f32 %v1725_v23, %v6032_v63  ;;  %v2014_v39 = vmul.f32 %v1982_v28, %v5931_v10  ;;  %v1147_v10 = vpop.f32.mrf.mxu0 }
 0x1a9   :  { %v6081_v32 = vadd.f32 1.0, %v1503_v0  ;;  %v4611_v37 = vpop.eup %4610  ;;  %v2135_v5 = vsub.f32 1.0, %v6067_v4  ;;  %vm2167_vm3 = vcmp.lt.f32.partialorder %v8434_v8, 0.0  ;;  %v1852_v24 = vadd.f32 -0.28449672, %v1820_v43 }
 0x1aa   :  { %v6086_v46 = vmul.f32 0.5, %v5901_v13  ;;  %v1146_v20 = vadd.f32 %v1145_v16, %v8435_v18  ;;  %v2294_v52 = vmul.f32 %v2262_v33, %v5998_v1  ;;  %v2200_v11 = vsub.f32 0.0, %v2136_v59  ;;  %v8436_v16 = vld [vmem:[#allocation71_spill] sm:$0xff] }
 0x1ab   :  { %v2105_v22 = vmul.f32 %v4611_v37, %v1945_v9  ;;  %4618 = vrcp.f32 %v6081_v32  ;;  %v4613_v26 = vpop.eup %4612  ;;  %v1883_v58 = vmul.f32 %v1851_v60, %v5978_v62  ;;  %v1726_v23 = vadd.f32 -1.4531521, %v1694_v61  ;;  %v1330_v60 = vpop.f32.mrf.mxu1 }
 0x1ac   :  { %4620 = vpow2.f32 %v2052_v34  ;;  %v6093_v28 = vmul.f32 0.70710677, %v6076_v45  ;;  %v2106_v13 = vmul.f32 %v4613_v26, %v1946_v15  ;;  %v1789_v14 = vadd.f32 1.4214138, %v1757_v7  ;;  %v1152_v7 = vpop.f32.mrf.mxu0 }
 0x1ad   :  { %v2054_v4 = vmul.f32 1.442695, %v2014_v39  ;;  %v6095_v43 = vadd.f32 %v1325_v17, %v1141_v57  ;;  %vm2169_vm4 = vcmp.lt.f32.partialorder %v8436_v16, 0.0  ;;  %v1884_v1 = vmul.f32 %v1852_v24, %v5987_v31  ;;  %v8438_v39 = vld [vmem:[#allocation72_spill] sm:$0xff] }
 0x1ae   :  { %v6100_v33 = vmul.f32 0.5, %v6024_v6  ;;  %v1148_v9 = vadd.f32 %v1147_v10, %v5898_v55  ;;  %v6104_v0 = vand.u32 2147483647, %v6093_v28  ;;  %v6106_v34 = vand.u32 4294901760, %v2294_v52 }
 0x1af   :  { %v2199_v61 = vsub.f32 0.0, %v2135_v5  ;;  %v2232_v57 = vsel %vm2168_vm2, %v2200_v11, %v2136_v59  ;;  %v2137_v15 = vsub.f32 1.0, %v2105_v22  ;;  %vm2170_vm5 = vcmp.lt.f32.partialorder %v8438_v39, 0.0  ;;  %v8439_v11 = vld [vmem:[#allocation46_spill] sm:$0xff] }
 0x1b0   :  { %8437 = vst [vmem:[#allocation25_spill] sm:$0xff] %v6106_v34  ;;  %v1915_v37 = vadd.f32 0.2548296, %v1883_v58  ;;  %v1758_v6 = vmul.f32 %v1726_v23, %v6064_v44  ;;  %v1504_v24 = vmul.f32 0.3275911, %v6104_v0  ;;  %v4615_v18 = vpop.eup %4614  ;;  %v2138_v17 = vsub.f32 1.0, %v2106_v13 }
 0x1b1   :  { %v6114_v55 = vmul.f32 0.70710677, %v6095_v43  ;;  %v1821_v10 = vmul.f32 %v1789_v14, %v6032_v63  ;;  %4622 = vpow2.f32 %v2054_v4  ;;  %v6117_v26 = vadd.f32 %v1330_v60, %v1146_v20  ;;  %v1332_v4 = vpop.f32.mrf.mxu1 }
 0x1b2   :  { %v1916_v36 = vadd.f32 0.2548296, %v1884_v1  ;;  %v6119_v59 = vadd.f32 1.0, %v1504_v24  ;;  %v1153_v22 = vadd.f32 %v1152_v7, %v8439_v11  ;;  %v4617_v23 = vpop.eup %4616  ;;  %v6126_v53 = vsub.f32 %v2294_v52, %v6106_v34 }
 0x1b3   :  { %v6123_v58 = vand.u32 2147483647, %v6114_v55  ;;  %v2231_v13 = vsel %vm2167_vm3, %v2199_v61, %v2135_v5  ;;  %v2264_v25 = vadd.f32 1.0, %v2232_v57  ;;  %v2201_v14 = vsub.f32 0.0, %v2137_v15 }
 0x1b4   :  { %8440 = vst [vmem:[#allocation28_spill] sm:$0xff] %v6126_v53  ;;  %v1947_v20 = vmul.f32 %v1915_v37, %v5978_v62  ;;  %v1790_v1 = vadd.f32 1.4214138, %v1758_v6  ;;  %4624 = vrcp.f32 %v6119_v59  ;;  %v2202_v7 = vsub.f32 0.0, %v2138_v17 }
 0x1b5   :  { %v1505_v60 = vmul.f32 0.3275911, %v6123_v58  ;;  %v1853_v24 = vadd.f32 -0.28449672, %v1821_v10  ;;  %v6135_v52 = vmul.f32 0.70710677, %v6117_v26  ;;  %v1948_v5 = vmul.f32 %v1916_v36, %v5987_v31  ;;  %v1337_v10 = vpop.f32.mrf.mxu1 }
 0x1b6   :  { %v2263_v34 = vadd.f32 1.0, %v2231_v13  ;;  %v6140_v61 = vadd.f32 %v1332_v4, %v1148_v9  ;;  %v8102_v62 = vand.u32 4294901760, %v6126_v53  ;;  %v2296_v57 = vmul.f32 %v2264_v25, %v6010_v2 }
 0x1b7   :  { %v6138_v8 = vadd.f32 1.0, %v1505_v60  ;;  %v2233_v37 = vsel %vm2169_vm4, %v2201_v14, %v2137_v15  ;;  %v6147_v6 = vand.u32 2147483647, %v6135_v52  ;;  %v2107_v51 = vmul.f32 %v4615_v18, %v1947_v20 }
 0x1b8   :  { %v4619_v11 = vpop.eup %4618  ;;  %v1822_v13 = vmul.f32 %v1790_v1, %v6064_v44  ;;  %v6152_v31 = vmul.f32 0.70710677, %v6140_v61  ;;  %v2234_v25 = vsel %vm2170_vm5, %v2202_v7, %v2138_v17  ;;  %v1885_v2 = vmul.f32 %v1853_v24, %v6032_v63  ;;  %v8443_v17 = vld [vmem:[#allocation74_spill] sm:$0xff] }
 0x1b9   :  { %4626 = vrcp.f32 %v6138_v8  ;;  %v4621_v9 = vpop.eup %4620  ;;  %v1599_v16 = vmul.f32 %v4619_v11, %v6081_v32  ;;  %v1506_v15 = vmul.f32 0.3275911, %v6147_v6  ;;  %v2265_v36 = vadd.f32 1.0, %v2233_v37  ;;  %v1154_v32 = vpop.f32.mrf.mxu0 }
 0x1ba   :  { %v2108_v14 = vmul.f32 %v4617_v23, %v1948_v5  ;;  %v6160_v18 = vand.u32 2147483647, %v6152_v31  ;;  %v6162_v4 = vadd.f32 %v1337_v10, %v1153_v22  ;;  %v6167_v20 = vsub.f32 %v6126_v53, %v8102_v62  ;;  %v8444_v22 = vld [vmem:[#allocation75_spill] sm:$0xff]  ;;  %v1339_v53 = vpop.f32.mrf.mxu1 }
 0x1bb   :  { %v6169_v39 = vand.u32 4294901760, %v2296_v57  ;;  %vm2171_vm6 = vcmp.lt.f32.partialorder %v8443_v17, 0.0  ;;  %v1631_v1 = vsub.f32 2.0, %v1599_v16  ;;  %v6172_v60 = vadd.f32 1.0, %v1506_v15  ;;  %v1159_v42 = vpop.f32.mrf.mxu0 }
 0x1bc   :  { %8441 = vst [vmem:[#allocation26_spill] sm:$0xff] %v6167_v20  ;;  %v2266_v7 = vadd.f32 1.0, %v2234_v25  ;;  %v2139_v23 = vsub.f32 1.0, %v2107_v51  ;;  %v1854_v24 = vadd.f32 -0.28449672, %v1822_v13  ;;  %vm2172_vm7 = vcmp.lt.f32.partialorder %v8444_v22, 0.0 }
 0x1bd   :  { %8442 = vst [vmem:[#allocation31_spill] sm:$0xff] %v6169_v39  ;;  %v1507_v5 = vmul.f32 0.3275911, %v6160_v18  ;;  %v1917_v37 = vadd.f32 0.2548296, %v1885_v2  ;;  %v6176_v10 = vmul.f32 %v4619_v11, %v1631_v1  ;;  %4628 = vrcp.f32 %v6172_v60 }
 0x1be   :  { %v6180_v62 = vmul.f32 0.70710677, %v6162_v4  ;;  %v6182_v16 = vpop.eup %4622  ;;  %v6185_v15 = vmul.f32 %v2263_v34, %v6005_v50  ;;  %v2140_v51 = vsub.f32 1.0, %v2108_v14  ;;  %v1155_v13 = vadd.f32 %v1154_v32, %v5905_v56  ;;  %v8448_v50 = vld [vmem:[#allocation50_spill] sm:$0xff] }
 0x1bf   :  { %v6188_v25 = vadd.f32 1.0, %v1507_v5  ;;  %v6191_v2 = vsub.f32 %v2296_v57, %v6169_v39  ;;  %v6194_v11 = vmul.f32 %v2265_v36, %v6020_v27  ;;  %v1695_v1 = vmul.f32 1.0614054, %v6176_v10  ;;  %v1344_v36 = vpop.f32.mrf.mxu1 }
 0x1c0   :  { %8445 = vst [vmem:[#allocation33_spill] sm:$0xff] %v6185_v15  ;;  %v6198_v41 = vand.u32 2147483647, %v6180_v62  ;;  %v2203_v34 = vsub.f32 0.0, %v2139_v23  ;;  %v1886_v14 = vmul.f32 %v1854_v24, %v6064_v44  ;;  %v6202_v56 = vadd.f32 %v1339_v53, %v1155_v13 }
 0x1c1   :  { %8446 = vst [vmem:[#allocation37_spill] sm:$0xff] %v6191_v2  ;;  %8447 = vst [vmem:[#allocation39_spill] sm:$0xff] %v6194_v11  ;;  %v4625_v32 = vpop.eup %4624  ;;  %v2298_v57 = vmul.f32 %v2266_v7, %v6027_v40  ;;  %v1949_v5 = vmul.f32 %v1917_v37, %v6032_v63  ;;  %4630 = vrcp.f32 %v6188_v25  ;;  %v2204_v39 = vsub.f32 0.0, %v2140_v51 }
 0x1c2   :  { %v1508_v27 = vmul.f32 0.3275911, %v6198_v41  ;;  %v1727_v2 = vadd.f32 -1.4531521, %v1695_v1  ;;  %v1600_v11 = vmul.f32 %v4625_v32, %v6119_v59  ;;  %v1160_v20 = vadd.f32 %v1159_v42, %v8448_v50 }
 0x1c3   :  { %v8449_v53 = vsub.f32 0.0, %v6058_v38  ;;  %v6214_v13 = vmul.f32 0.5, %v6076_v45  ;;  %v6219_v63 = vmul.f32 0.70710677, %v6202_v56  ;;  %v2235_v7 = vsel %vm2171_vm6, %v2203_v34, %v2139_v23 }
 0x1c4   :  { %v6216_v40 = vadd.f32 1.0, %v1508_v27  ;;  %v1918_v37 = vadd.f32 0.2548296, %v1886_v14  ;;  %v1632_v1 = vsub.f32 2.0, %v1600_v11  ;;  %v6223_v59 = vadd.f32 %v1344_v36, %v1160_v20 }
 0x1c5   :  { %v2015_v24 = vmul.f32 %v8449_v53, %v6058_v38  ;;  %v6225_v50 = vand.u32 4294901760, %v2298_v57  ;;  %v6227_v15 = vmul.f32 %v4621_v9, %v1949_v5  ;;  %v6231_v38 = vand.u32 2147483647, %v6219_v63  ;;  %v1161_v53 = vpop.f32.mrf.mxu0 }
 0x1c6   :  { %v4627_v42 = vpop.eup %4626  ;;  %4632 = vrcp.f32 %v6216_v40  ;;  %v2236_v45 = vsel %vm2172_vm7, %v2204_v39, %v2140_v51  ;;  %v1759_v17 = vmul.f32 %v1727_v2, %v6176_v10  ;;  %v6236_v23 = vmul.f32 %v4625_v32, %v1632_v1 }
 0x1c7   :  { %8450 = vst [vmem:[#allocation42_spill] sm:$0xff] %v6225_v50  ;;  %v1601_v20 = vmul.f32 %v4627_v42, %v6138_v8  ;;  %v2267_v11 = vadd.f32 1.0, %v2235_v7  ;;  %v2056_v34 = vmul.f32 1.442695, %v2015_v24  ;;  %v1984_v14 = vsub.f32 0.0, %v6104_v0 }
 0x1c8   :  { %v1509_v9 = vmul.f32 0.3275911, %v6231_v38  ;;  %v1950_v5 = vmul.f32 %v1918_v37, %v6064_v44  ;;  %v1696_v27 = vmul.f32 1.0614054, %v6236_v23  ;;  %v6244_v39 = vmul.f32 0.70710677, %v6223_v59  ;;  %v1346_v37 = vpop.f32.mrf.mxu1 }
 0x1c9   :  { %v1633_v36 = vsub.f32 2.0, %v1601_v20  ;;  %v6247_v22 = vsub.f32 %v2298_v57, %v6225_v50  ;;  %v2268_v51 = vadd.f32 1.0, %v2236_v45  ;;  %v2141_v8 = vsub.f32 1.0, %v6227_v15  ;;  %v8453_v20 = vld [vmem:[#allocation16_spill] sm:$0xff] }
 0x1ca   :  { %8451 = vst [vmem:[#allocation44_spill] sm:$0xff] %v6244_v39  ;;  %v6250_v2 = vadd.f32 1.0, %v1509_v9  ;;  %v4629_v32 = vpop.eup %4628  ;;  %v1791_v24 = vadd.f32 1.4214138, %v1759_v17  ;;  %v1728_v7 = vadd.f32 -1.4531521, %v1696_v27  ;;  %v2016_v30 = vmul.f32 %v1984_v14, %v6104_v0 }
 0x1cb   :  { %8452 = vst [vmem:[#allocation49_spill] sm:$0xff] %v6247_v22  ;;  %v6252_v1 = vmul.f32 %v4627_v42, %v1633_v36  ;;  %v6255_v44 = vand.u32 2147483647, %v6244_v39  ;;  %vm2173_vm8 = vcmp.lt.f32.partialorder %v8453_v20, 0.0  ;;  %v1602_v57 = vmul.f32 %v4629_v32, %v6172_v60 }
 0x1cc   :  { %v1162_v45 = vadd.f32 %v1161_v53, %v5915_v47  ;;  %4634 = vrcp.f32 %v6250_v2  ;;  %v2110_v15 = vmul.f32 %v6182_v16, %v1950_v5  ;;  %v1760_v17 = vmul.f32 %v1728_v7, %v6236_v23 }
 0x1cd   :  { %v1697_v42 = vmul.f32 1.0614054, %v6252_v1  ;;  %v1510_v9 = vmul.f32 0.3275911, %v6255_v44  ;;  %v6267_v27 = vmul.f32 %v2268_v51, %v6047_v54  ;;  %4636 = vpow2.f32 %v2056_v34 }
 0x1ce   :  { %v1634_v36 = vsub.f32 2.0, %v1602_v57  ;;  %v6269_v0 = vadd.f32 %v1346_v37, %v1162_v45  ;;  %v4631_v60 = vpop.eup %4630  ;;  %v1823_v47 = vmul.f32 %v1791_v24, %v6176_v10  ;;  %v1792_v14 = vadd.f32 1.4214138, %v1760_v17 }
 0x1cf   :  { %v1729_v53 = vadd.f32 -1.4531521, %v1697_v42  ;;  %v6272_v50 = vadd.f32 1.0, %v1510_v9  ;;  %v6275_v16 = vmul.f32 %v2267_v11, %v6035_v29  ;;  %v2205_v5 = vsub.f32 0.0, %v2141_v8 }
 0x1d0   :  { %v6278_v7 = vmul.f32 %v4629_v32, %v1634_v36  ;;  %v1603_v54 = vmul.f32 %v4631_v60, %v6188_v25  ;;  %v2142_v34 = vsub.f32 1.0, %v2110_v15  ;;  %v2058_v51 = vmul.f32 1.442695, %v2016_v30 }
 0x1d1   :  { %8454 = vst [vmem:[#allocation53_spill] sm:$0xff] %v6275_v16  ;;  %v1985_v37 = vsub.f32 0.0, %v6123_v58  ;;  %4638 = vrcp.f32 %v6272_v50  ;;  %v6284_v24 = vmul.f32 0.5, %v6095_v43  ;;  %v6288_v11 = vmul.f32 0.70710677, %v6269_v0 }
 0x1d2   :  { %v1698_v57 = vmul.f32 1.0614054, %v6278_v7  ;;  %v1635_v29 = vsub.f32 2.0, %v1603_v54  ;;  %v6291_v32 = vand.u32 4294901760, %v6267_v27  ;;  %v1855_v25 = vadd.f32 -0.28449672, %v1823_v47 }
 0x1d3   :  { %8455 = vst [vmem:[#allocation56_spill] sm:$0xff] %v6288_v11  ;;  %v4633_v45 = vpop.eup %4632  ;;  %v1824_v30 = vmul.f32 %v1792_v14, %v6236_v23  ;;  %v1761_v15 = vmul.f32 %v1729_v53, %v6252_v1  ;;  %v1986_v42 = vsub.f32 0.0, %v6147_v6  ;;  %v2237_v36 = vsel %vm2173_vm8, %v2205_v5, %v2141_v8 }
 0x1d4   :  { %8456 = vst [vmem:[#allocation59_spill] sm:$0xff] %v6291_v32  ;;  %v1730_v17 = vadd.f32 -1.4531521, %v1698_v57  ;;  %v6296_v43 = vmul.f32 %v4631_v60, %v1635_v29  ;;  %v1604_v9 = vmul.f32 %v4633_v45, %v6216_v40  ;;  %v2206_v54 = vsub.f32 0.0, %v2142_v34 }
 0x1d5   :  { %v2017_v22 = vmul.f32 %v1985_v37, %v6123_v58  ;;  %v6303_v16 = vand.u32 2147483647, %v6288_v11  ;;  %4640 = vpow2.f32 %v2058_v51  ;;  %v1887_v60 = vmul.f32 %v1855_v25, %v6176_v10 }
 0x1d6   :  { %v1762_v47 = vmul.f32 %v1730_v17, %v6278_v7  ;;  %v1699_v14 = vmul.f32 1.0614054, %v6296_v43  ;;  %v1636_v53 = vsub.f32 2.0, %v1604_v9  ;;  %v1856_v57 = vadd.f32 -0.28449672, %v1824_v30 }
 0x1d7   :  { %v1793_v29 = vadd.f32 1.4214138, %v1761_v15  ;;  %v1511_v40 = vmul.f32 0.3275911, %v6303_v16  ;;  %v2018_v8 = vmul.f32 %v1986_v42, %v6147_v6  ;;  %v2238_v51 = vsel %vm2174_vm9, %v2206_v54, %v2142_v34 }
 0x1d8   :  { %v1794_v20 = vadd.f32 1.4214138, %v1762_v47  ;;  %v1731_v5 = vadd.f32 -1.4531521, %v1699_v14  ;;  %v6310_v58 = vmul.f32 %v4633_v45, %v1636_v53  ;;  %v2060_v17 = vmul.f32 1.442695, %v2017_v22 }
 0x1d9   :  { %v4635_v37 = vpop.eup %4634  ;;  %v1987_v11 = vsub.f32 0.0, %v6160_v18  ;;  %v6315_v9 = vadd.f32 1.0, %v1511_v40  ;;  %v1919_v45 = vadd.f32 0.2548296, %v1887_v60  ;;  %v1888_v47 = vmul.f32 %v1856_v57, %v6236_v23  ;;  %v1166_v60 = vpop.f32.mrf.mxu0 }
 0x1da   :  { %v1826_v25 = vmul.f32 %v1794_v20, %v6278_v7  ;;  %v1763_v30 = vmul.f32 %v1731_v5, %v6296_v43  ;;  %v1700_v15 = vmul.f32 1.0614054, %v6310_v58  ;;  %v1605_v6 = vmul.f32 %v4635_v37, %v6250_v2  ;;  %v4637_v42 = vpop.eup %4636 }
 0x1db   :  { %v1825_v19 = vmul.f32 %v1793_v29, %v6252_v1  ;;  %4642 = vrcp.f32 %v6315_v9  ;;  %v2269_v22 = vadd.f32 1.0, %v2237_v36  ;;  %v6325_v34 = vmul.f32 0.5, %v6117_v26 }
 0x1dc   :  { %v2062_v54 = vmul.f32 1.442695, %v2018_v8  ;;  %v1732_v14 = vadd.f32 -1.4531521, %v1700_v15  ;;  %v6329_v53 = vsub.f32 %v6267_v27, %v6291_v32  ;;  %v1795_v40 = vadd.f32 1.4214138, %v1763_v30 }
 0x1dd   :  { %v2019_v2 = vmul.f32 %v1987_v11, %v6160_v18  ;;  %v1637_v20 = vsub.f32 2.0, %v1605_v6  ;;  %v2270_v5 = vadd.f32 1.0, %v2238_v51  ;;  %4644 = vpow2.f32 %v2060_v17  ;;  %v8458_v30 = vld [vmem:[#allocation52_spill] sm:$0xff]  ;;  %v1351_v11 = vpop.f32.mrf.mxu1 }
 0x1de   :  { %8457 = vst [vmem:[#allocation60_spill] sm:$0xff] %v6329_v53  ;;  %v4639_v57 = vpop.eup %4638  ;;  %v1858_v29 = vadd.f32 -0.28449672, %v1826_v25  ;;  %v1764_v36 = vmul.f32 %v1732_v14, %v6310_v58  ;;  %v1951_v26 = vmul.f32 %v1919_v45, %v6176_v10  ;;  %v1920_v39 = vadd.f32 0.2548296, %v1888_v47 }
 0x1df   :  { %v1857_v8 = vadd.f32 -0.28449672, %v1825_v19  ;;  %v1606_v15 = vmul.f32 %v4639_v57, %v6272_v50  ;;  %4646 = vpow2.f32 %v2062_v54  ;;  %v1988_v27 = vsub.f32 0.0, %v6198_v41 }
 0x1e0   :  { %v1167_v32 = vadd.f32 %v1166_v60, %v8458_v30  ;;  %v6337_v18 = vmul.f32 %v4635_v37, %v1637_v20  ;;  %v1827_v51 = vmul.f32 %v1795_v40, %v6296_v43  ;;  %v2064_v17 = vmul.f32 1.442695, %v2019_v2 }
 0x1e1   :  { %v1989_v25 = vsub.f32 0.0, %v6231_v38  ;;  %v1638_v6 = vsub.f32 2.0, %v1606_v15  ;;  %v2302_v10 = vmul.f32 %v2270_v5, %v6086_v46  ;;  %v1890_v45 = vmul.f32 %v1858_v29, %v6278_v7 }
 0x1e2   :  { %v6344_v50 = vmul.f32 0.5, %v6140_v61  ;;  %v1796_v47 = vadd.f32 1.4214138, %v1764_v36  ;;  %v4641_v19 = vpop.eup %4640  ;;  %v2111_v54 = vmul.f32 %v4637_v42, %v1951_v26  ;;  %v1952_v37 = vmul.f32 %v1920_v39, %v6236_v23 }
 0x1e3   :  { %v1889_v14 = vmul.f32 %v1857_v8, %v6252_v1  ;;  %v6348_v60 = vadd.f32 %v1351_v11, %v1167_v32  ;;  %v6351_v40 = vmul.f32 0.5, %v6162_v4  ;;  %v2020_v2 = vmul.f32 %v1988_v27, %v6198_v41  ;;  %v1168_v41 = vpop.f32.mrf.mxu0 }
 0x1e4   :  { %v1701_v46 = vmul.f32 1.0614054, %v6337_v18  ;;  %v6355_v20 = vmul.f32 %v4639_v57, %v1638_v6  ;;  %v1859_v61 = vadd.f32 -0.28449672, %v1827_v51  ;;  %4648 = vpow2.f32 %v2064_v17 }
 0x1e5   :  { %v2021_v5 = vmul.f32 %v1989_v25, %v6231_v38  ;;  %v1990_v42 = vsub.f32 0.0, %v6255_v44  ;;  %v6359_v23 = vand.u32 4294901760, %v2302_v10  ;;  %vm2175_vm10 = vcmp.lt.f32.partialorder %v6042_v3, 0.0 }
 0x1e6   :  { %v1922_v39 = vadd.f32 0.2548296, %v1890_v45  ;;  %v1828_v4 = vmul.f32 %v1796_v47, %v6310_v58  ;;  %v6364_v32 = vmul.f32 0.5, %v6202_v56  ;;  %v2143_v29 = vsub.f32 1.0, %v2111_v54 }
 0x1e7   :  { %8459 = vst [vmem:[#allocation64_spill] sm:$0xff] %v6359_v23  ;;  %v2112_v57 = vmul.f32 %v4641_v19, %v1952_v37  ;;  %v1921_v36 = vadd.f32 0.2548296, %v1889_v14  ;;  %v6367_v26 = vmul.f32 0.70710677, %v6348_v60  ;;  %v6370_v8 = vmul.f32 %v2269_v22, %v6053_v12 }
 0x1e8   :  { %v4643_v38 = vpop.eup %4642  ;;  %v2066_v15 = vmul.f32 1.442695, %v2020_v2  ;;  %v1733_v27 = vadd.f32 -1.4531521, %v1701_v46  ;;  %v1702_v30 = vmul.f32 1.0614054, %v6355_v20  ;;  %v1891_v11 = vmul.f32 %v1859_v61, %v6296_v43 }
 0x1e9   :  { %v2068_v51 = vmul.f32 1.442695, %v2021_v5  ;;  %v1169_v56 = vadd.f32 %v1168_v41, %v5923_v35  ;;  %v2022_v17 = vmul.f32 %v1990_v42, %v6255_v44  ;;  %v6377_v25 = vsub.f32 %v2302_v10, %v6359_v23 }
 0x1ea   :  { %vm2176_vm11 = vcmp.lt.f32.partialorder %v6093_v28, 0.0  ;;  %v1954_v6 = vmul.f32 %v1922_v39, %v6278_v7  ;;  %v1860_v12 = vadd.f32 -0.28449672, %v1828_v4  ;;  %v6382_v22 = vand.u32 2147483647, %v6367_v26  ;;  %v4645_v45 = vpop.eup %4644 }
 0x1eb   :  { %8460 = vst [vmem:[#allocation35_spill] sm:$0xff] %v6377_v25  ;;  %v2207_v47 = vsub.f32 0.0, %v2143_v29  ;;  %v2144_v19 = vsub.f32 1.0, %v2112_v57  ;;  %v1953_v54 = vmul.f32 %v1921_v36, %v6252_v1  ;;  %v1607_v35 = vmul.f32 %v4643_v38, %v6315_v9  ;;  %v1173_v1 = vpop.f32.mrf.mxu0 }
 0x1ec   :  { %4650 = vpow2.f32 %v2066_v15  ;;  %v1765_v44 = vmul.f32 %v1733_v27, %v6337_v18  ;;  %v1734_v10 = vadd.f32 -1.4531521, %v1702_v30  ;;  %v1512_v37 = vmul.f32 0.3275911, %v6382_v22  ;;  %v4647_v14 = vpop.eup %4646  ;;  %v2350_v30 = vld [vmem:[#allocation2 + $0xc0] sm:$0xff] }
 0x1ed   :  { %v1923_v2 = vadd.f32 0.2548296, %v1891_v11  ;;  %4652 = vpow2.f32 %v2068_v51  ;;  %v6389_v7 = vmul.f32 0.5, %v6223_v59  ;;  %v2070_v46 = vmul.f32 1.442695, %v2022_v17  ;;  %v8462_v51 = vld [vmem:[#allocation58_spill] sm:$0xff] }
 0x1ee   :  { %v6391_v61 = vmul.f32 %v4647_v14, %v1954_v6  ;;  %v1892_v5 = vmul.f32 %v1860_v12, %v6310_v58  ;;  %v6394_v42 = vadd.f32 1.0, %v1512_v37  ;;  %v8461_v9 = vand.u32 4294901760, %v5991_v21 }
 0x1ef   :  { %v2239_v4 = vsel %vm2175_vm10, %v2207_v47, %v2143_v29  ;;  %v2208_v41 = vsub.f32 0.0, %v2144_v19  ;;  %v2113_v57 = vmul.f32 %v4645_v45, %v1953_v54  ;;  %v1639_v36 = vsub.f32 2.0, %v1607_v35  ;;  %v1353_v29 = vpop.f32.mrf.mxu1  ;;  %v1175_v54 = vpop.f32.mrf.mxu0 }
 0x1f0   :  { %v2748_v39 = vsub.f32 %v5991_v21, %v8461_v9  ;;  %v1797_v59 = vadd.f32 1.4214138, %v1765_v44  ;;  %v1766_v15 = vmul.f32 %v1734_v10, %v6355_v20  ;;  %v1991_v27 = vsub.f32 0.0, %v6303_v16  ;;  %v2334_v44 = vld [vmem:[#allocation2 + $0x40] sm:$0xff] }
 0x1f1   :  { %4654 = vrcp.f32 %v6394_v42  ;;  %vm2178_vm12 = vcmp.lt.f32.partialorder %v6135_v52, 0.0  ;;  %v1955_v11 = vmul.f32 %v1923_v2, %v6296_v43  ;;  %v1174_v17 = vadd.f32 %v1173_v1, %v8462_v51  ;;  %v4649_v6 = vpop.eup %4648 }
 0x1f2   :  { %4656 = vpow2.f32 %v2070_v46  ;;  %v6408_v3 = vmul.f32 0.5, %v6269_v0  ;;  %v2271_v12 = vadd.f32 1.0, %v2239_v4  ;;  %vm2177_vm13 = vcmp.lt.f32.partialorder %v6114_v55, 0.0 }
 0x1f3   :  { %v2146_v45 = vsub.f32 1.0, %v6391_v61  ;;  %v1924_v47 = vadd.f32 0.2548296, %v1892_v5  ;;  %v2749_v35 = vand.u32 4294901760, %v2748_v39  ;;  %v2240_v43 = vsel %vm2176_vm11, %v2208_v41, %v2144_v19  ;;  %v1358_v19 = vpop.f32.mrf.mxu1 }
 0x1f4   :  { %v2145_v10 = vsub.f32 1.0, %v2113_v57  ;;  %v6414_v37 = vmul.f32 %v4643_v38, %v1639_v36  ;;  %v6416_v14 = vand.u32 4294901760, %v2350_v30  ;;  %v1829_v0 = vmul.f32 %v1797_v59, %v6337_v18 }
 0x1f5   :  { %v1798_v2 = vadd.f32 1.4214138, %v1766_v15  ;;  %v2023_v46 = vmul.f32 %v1991_v27, %v6303_v16  ;;  %4194 = vmatpush3.msra.mxu1 %v2749_v35  ;;  %v6420_v1 = vadd.f32 %v1353_v29, %v1169_v56  ;;  %v6422_v61 = vmul.f32 %v4649_v6, %v1955_v11 }
 0x1f6   :  { %8463 = vst [vmem:[#allocation17_spill] sm:$0xff] %v6416_v14  ;;  %v6425_v5 = vadd.f32 %v1175_v54, %v5937_v48  ;;  %4115 = vmatprep.subr.mxu0 %v6416_v14  ;;  %v6428_v28 = vand.u32 4294901760, %v2334_v44  ;;  %v6431_v38 = vsub.f32 %v2350_v30, %v6416_v14  ;;  %v6434_v9 = vmul.f32 %v2271_v12, %v6100_v33 }
 0x1f7   :  { %v2272_v16 = vadd.f32 1.0, %v2240_v43  ;;  %v2210_v39 = vsub.f32 0.0, %v2146_v45  ;;  %v1956_v56 = vmul.f32 %v1924_v47, %v6310_v58  ;;  %v2209_v4 = vsub.f32 0.0, %v2145_v10 }
 0x1f8   :  { %8464 = vst [vmem:[#allocation73_spill] sm:$0xff] %v6428_v28  ;;  %8465 = vst [vmem:[#allocation15_spill] sm:$0xff] %v6431_v38  ;;  %v1703_v41 = vmul.f32 1.0614054, %v6414_v37  ;;  %v6439_v48 = vmul.f32 0.70710677, %v6420_v1  ;;  %4116 = vmatpush3.msra.mxu0 %v6428_v28  ;;  %v1830_v33 = vmul.f32 %v1798_v2, %v6355_v20  ;;  %v6445_v15 = vadd.f32 %v1358_v19, %v1174_v17 }
 0x1f9   :  { %v8121_v57 = vand.u32 4294901760, %v6431_v38  ;;  %vm2179_vm14 = vcmp.lt.f32.partialorder %v6152_v31, 0.0  ;;  %v1861_v36 = vadd.f32 -0.28449672, %v1829_v0  ;;  %v2072_v59 = vmul.f32 1.442695, %v2023_v46  ;;  %v4651_v27 = vpop.eup %4650 }
 0x1fa   :  { %v2147_v58 = vsub.f32 1.0, %v6422_v61  ;;  %v6449_v30 = vand.u32 2147483647, %v6439_v48  ;;  %v6452_v11 = vsub.f32 %v2334_v44, %v6428_v28  ;;  %v6457_v29 = vpop.eup %4652  ;;  %v2304_v6 = vmul.f32 %v2272_v16, %v6214_v13 }
 0x1fb   :  { %v2867_v51 = vsub.f32 %v6431_v38, %v8121_v57  ;;  %v2242_v17 = vsel %vm2178_vm12, %v2210_v39, %v2146_v45  ;;  %v2116_v12 = vmul.f32 %v4651_v27, %v1956_v56  ;;  %v6463_v47 = vmul.f32 0.5, %v6348_v60  ;;  %v2349_v56 = vld [vmem:[#allocation2 + $0xb8] sm:$0xff] }
 0x1fc   :  { %8466 = vst [vmem:[#allocation70_spill] sm:$0xff] %v6452_v11  ;;  %v2241_v54 = vsel %vm2177_vm13, %v2209_v4, %v2145_v10  ;;  %v1735_v35 = vadd.f32 -1.4531521, %v1703_v41  ;;  %v1513_v44 = vmul.f32 0.3275911, %v6449_v30  ;;  %v1893_v0 = vmul.f32 %v1861_v36, %v6337_v18 }
 0x1fd   :  { %v2868_v43 = vand.u32 4294901760, %v2867_v51  ;;  %v1862_v2 = vadd.f32 -0.28449672, %v1830_v33  ;;  %4658 = vpow2.f32 %v2072_v59  ;;  %v6470_v13 = vmul.f32 0.70710677, %v6445_v15 }
 0x1fe   :  { %v4655_v52 = vpop.eup %4654  ;;  %v2274_v45 = vadd.f32 1.0, %v2242_v17  ;;  %v2211_v46 = vsub.f32 0.0, %v2147_v58  ;;  %vm2180_vm15 = vcmp.lt.f32.partialorder %v6180_v62, 0.0  ;;  %v6473_v60 = vadd.f32 1.0, %v1513_v44  ;;  %v2333_v17 = vld [vmem:[#allocation2 + $0x38] sm:$0xff] }
 0x1ff   :  { %4195 = vmatprep.subr.mxu1 %v2868_v43  ;;  %v8127_v55 = vand.u32 4294901760, %v6452_v11  ;;  %v6476_v10 = vpop.eup %4656  ;;  %v2148_v61 = vsub.f32 1.0, %v2116_v12  ;;  %v1608_v19 = vmul.f32 %v4655_v52, %v6394_v42  ;;  %v1992_v16 = vsub.f32 0.0, %v6382_v22  ;;  %v1360_v42 = vpop.f32.mrf.mxu1 }
 0x200   :  { %v6481_v39 = vand.u32 2147483647, %v6470_v13  ;;  %v6483_v4 = vand.u32 4294901760, %v2304_v6  ;;  %v2273_v41 = vadd.f32 1.0, %v2241_v54  ;;  %v1767_v36 = vmul.f32 %v1735_v35, %v6414_v37 }
 0x201   :  { %4660 = vrcp.f32 %v6473_v60  ;;  %v1925_v33 = vadd.f32 0.2548296, %v1893_v0  ;;  %v1894_v59 = vmul.f32 %v1862_v2, %v6355_v20  ;;  %v1640_v27 = vsub.f32 2.0, %v1608_v19  ;;  %v1180_v19 = vpop.f32.mrf.mxu0 }
 0x202   :  { %8467 = vst [vmem:[#allocation69_spill] sm:$0xff] %v6483_v4  ;;  %v1514_v51 = vmul.f32 0.3275911, %v6481_v39  ;;  %v2306_v12 = vmul.f32 %v2274_v45, %v6325_v34  ;;  %v2243_v44 = vsel %vm2179_vm14, %v2211_v46, %v2147_v58  ;;  %v2755_v54 = vsub.f32 %v6452_v11, %v8127_v55 }
 0x203   :  { %v6495_v35 = vand.u32 4294901760, %v2349_v56  ;;  %v2212_v43 = vsub.f32 0.0, %v2148_v61  ;;  %v6497_v0 = vmul.f32 %v4655_v52, %v1640_v27  ;;  %v2024_v2 = vmul.f32 %v1992_v16, %v6382_v22  ;;  %v1365_v22 = vpop.f32.mrf.mxu1  ;;  %v8471_v16 = vld [vmem:[#allocation61_spill] sm:$0xff] }
 0x204   :  { %v6500_v57 = vadd.f32 1.0, %v1514_v51  ;;  %v1799_v28 = vadd.f32 1.4214138, %v1767_v36  ;;  %v2756_v14 = vand.u32 4294901760, %v2755_v54  ;;  %v6504_v31 = vadd.f32 %v1360_v42, %v6425_v5 }
 0x205   :  { %8468 = vst [vmem:[#allocation41_spill] sm:$0xff] %v6495_v35  ;;  %4117 = vmatprep.subr.mxu0 %v6495_v35  ;;  %v6506_v34 = vand.u32 4294901760, %v2333_v17  ;;  %v1957_v58 = vmul.f32 %v1925_v33, %v6337_v18  ;;  %v1926_v45 = vadd.f32 0.2548296, %v1894_v59  ;;  %v1704_v52 = vmul.f32 1.0614054, %v6497_v0 }
 0x206   :  { %4662 = vrcp.f32 %v6500_v57  ;;  %v6512_v46 = vsub.f32 %v2304_v6, %v6483_v4  ;;  %v1181_v36 = vadd.f32 %v1180_v19, %v8471_v16  ;;  %4196 = vmatpush3.msra.mxu1 %v2756_v14  ;;  %v6516_v27 = vmul.f32 0.70710677, %v6504_v31 }
 0x207   :  { %8469 = vst [vmem:[#allocation71_spill] sm:$0xff] %v6506_v34  ;;  %4118 = vmatpush3.msra.mxu0 %v6506_v34  ;;  %v6520_v5 = vsub.f32 %v2333_v17, %v6506_v34  ;;  %v6522_v18 = vand.u32 4294901760, %v2306_v12  ;;  %v2275_v33 = vadd.f32 1.0, %v2243_v44  ;;  %v2244_v59 = vsel %vm2180_vm15, %v2212_v43, %v2148_v61 }
 0x208   :  { %8470 = vst [vmem:[#allocation72_spill] sm:$0xff] %v6512_v46  ;;  %v1736_v51 = vadd.f32 -1.4531521, %v1704_v52  ;;  %v1831_v6 = vmul.f32 %v1799_v28, %v6414_v37  ;;  %v6528_v42 = vand.u32 2147483647, %v6516_v27  ;;  %v6531_v14 = vsub.f32 %v2349_v56, %v6495_v35 }
 0x209   :  { %8472 = vst [vmem:[#allocation46_spill] sm:$0xff] %v6520_v5  ;;  %8473 = vst [vmem:[#allocation74_spill] sm:$0xff] %v6522_v18  ;;  %v6533_v54 = vadd.f32 %v1365_v22, %v1181_v36  ;;  %v6536_v17 = vmul.f32 %v6457_v29, %v1957_v58  ;;  %v1958_v19 = vmul.f32 %v1926_v45, %v6355_v20  ;;  %v2074_v44 = vmul.f32 1.442695, %v2024_v2  ;;  %v1182_v58 = vpop.f32.mrf.mxu0 }
 0x20a   :  { %8474 = vst [vmem:[#allocation75_spill] sm:$0xff] %v6531_v14  ;;  %v8126_v62 = vand.u32 4294901760, %v6520_v5  ;;  %v6540_v61 = vpop.eup %4658  ;;  %v6543_v28 = vmul.f32 %v2273_v41, %v6284_v24  ;;  %v2276_v43 = vadd.f32 1.0, %v2244_v59  ;;  %v1515_v52 = vmul.f32 0.3275911, %v6528_v42 }
 0x20b   :  { %v8128_v56 = vand.u32 4294901760, %v6531_v14  ;;  %v6548_v22 = vsub.f32 %v2306_v12, %v6522_v18  ;;  %v1768_v29 = vmul.f32 %v1736_v51, %v6497_v0  ;;  %v6552_v20 = vmul.f32 0.70710677, %v6533_v54 }
 0x20c   :  { %v2762_v2 = vsub.f32 %v6520_v5, %v8126_v62  ;;  %v6558_v24 = vmul.f32 %v2275_v33, %v6344_v50  ;;  %vm2181_vm0 = vcmp.lt.f32.partialorder %v6219_v63, 0.0  ;;  %v1863_v41 = vadd.f32 -0.28449672, %v1831_v6  ;;  %v2348_v50 = vld [vmem:[#allocation2 + $0xb0] sm:$0xff]  ;;  %v1367_v62 = vpop.f32.mrf.mxu1 }
 0x20d   :  { %8475 = vst [vmem:[#allocation50_spill] sm:$0xff] %v6548_v22  ;;  %v6561_v45 = vadd.f32 1.0, %v1515_v52  ;;  %v2874_v12 = vsub.f32 %v6531_v14, %v8128_v56  ;;  %v2149_v36 = vsub.f32 1.0, %v6536_v17  ;;  %v2118_v59 = vmul.f32 %v6476_v10, %v1958_v19  ;;  %v2332_v10 = vld [vmem:[#allocation2 + $0x30] sm:$0xff]  ;;  %v8476_v19 = vld [vmem:[#allocation44_spill] sm:$0xff] }
 0x20e   :  { %v4661_v16 = vpop.eup %4660  ;;  %4664 = vpow2.f32 %v2074_v44  ;;  %v6569_v51 = vand.u32 2147483647, %v6552_v20  ;;  %v2308_v33 = vmul.f32 %v2276_v43, %v6351_v40  ;;  %v2763_v52 = vand.u32 4294901760, %v2762_v2 }
 0x20f   :  { %v1609_v6 = vmul.f32 %v4661_v16, %v6473_v60  ;;  %4666 = vrcp.f32 %v6561_v45  ;;  %v1800_v55 = vadd.f32 1.4214138, %v1768_v29  ;;  %v1183_v56 = vadd.f32 %v1182_v58, %v5945_v49  ;;  %v1187_v60 = vpop.f32.mrf.mxu0 }
 0x210   :  { %v2875_v5 = vand.u32 4294901760, %v2874_v12  ;;  %v1516_v17 = vmul.f32 0.3275911, %v6569_v51  ;;  %vm2182_vm1 = vcmp.lt.f32.partialorder %v8476_v19, 0.0  ;;  %v1895_v44 = vmul.f32 %v1863_v41, %v6414_v37 }
 0x211   :  { %v6579_v34 = vmul.f32 0.5, %v6420_v1  ;;  %v1641_v40 = vsub.f32 2.0, %v1609_v6  ;;  %v6581_v43 = vand.u32 4294901760, %v2348_v50  ;;  %v2213_v2 = vsub.f32 0.0, %v2149_v36  ;;  %v8481_v6 = vld [vmem:[#allocation62_spill] sm:$0xff] }
 0x212   :  { %v2150_v35 = vsub.f32 1.0, %v2118_v59  ;;  %4197 = vmatprep.subr.mxu1 %v2875_v5  ;;  %v6583_v29 = vadd.f32 1.0, %v1516_v17  ;;  %v6585_v49 = vadd.f32 %v1367_v62, %v1183_v56  ;;  %v6587_v12 = vand.u32 4294901760, %v2308_v33  ;;  %v1372_v56 = vpop.f32.mrf.mxu1 }
 0x213   :  { %8477 = vst [vmem:[#allocation16_spill] sm:$0xff] %v6581_v43  ;;  %v4663_v58 = vpop.eup %4662  ;;  %v6589_v14 = vmul.f32 %v4661_v16, %v1641_v40  ;;  %4198 = vmatpush3.msra.mxu1 %v2763_v52  ;;  %4119 = vmatprep.subr.mxu0 %v6581_v43  ;;  %v6592_v1 = vand.u32 4294901760, %v2332_v10  ;;  %v6595_v41 = vsub.f32 %v2348_v50, %v6581_v43  ;;  %v1927_v17 = vadd.f32 0.2548296, %v1895_v44 }
 0x214   :  { %8478 = vst [vmem:[#allocation52_spill] sm:$0xff] %v6587_v12  ;;  %v1832_v59 = vmul.f32 %v1800_v55, %v6497_v0  ;;  %v1610_v5 = vmul.f32 %v4663_v58, %v6500_v57  ;;  %v1188_v62 = vadd.f32 %v1187_v60, %v8481_v6  ;;  %4668 = vrcp.f32 %v6583_v29 }
 0x215   :  { %8479 = vst [vmem:[#allocation58_spill] sm:$0xff] %v6592_v1  ;;  %8480 = vst [vmem:[#allocation61_spill] sm:$0xff] %v6595_v41  ;;  %v1705_v16 = vmul.f32 1.0614054, %v6589_v14  ;;  %v6603_v52 = vmul.f32 0.70710677, %v6585_v49  ;;  %4120 = vmatpush3.msra.mxu0 %v6592_v1  ;;  %v6607_v50 = vsub.f32 %v2332_v10, %v6592_v1  ;;  %v2245_v55 = vsel %vm2181_vm0, %v2213_v2, %v2149_v36 }
 0x216   :  { %v2214_v57 = vsub.f32 0.0, %v2150_v35  ;;  %v1642_v40 = vsub.f32 2.0, %v1610_v5  ;;  %v8145_v60 = vand.u32 4294901760, %v6595_v41  ;;  %v1993_v44 = vsub.f32 0.0, %v6449_v30 }
 0x217   :  { %8482 = vst [vmem:[#allocation44_spill] sm:$0xff] %v6607_v50  ;;  %v1737_v6 = vadd.f32 -1.4531521, %v1705_v16  ;;  %v6614_v43 = vand.u32 2147483647, %v6603_v52  ;;  %v6616_v11 = vadd.f32 %v1372_v56, %v1188_v62  ;;  %v6625_v10 = vsub.f32 %v2308_v33, %v6587_v12 }
 0x218   :  { %v1864_v38 = vadd.f32 -0.28449672, %v1832_v59  ;;  %v6618_v21 = vmul.f32 %v4663_v58, %v1642_v40  ;;  %v2881_v63 = vsub.f32 %v6595_v41, %v8145_v60  ;;  %v1959_v2 = vmul.f32 %v1927_v17, %v6414_v37 }
 0x219   :  { %8483 = vst [vmem:[#allocation62_spill] sm:$0xff] %v6625_v10  ;;  %v1769_v5 = vmul.f32 %v1737_v6, %v6589_v14  ;;  %v1517_v16 = vmul.f32 0.3275911, %v6614_v43  ;;  %v2246_v59 = vsel %vm2182_vm1, %v2214_v57, %v2150_v35  ;;  %v6634_v56 = vmul.f32 0.70710677, %v6616_v11 }
 0x21a   :  { %v1706_v58 = vmul.f32 1.0614054, %v6618_v21  ;;  %v2882_v62 = vand.u32 4294901760, %v2881_v63  ;;  %v2025_v33 = vmul.f32 %v1993_v44, %v6449_v30  ;;  %v1994_v37 = vsub.f32 0.0, %v6481_v39 }
 0x21b   :  { %v6636_v40 = vpop.eup %4664  ;;  %v1801_v60 = vadd.f32 1.4214138, %v1769_v5  ;;  %v6640_v17 = vadd.f32 1.0, %v1517_v16  ;;  %v1896_v36 = vmul.f32 %v1864_v38, %v6497_v0  ;;  %v6644_v35 = vand.u32 2147483647, %v6634_v56 }
 0x21c   :  { %v4667_v6 = vpop.eup %4666  ;;  %v1738_v19 = vadd.f32 -1.4531521, %v1706_v58  ;;  %4199 = vmatprep.subr.mxu1 %v2882_v62  ;;  %v8484_v57 = vand.u32 4294901760, %v6607_v50  ;;  %v2278_v1 = vadd.f32 1.0, %v2246_v59  ;;  %v2119_v5 = vmul.f32 %v6540_v61, %v1959_v2  ;;  %v1189_v58 = vpop.f32.mrf.mxu0  ;;  %v2347_v61 = vld [vmem:[#allocation2 + $0xa8] sm:$0xff]  ;;  %v8485_v2 = vld [vmem:[#allocation56_spill] sm:$0xff] }
 0x21d   :  { %v1611_v30 = vmul.f32 %v4667_v6, %v6561_v45  ;;  %4670 = vrcp.f32 %v6640_v17  ;;  %v6652_v44 = vadd.f32 1.0, %v2245_v55  ;;  %v1833_v38 = vmul.f32 %v1801_v60, %v6589_v14 }
 0x21e   :  { %v2769_v63 = vsub.f32 %v6607_v50, %v8484_v57  ;;  %v1770_v16 = vmul.f32 %v1738_v19, %v6618_v21  ;;  %v1518_v62 = vmul.f32 0.3275911, %v6644_v35  ;;  %v2076_v41 = vmul.f32 1.442695, %v2025_v33  ;;  %v8486_v33 = vld [vmem:[#allocation18_spill] sm:$0xff] }
 0x21f   :  { %v2026_v12 = vmul.f32 %v1994_v37, %v6481_v39  ;;  %v1643_v57 = vsub.f32 2.0, %v1611_v30  ;;  %v1995_v59 = vsub.f32 0.0, %v6528_v42  ;;  %vm2183_vm2 = vcmp.lt.f32.partialorder %v8485_v2, 0.0  ;;  %v1374_v37 = vpop.f32.mrf.mxu1 }
 0x220   :  { %v1928_v45 = vadd.f32 0.2548296, %v1896_v36  ;;  %v1802_v50 = vadd.f32 1.4214138, %v1770_v16  ;;  %v6660_v55 = vadd.f32 1.0, %v1518_v62  ;;  %v2770_v18 = vand.u32 4294901760, %v2769_v63 }
 0x221   :  { %v4669_v60 = vpop.eup %4668  ;;  %v6663_v19 = vmul.f32 %v2278_v1, %v6389_v7  ;;  %v2151_v10 = vsub.f32 1.0, %v2119_v5  ;;  %v6665_v4 = vmul.f32 %v4667_v6, %v1643_v57  ;;  %v1190_v39 = vadd.f32 %v1189_v58, %v8486_v33  ;;  %v6671_v36 = vld [vmem:[#allocation2 + $0x28] sm:$0xff]  ;;  %v1194_v57 = vpop.f32.mrf.mxu0 }
 0x222   :  { %v1865_v30 = vadd.f32 -0.28449672, %v1833_v38  ;;  %v1834_v22 = vmul.f32 %v1802_v50, %v6618_v21  ;;  %v1612_v23 = vmul.f32 %v4669_v60, %v6583_v29  ;;  %4672 = vrcp.f32 %v6660_v55  ;;  %4200 = vmatpush3.msra.mxu1 %v2770_v18 }
 0x223   :  { %v2078_v63 = vmul.f32 1.442695, %v2026_v12  ;;  %v1707_v7 = vmul.f32 1.0614054, %v6665_v4  ;;  %v2027_v1 = vmul.f32 %v1995_v59, %v6528_v42  ;;  %v6675_v6 = vand.u32 4294901760, %v2347_v61 }
 0x224   :  { %v1960_v5 = vmul.f32 %v1928_v45, %v6497_v0  ;;  %4674 = vpow2.f32 %v2076_v41  ;;  %v1644_v38 = vsub.f32 2.0, %v1612_v23  ;;  %v6678_v16 = vadd.f32 %v1374_v37, %v1190_v39 }
 0x225   :  { %8487 = vst [vmem:[#allocation56_spill] sm:$0xff] %v6675_v6  ;;  %v2215_v50 = vsub.f32 0.0, %v2151_v10  ;;  %v1866_v29 = vadd.f32 -0.28449672, %v1834_v22  ;;  %v1739_v58 = vadd.f32 -1.4531521, %v1707_v7  ;;  %4121 = vmatprep.subr.mxu0 %v6675_v6  ;;  %v1897_v12 = vmul.f32 %v1865_v30, %v6589_v14 }
 0x226   :  { %v6682_v18 = vand.u32 4294901760, %v6671_v36  ;;  %v6686_v42 = vmul.f32 0.5, %v6445_v15  ;;  %v6688_v62 = vmul.f32 %v4669_v60, %v1644_v38  ;;  %v6691_v0 = vmul.f32 0.70710677, %v6678_v16 }
 0x227   :  { %4676 = vpow2.f32 %v2078_v63  ;;  %v1771_v23 = vmul.f32 %v1739_v58, %v6665_v4  ;;  %v2080_v22 = vmul.f32 1.442695, %v2027_v1  ;;  %v1996_v41 = vsub.f32 0.0, %v6569_v51  ;;  %v8491_v1 = vld [vmem:[#allocation63_spill] sm:$0xff] }
 0x228   :  { %8488 = vst [vmem:[#allocation18_spill] sm:$0xff] %v6682_v18  ;;  %4122 = vmatpush3.msra.mxu0 %v6682_v18  ;;  %v2120_v59 = vmul.f32 %v6636_v40, %v1960_v5  ;;  %v1708_v45 = vmul.f32 1.0614054, %v6688_v62  ;;  %v6699_v15 = vand.u32 2147483647, %v6691_v0  ;;  %v6702_v60 = vsub.f32 %v2347_v61, %v6675_v6 }
 0x229   :  { %v6705_v33 = vand.u32 4294901760, %v6663_v19  ;;  %v2247_v39 = vsel %vm2183_vm2, %v2215_v50, %v2151_v10  ;;  %v1898_v37 = vmul.f32 %v1866_v29, %v6618_v21  ;;  %v1803_v30 = vadd.f32 1.4214138, %v1771_v23 }
 0x22a   :  { %8489 = vst [vmem:[#allocation76_spill] sm:$0xff] %v6702_v60  ;;  %v4671_v63 = vpop.eup %4670  ;;  %v1929_v7 = vadd.f32 0.2548296, %v1897_v12  ;;  %v1740_v40 = vadd.f32 -1.4531521, %v1708_v45  ;;  %v1195_v5 = vadd.f32 %v1194_v57, %v8491_v1  ;;  %vm2184_vm3 = vcmp.lt.f32.partialorder %v6367_v26, 0.0  ;;  %v1379_v12 = vpop.f32.mrf.mxu1 }
 0x22b   :  { %8490 = vst [vmem:[#allocation77_spill] sm:$0xff] %v6705_v33  ;;  %v1519_v38 = vmul.f32 0.3275911, %v6699_v15  ;;  %v1835_v61 = vmul.f32 %v1803_v30, %v6665_v4  ;;  %v2028_v58 = vmul.f32 %v1996_v41, %v6569_v51  ;;  %v1613_v6 = vmul.f32 %v4671_v63, %v6640_v17 }
 0x22c   :  { %v8165_v10 = vand.u32 4294901760, %v6702_v60  ;;  %v2152_v2 = vsub.f32 1.0, %v2120_v59  ;;  %4678 = vpow2.f32 %v2080_v22  ;;  %v1772_v50 = vmul.f32 %v1740_v40, %v6688_v62 }
 0x22d   :  { %v6718_v29 = vadd.f32 1.0, %v1519_v38  ;;  %v1930_v23 = vadd.f32 0.2548296, %v1898_v37  ;;  %v1867_v57 = vadd.f32 -0.28449672, %v1835_v61  ;;  %v1645_v45 = vsub.f32 2.0, %v1613_v6 }
 0x22e   :  { %v2888_v30 = vsub.f32 %v6702_v60, %v8165_v10  ;;  %v2279_v1 = vadd.f32 1.0, %v2247_v39  ;;  %v1961_v51 = vmul.f32 %v1929_v7, %v6589_v14  ;;  %v1804_v17 = vadd.f32 1.4214138, %v1772_v50 }
 0x22f   :  { %4680 = vrcp.f32 %v6718_v29  ;;  %v4673_v41 = vpop.eup %4672  ;;  %v2082_v22 = vmul.f32 1.442695, %v2028_v58  ;;  %v6725_v59 = vmul.f32 %v4671_v63, %v1645_v45  ;;  %v6727_v38 = vadd.f32 %v1379_v12, %v1195_v5 }
 0x230   :  { %v2889_v40 = vand.u32 4294901760, %v2888_v30  ;;  %v2216_v37 = vsub.f32 0.0, %v2152_v2  ;;  %v1836_v6 = vmul.f32 %v1804_v17, %v6688_v62  ;;  %v1614_v61 = vmul.f32 %v4673_v41, %v6660_v55 }
 0x231   :  { %v6733_v39 = vsub.f32 %v6671_v36, %v6682_v18  ;;  %v4675_v14 = vpop.eup %4674  ;;  %v6737_v7 = vmul.f32 %v6652_v44, %v6364_v32  ;;  %v1962_v63 = vmul.f32 %v1930_v23, %v6618_v21  ;;  %v1899_v58 = vmul.f32 %v1867_v57, %v6665_v4 }
 0x232   :  { %v1709_v5 = vmul.f32 1.0614054, %v6725_v59  ;;  %4201 = vmatprep.subr.mxu1 %v2889_v40  ;;  %v6744_v50 = vsub.f32 %v6663_v19, %v6705_v33  ;;  %v2121_v55 = vmul.f32 %v4675_v14, %v1961_v51  ;;  %v1868_v12 = vadd.f32 -0.28449672, %v1836_v6  ;;  %v1196_v40 = vpop.f32.mrf.mxu0  ;;  %v2330_v33 = vld [vmem:[#allocation2 + $0x20] sm:$0xff] }
 0x233   :  { %8492 = vst [vmem:[#allocation63_spill] sm:$0xff] %v6733_v39  ;;  %v1646_v36 = vsub.f32 2.0, %v1614_v61  ;;  %v2311_v45 = vmul.f32 %v2279_v1, %v6408_v3  ;;  %4682 = vpow2.f32 %v2082_v22  ;;  %v6748_v32 = vmul.f32 0.70710677, %v6727_v38 }
 0x234   :  { %v1741_v30 = vadd.f32 -1.4531521, %v1709_v5  ;;  %v4677_v21 = vpop.eup %4676  ;;  %v2248_v44 = vsel %vm2184_vm3, %v2216_v37, %v2152_v2  ;;  %v1997_v23 = vsub.f32 0.0, %v6614_v43  ;;  %v8164_v19 = vand.u32 4294901760, %v6733_v39 }
 0x235   :  { %v6753_v57 = vmul.f32 %v4673_v41, %v1646_v36  ;;  %vm2185_vm4 = vcmp.lt.f32.partialorder %v6439_v48, 0.0  ;;  %v6757_v51 = vmul.f32 %v4677_v21, %v1962_v63  ;;  %v1931_v3 = vadd.f32 0.2548296, %v1899_v58  ;;  %v8494_v21 = vld [vmem:[#allocation21_spill] sm:$0xff] }
 0x236   :  { %v1998_v1 = vsub.f32 0.0, %v6644_v35  ;;  %v6761_v17 = vand.u32 2147483647, %v6748_v32  ;;  %v2153_v22 = vsub.f32 1.0, %v2121_v55  ;;  %v1900_v26 = vmul.f32 %v1868_v12, %v6688_v62  ;;  %v2346_v12 = vld [vmem:[#allocation2 + $0xa0] sm:$0xff] }
 0x237   :  { %v1773_v2 = vmul.f32 %v1741_v30, %v6725_v59  ;;  %v2776_v41 = vsub.f32 %v6733_v39, %v8164_v19  ;;  %v2280_v37 = vadd.f32 1.0, %v2248_v44  ;;  %v6769_v6 = vmul.f32 0.5, %v6504_v31 }
 0x238   :  { %v1710_v61 = vmul.f32 1.0614054, %v6753_v57  ;;  %v1520_v14 = vmul.f32 0.3275911, %v6761_v17  ;;  %v6773_v63 = vand.u32 4294901760, %v2311_v45  ;;  %vm2186_vm5 = vcmp.lt.f32.partialorder %v6470_v13, 0.0 }
 0x239   :  { %v6777_v58 = vmul.f32 0.5, %v6533_v54  ;;  %v2029_v5 = vmul.f32 %v1997_v23, %v6614_v43  ;;  %v2777_v55 = vand.u32 4294901760, %v2776_v41  ;;  %v4679_v36 = vpop.eup %4678  ;;  %v2154_v30 = vsub.f32 1.0, %v6757_v51  ;;  %v1381_v54 = vpop.f32.mrf.mxu1 }
 0x23a   :  { %8493 = vst [vmem:[#allocation78_spill] sm:$0xff] %v6773_v63  ;;  %v1963_v31 = vmul.f32 %v1931_v3, %v6665_v4  ;;  %v1197_v44 = vadd.f32 %v1196_v40, %v8494_v21  ;;  %v6783_v19 = vadd.f32 1.0, %v1520_v14  ;;  %v2217_v10 = vsub.f32 0.0, %v2153_v22 }
 0x23b   :  { %v1932_v39 = vadd.f32 0.2548296, %v1900_v26  ;;  %v1805_v18 = vadd.f32 1.4214138, %v1773_v2  ;;  %v2030_v60 = vmul.f32 %v1998_v1, %v6644_v35  ;;  %4202 = vmatpush3.msra.mxu1 %v2777_v55  ;;  %v2312_v23 = vmul.f32 %v2280_v37, %v6463_v47  ;;  %v1201_v55 = vpop.f32.mrf.mxu0 }
 0x23c   :  { %v4681_v43 = vpop.eup %4680  ;;  %v1742_v41 = vadd.f32 -1.4531521, %v1710_v61  ;;  %4684 = vrcp.f32 %v6783_v19  ;;  %v6788_v51 = vand.u32 4294901760, %v2346_v12  ;;  %v6791_v4 = vsub.f32 %v2311_v45, %v6773_v63 }
 0x23d   :  { %v6794_v3 = vmul.f32 0.5, %v6585_v49  ;;  %v2084_v26 = vmul.f32 1.442695, %v2029_v5  ;;  %v1615_v35 = vmul.f32 %v4681_v43, %v6718_v29  ;;  %v2218_v1 = vsub.f32 0.0, %v2154_v30 }
 0x23e   :  { %8495 = vst [vmem:[#allocation21_spill] sm:$0xff] %v6788_v51  ;;  %8496 = vst [vmem:[#allocation79_spill] sm:$0xff] %v6791_v4  ;;  %v6797_v2 = vmul.f32 %v4679_v36, %v1963_v31  ;;  %4123 = vmatprep.subr.mxu0 %v6788_v51  ;;  %v6800_v47 = vadd.f32 %v1381_v54, %v1197_v44  ;;  %v6802_v40 = vand.u32 4294901760, %v2330_v33  ;;  %v6808_v14 = vand.u32 4294901760, %v2312_v23  ;;  %v8499_v54 = vld [vmem:[#allocation67_spill] sm:$0xff] }
 0x23f   :  { %v2249_v37 = vsel %vm2185_vm4, %v2217_v10, %v2153_v22  ;;  %v1964_v45 = vmul.f32 %v1932_v39, %v6688_v62  ;;  %v1837_v49 = vmul.f32 %v1805_v18, %v6725_v59  ;;  %v1647_v61 = vsub.f32 2.0, %v1615_v35 }
 0x240   :  { %8497 = vst [vmem:[#allocation80_spill] sm:$0xff] %v6802_v40  ;;  %8498 = vst [vmem:[#allocation81_spill] sm:$0xff] %v6808_v14  ;;  %v1774_v29 = vmul.f32 %v1742_v41, %v6753_v57  ;;  %v2086_v5 = vmul.f32 1.442695, %v2030_v60  ;;  %v6812_v36 = vmul.f32 0.70710677, %v6800_v47  ;;  %4124 = vmatpush3.msra.mxu0 %v6802_v40  ;;  %v4683_v31 = vpop.eup %4682  ;;  %4686 = vpow2.f32 %v2084_v26 }
 0x241   :  { %v6816_v48 = vmul.f32 0.5, %v6616_v11  ;;  %v6818_v62 = vmul.f32 %v4681_v43, %v1647_v61  ;;  %v1999_v18 = vsub.f32 0.0, %v6699_v15  ;;  %v2281_v10 = vadd.f32 1.0, %v2249_v37  ;;  %v1203_v37 = vpop.f32.mrf.mxu0 }
 0x242   :  { %v2250_v39 = vsel %vm2186_vm5, %v2218_v1, %v2154_v30  ;;  %v2155_v60 = vsub.f32 1.0, %v6797_v2  ;;  %vm2187_vm6 = vcmp.lt.f32.partialorder %v6516_v27, 0.0  ;;  %v6826_v22 = vand.u32 2147483647, %v6812_v36  ;;  %v1386_v30 = vpop.f32.mrf.mxu1 }
 0x243   :  { %v2124_v21 = vmul.f32 %v4683_v31, %v1964_v45  ;;  %v1869_v44 = vadd.f32 -0.28449672, %v1837_v49  ;;  %v1202_v11 = vadd.f32 %v1201_v55, %v8499_v54  ;;  %v1711_v43 = vmul.f32 1.0614054, %v6818_v62 }
 0x244   :  { %v6831_v41 = vsub.f32 %v2312_v23, %v6808_v14  ;;  %v1806_v26 = vadd.f32 1.4214138, %v1774_v29  ;;  %4688 = vpow2.f32 %v2086_v5  ;;  %v1521_v13 = vmul.f32 0.3275911, %v6826_v22 }
 0x245   :  { %v2282_v35 = vadd.f32 1.0, %v2250_v39  ;;  %v6835_v1 = vmul.f32 0.5, %v6678_v16  ;;  %v1743_v2 = vadd.f32 -1.4531521, %v1711_v43  ;;  %v6838_v45 = vsub.f32 %v2346_v12, %v6788_v51  ;;  %v8502_v12 = vld [vmem:[#allocation22_spill] sm:$0xff] }
 0x246   :  { %v2313_v49 = vmul.f32 %v2281_v10, %v6579_v34  ;;  %v2219_v61 = vsub.f32 0.0, %v2155_v60  ;;  %v2031_v23 = vmul.f32 %v1999_v18, %v6699_v15  ;;  %v6842_v55 = vadd.f32 1.0, %v1521_v13 }
 0x247   :  { %8500 = vst [vmem:[#allocation67_spill] sm:$0xff] %v6838_v45  ;;  %v2156_v29 = vsub.f32 1.0, %v2124_v21  ;;  %vm2188_vm7 = vcmp.lt.f32.partialorder %v6552_v20, 0.0  ;;  %v1901_v5 = vmul.f32 %v1869_v44, %v6725_v59  ;;  %v8176_v16 = vand.u32 4294901760, %v6838_v45 }
 0x248   :  { %v6847_v31 = vadd.f32 %v1386_v30, %v1202_v11  ;;  %v1838_v39 = vmul.f32 %v1806_v26, %v6753_v57  ;;  %v1204_v54 = vadd.f32 %v1203_v37, %v8502_v12  ;;  %4690 = vrcp.f32 %v6842_v55 }
 0x249   :  { %v6853_v34 = vsub.f32 %v2330_v33, %v6802_v40  ;;  %v4685_v15 = vpop.eup %4684  ;;  %v2314_v18 = vmul.f32 %v2282_v35, %v6686_v42  ;;  %v1775_v10 = vmul.f32 %v1743_v2, %v6818_v62  ;;  %v2000_v21 = vsub.f32 0.0, %v6761_v17  ;;  %v2345_v33 = vld [vmem:[#allocation2 + $0x98] sm:$0xff] }
 0x24a   :  { %8501 = vst [vmem:[#allocation82_spill] sm:$0xff] %v6847_v31  ;;  %v2895_v44 = vsub.f32 %v6838_v45, %v8176_v16  ;;  %v6861_v11 = vand.u32 4294901760, %v2313_v49  ;;  %v2088_v43 = vmul.f32 1.442695, %v2031_v23  ;;  %v1616_v26 = vmul.f32 %v4685_v15, %v6783_v19 }
 0x24b   :  { %8503 = vst [vmem:[#allocation22_spill] sm:$0xff] %v6853_v34  ;;  %v6865_v13 = vmul.f32 0.70710677, %v6847_v31  ;;  %v2251_v42 = vsel %vm2187_vm6, %v2219_v61, %v2155_v60  ;;  %v2220_v30 = vsub.f32 0.0, %v2156_v29  ;;  %v1933_v35 = vadd.f32 0.2548296, %v1901_v5 }
 0x24c   :  { %8504 = vst [vmem:[#allocation83_spill] sm:$0xff] %v6861_v11  ;;  %v2896_v2 = vand.u32 4294901760, %v2895_v44  ;;  %v1870_v37 = vadd.f32 -0.28449672, %v1838_v39  ;;  %v1648_v12 = vsub.f32 2.0, %v1616_v26  ;;  %v8181_v16 = vand.u32 4294901760, %v6853_v34 }
 0x24d   :  { %v6870_v40 = vand.u32 2147483647, %v6865_v13  ;;  %v6873_v23 = vand.u32 4294901760, %v2314_v18  ;;  %v1807_v19 = vadd.f32 1.4214138, %v1775_v10  ;;  %v2032_v51 = vmul.f32 %v2000_v21, %v6761_v17  ;;  %v4687_v27 = vpop.eup %4686 }
 0x24e   :  { %4203 = vmatprep.subr.mxu1 %v2896_v2  ;;  %v6876_v45 = vand.u32 4294901760, %v2345_v33  ;;  %v2283_v60 = vadd.f32 1.0, %v2251_v42  ;;  %v6878_v61 = vmul.f32 %v4685_v15, %v1648_v12  ;;  %v2783_v39 = vsub.f32 %v6853_v34, %v8181_v16  ;;  %v2329_v2 = vld [vmem:[#allocation2 + $0x18] sm:$0xff]  ;;  %v1208_v16 = vpop.f32.mrf.mxu0 }
 0x24f   :  { %8505 = vst [vmem:[#allocation84_spill] sm:$0xff] %v6873_v23  ;;  %v1522_v5 = vmul.f32 0.3275911, %v6870_v40  ;;  %v6885_v44 = vsub.f32 %v2313_v49, %v6861_v11  ;;  %4692 = vpow2.f32 %v2088_v43  ;;  %v6888_v10 = vmul.f32 0.5, %v6727_v38  ;;  %v1388_v49 = vpop.f32.mrf.mxu1 }
 0x250   :  { %8506 = vst [vmem:[#allocation85_spill] sm:$0xff] %v6876_v45  ;;  %4125 = vmatprep.subr.mxu0 %v6876_v45  ;;  %v6892_v17 = vsub.f32 %v2345_v33, %v6876_v45  ;;  %v2252_v15 = vsel %vm2188_vm7, %v2220_v30, %v2156_v29  ;;  %v1965_v21 = vmul.f32 %v1933_v35, %v6725_v59  ;;  %v2090_v12 = vmul.f32 1.442695, %v2032_v51  ;;  %v2344_v45 = vld [vmem:[#allocation2 + $0x90] sm:$0xff] }
 0x251   :  { %v1902_v26 = vmul.f32 %v1870_v37, %v6753_v57  ;;  %v6898_v42 = vadd.f32 1.0, %v1522_v5  ;;  %v4689_v43 = vpop.eup %4688  ;;  %v1839_v38 = vmul.f32 %v1807_v19, %v6818_v62  ;;  %v2784_v34 = vand.u32 4294901760, %v2783_v39  ;;  %v8510_v5 = vld [vmem:[#allocation68_spill] sm:$0xff] }
 0x252   :  { %8507 = vst [vmem:[#allocation86_spill] sm:$0xff] %v6892_v17  ;;  %v8188_v33 = vand.u32 4294901760, %v6892_v17  ;;  %v6903_v20 = vsub.f32 %v2314_v18, %v6873_v23  ;;  %v2315_v59 = vmul.f32 %v2283_v60, %v6769_v6  ;;  %v1712_v29 = vmul.f32 1.0614054, %v6878_v61 }
 0x253   :  { %4694 = vrcp.f32 %v6898_v42  ;;  %v2284_v30 = vadd.f32 1.0, %v2252_v15  ;;  %4204 = vmatpush3.msra.mxu1 %v2784_v34  ;;  %v6911_v35 = vadd.f32 %v1388_v49, %v1204_v54  ;;  %v6913_v37 = vand.u32 4294901760, %v2329_v2 }
 0x254   :  { %8508 = vst [vmem:[#allocation87_spill] sm:$0xff] %v6903_v20  ;;  %v2902_v51 = vsub.f32 %v6892_v17, %v8188_v33  ;;  %v6915_v19 = vmul.f32 %v4687_v27, %v1965_v21  ;;  %v1934_v18 = vadd.f32 0.2548296, %v1902_v26  ;;  %v1209_v39 = vadd.f32 %v1208_v16, %v8510_v5  ;;  %v1393_v16 = vpop.f32.mrf.mxu1 }
 0x255   :  { %8509 = vst [vmem:[#allocation88_spill] sm:$0xff] %v6913_v37  ;;  %v6918_v6 = vand.u32 4294901760, %v2344_v45  ;;  %v4691_v60 = vpop.eup %4690  ;;  %v1871_v23 = vadd.f32 -0.28449672, %v1839_v38  ;;  %4696 = vpow2.f32 %v2090_v12  ;;  %v6921_v34 = vmul.f32 0.70710677, %v6911_v35  ;;  %4126 = vmatpush3.msra.mxu0 %v6913_v37 }
 0x256   :  { %v2903_v15 = vand.u32 4294901760, %v2902_v51  ;;  %v1744_v54 = vadd.f32 -1.4531521, %v1712_v29  ;;  %v6925_v49 = vmul.f32 0.5, %v6800_v47  ;;  %v1617_v27 = vmul.f32 %v4691_v60, %v6842_v55 }
 0x257   :  { %8511 = vst [vmem:[#allocation68_spill] sm:$0xff] %v6918_v6  ;;  %v6929_v21 = vsub.f32 %v2329_v2, %v6913_v37  ;;  %4127 = vmatprep.subr.mxu0 %v6918_v6  ;;  %v6932_v26 = vand.u32 4294901760, %v2315_v59  ;;  %v2316_v38 = vmul.f32 %v2284_v30, %v6777_v58  ;;  %vm2189_vm8 = vcmp.lt.f32.partialorder %v6603_v52, 0.0  ;;  %v1395_v52 = vpop.f32.mrf.mxu1 }
 0x258   :  { %4205 = vmatprep.subr.mxu1 %v2903_v15  ;;  %v6937_v12 = vand.u32 2147483647, %v6921_v34  ;;  %v6940_v47 = vsub.f32 %v2344_v45, %v6918_v6  ;;  %v2157_v55 = vsub.f32 1.0, %v6915_v19  ;;  %v1966_v2 = vmul.f32 %v1934_v18, %v6753_v57  ;;  %v1210_v6 = vpop.f32.mrf.mxu0 }
 0x259   :  { %8512 = vst [vmem:[#allocation89_spill] sm:$0xff] %v6929_v21  ;;  %8513 = vst [vmem:[#allocation90_spill] sm:$0xff] %v6932_v26  ;;  %v1649_v29 = vsub.f32 2.0, %v1617_v27  ;;  %v8193_v51 = vand.u32 4294901760, %v6929_v21  ;;  %v1903_v5 = vmul.f32 %v1871_v23, %v6818_v62  ;;  %v6948_v15 = vadd.f32 %v1393_v16, %v1209_v39 }
 0x25a   :  { %8514 = vst [vmem:[#allocation91_spill] sm:$0xff] %v6940_v47  ;;  %v1523_v58 = vmul.f32 0.3275911, %v6937_v12  ;;  %v8202_v30 = vand.u32 4294901760, %v6940_v47  ;;  %v1776_v33 = vmul.f32 %v1744_v54, %v6878_v61  ;;  %v2001_v45 = vsub.f32 0.0, %v6826_v22  ;;  %v2328_v54 = vld [vmem:[#allocation2 + $0x10] sm:$0xff] }
 0x25b   :  { %8515 = vst [vmem:[#allocation92_spill] sm:$0xff] %v6948_v15  ;;  %v6951_v37 = vmul.f32 %v4691_v60, %v1649_v29  ;;  %v2790_v57 = vsub.f32 %v6929_v21, %v8193_v51  ;;  %v6958_v19 = vsub.f32 %v2315_v59, %v6932_v26  ;;  %v6960_v23 = vand.u32 4294901760, %v2316_v38  ;;  %v2343_v21 = vld [vmem:[#allocation2 + $0x88] sm:$0xff] }
 0x25c   :  { %v6962_v18 = vadd.f32 1.0, %v1523_v58  ;;  %v2909_v39 = vsub.f32 %v6940_v47, %v8202_v30  ;;  %v4693_v60 = vpop.eup %4692  ;;  %v2221_v27 = vsub.f32 0.0, %v2157_v55  ;;  %v6967_v16 = vmul.f32 %v4689_v43, %v1966_v2 }
 0x25d   :  { %8516 = vst [vmem:[#allocation93_spill] sm:$0xff] %v6958_v19  ;;  %8517 = vst [vmem:[#allocation94_spill] sm:$0xff] %v6960_v23  ;;  %v1713_v29 = vmul.f32 1.0614054, %v6951_v37  ;;  %v2791_v51 = vand.u32 4294901760, %v2790_v57  ;;  %v2033_v30 = vmul.f32 %v2001_v45, %v6826_v22  ;;  %v6975_v47 = vand.u32 4294901760, %v2328_v54 }
 0x25e   :  { %v1935_v59 = vadd.f32 0.2548296, %v1903_v5  ;;  %4698 = vrcp.f32 %v6962_v18  ;;  %v2910_v17 = vand.u32 4294901760, %v2909_v39  ;;  %v6972_v58 = vmul.f32 0.70710677, %v6948_v15  ;;  %v8520_v5 = vld [vmem:[#allocation24_spill] sm:$0xff] }
 0x25f   :  { %v1808_v26 = vadd.f32 1.4214138, %v1776_v33  ;;  %v1745_v14 = vadd.f32 -1.4531521, %v1713_v29  ;;  %4206 = vmatpush3.msra.mxu1 %v2791_v51  ;;  %8518 = vst [vmem:[#allocation95_spill] sm:$0xff] %v6975_v47  ;;  %v6978_v2 = vsub.f32 %v2316_v38, %v6960_v23  ;;  %vm2190_vm9 = vcmp.lt.f32.partialorder %v6634_v56, 0.0  ;;  %4128 = vmatpush3.msra.mxu0 %v6975_v47 }
 0x260   :  { %v4695_v43 = vpop.eup %4694  ;;  %v1211_v57 = vadd.f32 %v1210_v6, %v8520_v5  ;;  %4207 = vmatprep.subr.mxu1 %v2910_v17  ;;  %v6983_v39 = vand.u32 2147483647, %v6972_v58  ;;  %v6985_v15 = vand.u32 4294901760, %v2343_v21  ;;  %v2253_v22 = vsel %vm2189_vm8, %v2221_v27, %v2157_v55 }
 0x261   :  { %8519 = vst [vmem:[#allocation96_spill] sm:$0xff] %v6978_v2  ;;  %v2158_v33 = vsub.f32 1.0, %v6967_v16  ;;  %v1618_v51 = vmul.f32 %v4695_v43, %v6898_v42  ;;  %v2002_v38 = vsub.f32 0.0, %v6870_v40  ;;  %v1967_v45 = vmul.f32 %v1935_v59, %v6818_v62 }
 0x262   :  { %8521 = vst [vmem:[#allocation24_spill] sm:$0xff] %v6985_v15  ;;  %v1524_v17 = vmul.f32 0.3275911, %v6983_v39  ;;  %v6996_v6 = vsub.f32 %v2328_v54, %v6975_v47  ;;  %v6999_v29 = vsub.f32 %v2343_v21, %v6985_v15  ;;  %4129 = vmatprep.subr.mxu0 %v6985_v15  ;;  %v7002_v55 = vpop.eup %4696  ;;  %v1840_v42 = vmul.f32 %v1808_v26, %v6878_v61 }
 0x263   :  { %v1777_v27 = vmul.f32 %v1745_v14, %v6951_v37  ;;  %v2092_v16 = vmul.f32 1.442695, %v2033_v30  ;;  %v1650_v5 = vsub.f32 2.0, %v1618_v51  ;;  %v2285_v62 = vadd.f32 1.0, %v2253_v22  ;;  %v2327_v30 = vld [vmem:[#allocation2 + $0x8] sm:$0xff]  ;;  %v2342_v22 = vld [vmem:[#allocation2 + $0x80] sm:$0xff] }
 0x264   :  { %8522 = vst [vmem:[#allocation97_spill] sm:$0xff] %v6996_v6  ;;  %8523 = vst [vmem:[#allocation98_spill] sm:$0xff] %v6999_v29  ;;  %v7006_v59 = vadd.f32 1.0, %v1524_v17  ;;  %v8215_v54 = vand.u32 4294901760, %v6996_v6  ;;  %v8214_v47 = vand.u32 4294901760, %v6999_v29  ;;  %v2222_v21 = vsub.f32 0.0, %v2158_v33 }
 0x265   :  { %v7010_v23 = vmul.f32 %v4695_v43, %v1650_v5  ;;  %v2034_v15 = vmul.f32 %v2002_v38, %v6870_v40  ;;  %v7013_v2 = vadd.f32 %v1395_v52, %v1211_v57  ;;  %v2127_v31 = vmul.f32 %v4693_v60, %v1967_v45  ;;  %v2326_v17 = vld [vmem:[#allocation2] sm:$0xff] }
 0x266   :  { %4700 = vrcp.f32 %v7006_v59  ;;  %v2797_v14 = vsub.f32 %v6996_v6, %v8215_v54  ;;  %v2916_v26 = vsub.f32 %v6999_v29, %v8214_v47  ;;  %v1872_v51 = vadd.f32 -0.28449672, %v1840_v42 }
 0x267   :  { %v1809_v43 = vadd.f32 1.4214138, %v1777_v27  ;;  %4702 = vpow2.f32 %v2092_v16  ;;  %v1714_v40 = vmul.f32 1.0614054, %v7010_v23  ;;  %v2003_v57 = vsub.f32 0.0, %v6937_v12 }
 0x268   :  { %v2798_v60 = vand.u32 4294901760, %v2797_v14  ;;  %v2917_v38 = vand.u32 4294901760, %v2916_v26  ;;  %v7025_v45 = vmul.f32 0.70710677, %v7013_v2  ;;  %v7028_v52 = vmul.f32 %v2285_v62, %v6794_v3 }
 0x269   :  { %v2254_v5 = vsel %vm2190_vm9, %v2222_v21, %v2158_v33  ;;  %vm2191_vm10 = vcmp.lt.f32.partialorder %v6691_v0, 0.0  ;;  %v1746_v42 = vadd.f32 -1.4531521, %v1714_v40  ;;  %v7033_v27 = vand.u32 4294901760, %v2327_v30 }
 0x26a   :  { %v2159_v16 = vsub.f32 1.0, %v2127_v31  ;;  %v2094_v47 = vmul.f32 1.442695, %v2034_v15  ;;  %4208 = vmatpush3.msra.mxu1 %v2798_v60  ;;  %v7036_v14 = vand.u32 2147483647, %v7025_v45  ;;  %v7038_v26 = vand.u32 4294901760, %v2342_v22 }
 0x26b   :  { %8524 = vst [vmem:[#allocation99_spill] sm:$0xff] %v7033_v27  ;;  %v4699_v54 = vpop.eup %4698  ;;  %v1904_v3 = vmul.f32 %v1872_v51, %v6878_v61  ;;  %v1841_v62 = vmul.f32 %v1809_v43, %v6951_v37  ;;  %4209 = vmatprep.subr.mxu1 %v2917_v38  ;;  %v7043_v56 = vsub.f32 %v2327_v30, %v7033_v27  ;;  %v7045_v33 = vand.u32 4294901760, %v2326_v17 }
 0x26c   :  { %8525 = vst [vmem:[#allocation100_spill] sm:$0xff] %v7038_v26  ;;  %4130 = vmatpush3.msra.mxu0 %v7033_v27  ;;  %v2286_v31 = vadd.f32 1.0, %v2254_v5  ;;  %v1619_v15 = vmul.f32 %v4699_v54, %v6962_v18  ;;  %v2035_v21 = vmul.f32 %v2003_v57, %v6937_v12  ;;  %v1525_v40 = vmul.f32 0.3275911, %v7036_v14  ;;  %v8530_v57 = vld [vmem:[#allocation10_spill] sm:$0xff] }
 0x26d   :  { %8526 = vst [vmem:[#allocation101_spill] sm:$0xff] %v7043_v56  ;;  %8527 = vst [vmem:[#allocation102_spill] sm:$0xff] %v7045_v33  ;;  %4131 = vmatprep.subr.mxu0 %v7038_v26  ;;  %v7053_v51 = vand.u32 4294901760, %v7028_v52  ;;  %v1778_v43 = vmul.f32 %v1746_v42, %v7010_v23  ;;  %v8224_v30 = vand.u32 4294901760, %v7043_v56  ;;  %v7058_v60 = vsub.f32 %v2342_v22, %v7038_v26 }
 0x26e   :  { %4132 = vmatpush3.msra.mxu0 %v7045_v33  ;;  %v2223_v38 = vsub.f32 0.0, %v2159_v16  ;;  %4704 = vpow2.f32 %v2094_v47  ;;  %v1651_v18 = vsub.f32 2.0, %v1619_v15  ;;  %v7061_v12 = vadd.f32 1.0, %v1525_v40 }
 0x26f   :  { %8528 = vst [vmem:[#allocation103_spill] sm:$0xff] %v7053_v51  ;;  %8529 = vst [vmem:[#allocation104_spill] sm:$0xff] %v7058_v60  ;;  %4261 = vmatprep.subr.mxu0 %v8530_v57  ;;  %v1936_v5 = vadd.f32 0.2548296, %v1904_v3  ;;  %v1873_v29 = vadd.f32 -0.28449672, %v1841_v62  ;;  %v2804_v42 = vsub.f32 %v7043_v56, %v8224_v30  ;;  %v7069_v22 = vmul.f32 %v2286_v31, %v6816_v48 }
 0x270   :  { %v8225_v27 = vand.u32 4294901760, %v7058_v60  ;;  %v7071_v26 = vmul.f32 %v4699_v54, %v1651_v18  ;;  %v2096_v6 = vmul.f32 1.442695, %v2035_v21  ;;  %4706 = vrcp.f32 %v7061_v12  ;;  %v8532_v31 = vld [vmem:[#allocation33_spill] sm:$0xff] }
 0x271   :  { %v1810_v47 = vadd.f32 1.4214138, %v1778_v43  ;;  %v2004_v15 = vsub.f32 0.0, %v6983_v39  ;;  %v2805_v40 = vand.u32 4294901760, %v2804_v42  ;;  %v7080_v62 = vsel %vm2191_vm10, %v2223_v38, %v2159_v16 }
 0x272   :  { %v2923_v3 = vsub.f32 %v7058_v60, %v8225_v27  ;;  %v1715_v48 = vmul.f32 1.0614054, %v7071_v26  ;;  %v7084_v54 = vsub.f32 %v2326_v17, %v7045_v33  ;;  %v7087_v21 = vand.u32 4294901760, %v8532_v31  ;;  %v8534_v27 = vld [vmem:[#allocation39_spill] sm:$0xff] }
 0x273   :  { %v4701_v43 = vpop.eup %4700  ;;  %v1968_v18 = vmul.f32 %v1936_v5, %v6878_v61  ;;  %v1905_v42 = vmul.f32 %v1873_v29, %v6951_v37  ;;  %4210 = vmatpush3.msra.mxu1 %v2805_v40  ;;  %v7092_v57 = vand.u32 4294901760, %v8534_v27  ;;  %v1842_v61 = vmul.f32 %v1810_v47, %v7010_v23 }
 0x274   :  { %8531 = vst [vmem:[#allocation105_spill] sm:$0xff] %v7084_v54  ;;  %8533 = vst [vmem:[#allocation33_spill] sm:$0xff] %v7087_v21  ;;  %v2924_v30 = vand.u32 4294901760, %v2923_v3  ;;  %v7094_v0 = vpop.eup %4702  ;;  %v1747_v16 = vadd.f32 -1.4531521, %v1715_v48  ;;  %v1620_v38 = vmul.f32 %v4701_v43, %v7006_v59  ;;  %v8230_v17 = vand.u32 4294901760, %v7084_v54  ;;  %2927 = vmatprep.mubr.f32.mxu1 %v7087_v21 }
 0x275   :  { %8535 = vst [vmem:[#allocation39_spill] sm:$0xff] %v7092_v57  ;;  %v7101_v60 = vsub.f32 %v8532_v31, %v7087_v21  ;;  %4708 = vpow2.f32 %v2096_v6  ;;  %v2036_v29 = vmul.f32 %v2004_v15, %v6983_v39  ;;  %v7107_v5 = vsub.f32 %v8534_v27, %v7092_v57  ;;  %v8537_v48 = vld [vmem:[#allocation53_spill] sm:$0xff] }
 0x276   :  { %4211 = vmatprep.subr.mxu1 %v2924_v30  ;;  %v1779_v59 = vmul.f32 %v1747_v16, %v7071_v26  ;;  %v1652_v40 = vsub.f32 2.0, %v1620_v38  ;;  %v2811_v3 = vsub.f32 %v7084_v54, %v8230_v17  ;;  %v7114_v31 = vand.u32 4294901760, %v8537_v48 }
 0x277   :  { %8536 = vst [vmem:[#allocation106_spill] sm:$0xff] %v7107_v5  ;;  %v7117_v47 = vmul.f32 %v7002_v55, %v1968_v18  ;;  %v2005_v39 = vsub.f32 0.0, %v7036_v14  ;;  %v8238_v6 = vand.u32 4294901760, %v7101_v60  ;;  %v8237_v27 = vand.u32 4294901760, %v7107_v5  ;;  %v8539_v18 = vld [vmem:[#allocation37_spill] sm:$0xff] }
 0x278   :  { %8538 = vst [vmem:[#allocation53_spill] sm:$0xff] %v7114_v31  ;;  %v1937_v30 = vadd.f32 0.2548296, %v1905_v42  ;;  %v1811_v15 = vadd.f32 1.4214138, %v1779_v59  ;;  %v7122_v16 = vmul.f32 %v4701_v43, %v1652_v40  ;;  %v2812_v38 = vand.u32 4294901760, %v2811_v3 }
 0x279   :  { %v1874_v21 = vadd.f32 -0.28449672, %v1842_v61  ;;  %v2464_v17 = vsub.f32 %v7101_v60, %v8238_v6  ;;  %v2479_v55 = vsub.f32 %v7107_v5, %v8237_v27  ;;  %v2098_v42 = vmul.f32 1.442695, %v2036_v29  ;;  %v8540_v40 = vld [vmem:[#allocation25_spill] sm:$0xff]  ;;  %v8541_v27 = vld [vmem:[#allocation8_spill] sm:$0xff] }
 0x27a   :  { %v1843_v56 = vmul.f32 %v1811_v15, %v7071_v26  ;;  %v1716_v33 = vmul.f32 1.0614054, %v7122_v16  ;;  %4212 = vmatpush3.msra.mxu1 %v2812_v38  ;;  %v7135_v43 = vsub.f32 %v8537_v48, %v7114_v31  ;;  %v2037_v59 = vmul.f32 %v2005_v39, %v7036_v14  ;;  %v8543_v38 = vld [vmem:[#allocation9_spill] sm:$0xff] }
 0x27b   :  { %v7137_v61 = vpop.eup %4704  ;;  %2929 = vmatmul.mubr.f32.vlgmr.msra.gmra.mxu1 %v8540_v40  ;;  %v2465_v3 = vand.u32 4294901760, %v2464_v17  ;;  %4341 = vmatprep.subr.mxu1 %v8541_v27  ;;  %v2480_v6 = vand.u32 4294901760, %v2479_v55  ;;  %v7143_v15 = vand.u32 4294901760, %v6370_v8  ;;  %v8544_v48 = vand.u32 4294901760, %v8539_v18 }
 0x27c   :  { %v1875_v54 = vadd.f32 -0.28449672, %v1843_v56  ;;  %v1748_v29 = vadd.f32 -1.4531521, %v1716_v33  ;;  %2934 = vmatprep.mubr.f32.mxu1 %v7092_v57  ;;  %4342 = vmatpush3.msra.mxu1 %v8543_v38  ;;  %v1969_v55 = vmul.f32 %v1937_v30, %v6951_v37  ;;  %v1906_v40 = vmul.f32 %v1874_v21, %v7010_v23  ;;  %v8545_v56 = vld [vmem:[#allocation12_spill] sm:$0xff]  ;;  %v8546_v33 = vld [vmem:[#allocation49_spill] sm:$0xff] }
 0x27d   :  { %8542 = vst [vmem:[#allocation107_spill] sm:$0xff] %v7143_v15  ;;  %v2485_v5 = vsub.f32 %v8539_v18, %v8544_v48  ;;  %v4707_v39 = vpop.eup %4706  ;;  %2466 = vmatprep.mubr.f32.mxu0 %v2465_v3  ;;  %4343 = vmatprep.subr.mxu1 %v8545_v56  ;;  %v8547_v18 = vld [vmem:[#allocation26_spill] sm:$0xff]  ;;  %v8549_v17 = vand.u32 4294901760, %v7135_v43  ;;  %4710 = vpow2.f32 %v2098_v42  ;;  %v2100_v21 = vmul.f32 1.442695, %v2037_v59  ;;  %v8550_v30 = vld [vmem:[#allocation31_spill] sm:$0xff] }
 0x27e   :  { %v1907_v38 = vmul.f32 %v1875_v54, %v7071_v26  ;;  %v1780_v27 = vmul.f32 %v1748_v29, %v7122_v16  ;;  %v1621_v48 = vmul.f32 %v4707_v39, %v7061_v12  ;;  %v8548_v14 = vand.u32 4294901760, %v8547_v18  ;;  %v8551_v3 = vld [vmem:[#allocation11_spill] sm:$0xff]  ;;  %v8555_v56 = vld [vmem:[#allocation13_spill] sm:$0xff] }
 0x27f   :  { %v2494_v37 = vsub.f32 %v7135_v43, %v8549_v17  ;;  %2936 = vmatmul.mubr.f32.gmra.mxu1 %v8550_v30  ;;  %v7167_v57 = vand.u32 4294901760, %v6434_v9  ;;  %v7171_v54 = vsub.f32 %v6370_v8, %v7143_v15  ;;  %v2486_v29 = vand.u32 4294901760, %v2485_v5  ;;  %v8554_v17 = vld [vmem:[#allocation14_spill] sm:$0xff] }
 0x280   :  { %2472 = vmatmul.mubr.f32.vlgmr.msra.gmra.mxu0 %v8548_v14  ;;  %v1812_v12 = vadd.f32 1.4214138, %v1780_v27  ;;  %v1653_v18 = vsub.f32 2.0, %v1621_v48  ;;  %2941 = vmatprep.mubr.f32.mxu1 %v7114_v31  ;;  %v8553_v42 = vand.u32 4294901760, %v8546_v33  ;;  %v7178_v14 = vmul.f32 %v7094_v0, %v1969_v55  ;;  %v8557_v0 = vld [vmem:[#allocation19_spill] sm:$0xff] }
 0x281   :  { %4262 = vmatpush3.msra.mxu0 %v8551_v3  ;;  %8552 = vst [vmem:[#allocation49_spill] sm:$0xff] %v7167_v57  ;;  %2481 = vmatprep.mubr.f32.mxu0 %v2480_v6  ;;  %v2495_v30 = vand.u32 4294901760, %v2494_v37  ;;  %v8246_v8 = vand.u32 4294901760, %v7171_v54  ;;  %v8247_v27 = vand.u32 4294901760, %v6329_v53  ;;  %v1938_v31 = vadd.f32 0.2548296, %v1906_v40 }
 0x282   :  { %v2500_v59 = vsub.f32 %v8546_v33, %v8553_v42  ;;  %4263 = vmatprep.subr.mxu0 %v8554_v17  ;;  %4344 = vmatpush3.msra.mxu1 %v8555_v56  ;;  %v4709_v48 = vpop.eup %4708  ;;  %v1939_v6 = vadd.f32 0.2548296, %v1907_v38  ;;  %v1844_v5 = vmul.f32 %v1812_v12, %v7122_v16  ;;  %v7185_v3 = vmul.f32 %v4707_v39, %v1653_v18  ;;  %v8556_v42 = vld [vmem:[#allocation42_spill] sm:$0xff] }
 0x283   :  { %2943 = vmatmul.mubr.f32.gmra.mxu1 %v8556_v42  ;;  %4264 = vmatpush3.msra.mxu0 %v8557_v0  ;;  %v2509_v55 = vsub.f32 %v7171_v54, %v8246_v8  ;;  %v7193_v37 = vand.u32 4294901760, %v6543_v28  ;;  %v2515_v40 = vsub.f32 %v6329_v53, %v8247_v27  ;;  %v7200_v38 = vsub.f32 %v6434_v9, %v7167_v57  ;;  %v8560_v8 = vld [vmem:[#allocation20_spill] sm:$0xff]  ;;  %v8563_v53 = vld [vmem:[#allocation59_spill] sm:$0xff] }
 0x284   :  { %2487 = vmatmul.mubr.f32.gmra.mxu0 %v2486_v29  ;;  %v1876_v39 = vadd.f32 -0.28449672, %v1844_v5  ;;  %v1717_v12 = vmul.f32 1.0614054, %v7185_v3  ;;  %4712 = vpow2.f32 %v2100_v21  ;;  %2948 = vmatprep.mubr.f32.mxu1 %v7143_v15  ;;  %v2501_v18 = vand.u32 4294901760, %v2500_v59  ;;  %v8559_v29 = vld [vmem:[#allocation29_spill] sm:$0xff] }
 0x285   :  { %8558 = vst [vmem:[#allocation26_spill] sm:$0xff] %v7193_v37  ;;  %2496 = vmatprep.mubr.f32.mxu0 %v2495_v30  ;;  %4265 = vmatprep.subr.mxu0 %v8559_v29  ;;  %v2510_v42 = vand.u32 4294901760, %v2509_v55  ;;  %v7208_v27 = vand.u32 4294901760, %v6558_v24  ;;  %v8252_v9 = vand.u32 4294901760, %v6377_v25  ;;  %v1970_v5 = vmul.f32 %v1938_v31, %v7010_v23  ;;  %v8562_v59 = vld [vmem:[#allocation27_spill] sm:$0xff]  ;;  %v8564_v55 = vld [vmem:[#allocation30_spill] sm:$0xff] }
 0x286   :  { %4345 = vmatprep.subr.mxu1 %v8560_v8  ;;  %v1971_v21 = vmul.f32 %v1939_v6, %v7071_v26  ;;  %v1908_v15 = vmul.f32 %v1876_v39, %v7122_v16  ;;  %v1749_v30 = vadd.f32 -1.4531521, %v1717_v12  ;;  %4266 = vmatpush3.msra.mxu0 %v8564_v55  ;;  %v2516_v0 = vand.u32 4294901760, %v2515_v40  ;;  %v8568_v12 = vld [vmem:[#allocation36_spill] sm:$0xff] }
 0x287   :  { %8561 = vst [vmem:[#allocation14_spill] sm:$0xff] %v7208_v27  ;;  %4346 = vmatpush3.msra.mxu1 %v8562_v59  ;;  %v8565_v8 = vand.u32 4294901760, %v7200_v38  ;;  %v2530_v23 = vsub.f32 %v6377_v25, %v8252_v9  ;;  %v7225_v26 = vsub.f32 %v6543_v28, %v7193_v37  ;;  %vm2192_vm11 = vcmp.lt.f32.partialorder %v6748_v32, 0.0  ;;  %4267 = vmatprep.subr.mxu0 %v8568_v12  ;;  %v8569_v28 = vld [vmem:[#allocation32_spill] sm:$0xff] }
 0x288   :  { %2502 = vmatmul.mubr.f32.gmra.mxu0 %v2501_v18  ;;  %2950 = vmatmul.mubr.f32.gmra.mxu1 %v8563_v53  ;;  %v1940_v31 = vadd.f32 0.2548296, %v1908_v15  ;;  %v1781_v6 = vmul.f32 %v1749_v30, %v7185_v3  ;;  %v7231_v40 = vand.u32 4294901760, %v6737_v7  ;;  %v2161_v39 = vsub.f32 1.0, %v7178_v14  ;;  %v8572_v53 = vld [vmem:[#allocation64_spill] sm:$0xff] }
 0x289   :  { %v2524_v29 = vsub.f32 %v7200_v38, %v8565_v8  ;;  %8566 = vst [vmem:[#allocation13_spill] sm:$0xff] %v7225_v26  ;;  %2955 = vmatprep.mubr.f32.mxu1 %v7167_v57  ;;  %2511 = vmatprep.mubr.f32.mxu0 %v2510_v42  ;;  %vm2193_vm12 = vcmp.lt.f32.partialorder %v6812_v36, 0.0  ;;  %v8257_v15 = vand.u32 4294901760, %v7225_v26  ;;  %v7241_v30 = vsub.f32 %v6558_v24, %v7208_v27  ;;  %v8571_v57 = vld [vmem:[#allocation34_spill] sm:$0xff] }
 0x28a   :  { %8567 = vst [vmem:[#allocation27_spill] sm:$0xff] %v7231_v40  ;;  %4347 = vmatprep.subr.mxu1 %v8569_v28  ;;  %v7244_v42 = vmul.f32 %v7137_v61, %v1970_v5  ;;  %v7246_v9 = vmul.f32 %v4709_v48, %v1971_v21  ;;  %v1972_v14 = vmul.f32 %v1940_v31, %v7122_v16  ;;  %v1813_v8 = vadd.f32 1.4214138, %v1781_v6  ;;  %v8575_v5 = vld [vmem:[#allocation50_spill] sm:$0xff]  ;;  %v4711_v21 = vpop.eup %4710  ;;  %v8578_v16 = vld [vmem:[#allocation45_spill] sm:$0xff]  ;;  %v8579_v48 = vld [vmem:[#allocation40_spill] sm:$0xff] }
 0x28b   :  { %v2525_v18 = vand.u32 4294901760, %v2524_v29  ;;  %8570 = vst [vmem:[#allocation30_spill] sm:$0xff] %v7241_v30  ;;  %4348 = vmatpush3.msra.mxu1 %v8571_v57  ;;  %v8573_v29 = vld [vmem:[#allocation38_spill] sm:$0xff]  ;;  %v2539_v24 = vsub.f32 %v7225_v26, %v8257_v15  ;;  %v8574_v25 = vand.u32 4294901760, %v6512_v46  ;;  %v2531_v6 = vand.u32 4294901760, %v2530_v23 }
 0x28c   :  { %2517 = vmatmul.mubr.f32.gmra.mxu0 %v2516_v0  ;;  %2957 = vmatmul.mubr.f32.gmra.mxu1 %v8572_v53  ;;  %v2287_v0 = vadd.f32 1.0, %v7080_v62  ;;  %v1845_v31 = vmul.f32 %v1813_v8, %v7185_v3  ;;  %v7265_v15 = vsub.f32 %v6737_v7, %v7231_v40  ;;  %v8577_v53 = vsub.f32 1.0, %v7117_v47 }
 0x28d   :  { %4268 = vmatpush3.msra.mxu0 %v8573_v29  ;;  %v2545_v61 = vsub.f32 %v6512_v46, %v8574_v25  ;;  %2962 = vmatprep.mubr.f32.mxu1 %v7193_v37  ;;  %v2225_v46 = vsub.f32 0.0, %v2161_v39  ;;  %vm2194_vm13 = vcmp.lt.f32.partialorder %v6865_v13, 0.0  ;;  %v2540_v62 = vand.u32 4294901760, %v2539_v24  ;;  %v8581_v29 = vld [vmem:[#allocation43_spill] sm:$0xff] }
 0x28e   :  { %2526 = vmatprep.mubr.f32.mxu0 %v2525_v18  ;;  %8576 = vst [vmem:[#allocation36_spill] sm:$0xff] %v7265_v15  ;;  %v2224_v25 = vsub.f32 0.0, %v8577_v53  ;;  %4269 = vmatprep.subr.mxu0 %v8578_v16  ;;  %v8580_v8 = vand.u32 4294901760, %v7241_v30  ;;  %v2162_v23 = vsub.f32 1.0, %v7244_v42  ;;  %v2163_v7 = vsub.f32 1.0, %v7246_v9  ;;  %v8582_v16 = vld [vmem:[#allocation69_spill] sm:$0xff] }
 0x28f   :  { %4349 = vmatprep.subr.mxu1 %v8579_v48  ;;  %v1877_v37 = vadd.f32 -0.28449672, %v1845_v31  ;;  %v8266_v53 = vand.u32 4294901760, %v7265_v15  ;;  %v7279_v26 = vmul.f32 %v4711_v21, %v1972_v14  ;;  %v8583_v48 = vld [vmem:[#allocation47_spill] sm:$0xff]  ;;  %v2546_v24 = vand.u32 4294901760, %v2545_v61  ;;  %v8585_v42 = vld [vmem:[#allocation62_spill] sm:$0xff] }
 0x290   :  { %v2554_v18 = vsub.f32 %v7241_v30, %v8580_v8  ;;  %2532 = vmatmul.mubr.f32.gmra.mxu0 %v2531_v6  ;;  %4350 = vmatpush3.msra.mxu1 %v8581_v29  ;;  %v8584_v57 = vand.u32 4294901760, %v8575_v5  ;;  %v7295_v61 = vsub.f32 %v7028_v52, %v7053_v51  ;;  %v8588_v30 = vsub.f32 1.0, %v7117_v47  ;;  %v8593_v47 = vld [vmem:[#allocation54_spill] sm:$0xff] }
 0x291   :  { %2964 = vmatmul.mubr.f32.gmra.mxu1 %v8582_v16  ;;  %4270 = vmatpush3.msra.mxu0 %v8583_v48  ;;  %v1909_v9 = vmul.f32 %v1877_v37, %v7185_v3  ;;  %v2569_v14 = vsub.f32 %v7265_v15, %v8266_v53  ;;  %v4713_v6 = vpop.eup %4712  ;;  %v2319_v37 = vmul.f32 %v2287_v0, %v6835_v1  ;;  %v8590_v53 = vld [vmem:[#allocation48_spill] sm:$0xff]  ;;  %v2227_v52 = vsub.f32 0.0, %v2163_v7  ;;  %v8591_v15 = vld [vmem:[#allocation51_spill] sm:$0xff]  ;;  %v8592_v0 = vld [vmem:[#allocation74_spill] sm:$0xff] }
 0x292   :  { %v2560_v8 = vsub.f32 %v8575_v5, %v8584_v57  ;;  %2969 = vmatprep.mubr.f32.mxu1 %v7208_v27  ;;  %2541 = vmatprep.mubr.f32.mxu0 %v2540_v62  ;;  %v2555_v31 = vand.u32 4294901760, %v2554_v18  ;;  %8586 = vst [vmem:[#allocation32_spill] sm:$0xff] %v7295_v61  ;;  %v7298_v57 = vand.u32 4294901760, %v7069_v22  ;;  %v2256_v62 = vsel %vm2192_vm11, %v2224_v25, %v8588_v30  ;;  %v8589_v18 = vld [vmem:[#allocation55_spill] sm:$0xff]  ;;  %v8597_v25 = vld [vmem:[#allocation66_spill] sm:$0xff] }
 0x293   :  { %4271 = vmatprep.subr.mxu0 %v8589_v18  ;;  %4351 = vmatprep.subr.mxu1 %v8590_v53  ;;  %v2257_v21 = vsel %vm2193_vm12, %v2225_v46, %v2161_v39  ;;  %v2226_v27 = vsub.f32 0.0, %v2162_v23  ;;  %v1941_v16 = vadd.f32 0.2548296, %v1909_v9  ;;  %v2164_v1 = vsub.f32 1.0, %v7279_v26  ;;  %v8598_v46 = vld [vmem:[#allocation57_spill] sm:$0xff] }
 0x294   :  { %8587 = vst [vmem:[#allocation50_spill] sm:$0xff] %v7298_v57  ;;  %2547 = vmatmul.mubr.f32.gmra.mxu0 %v2546_v24  ;;  %4352 = vmatpush3.msra.mxu1 %v8591_v15  ;;  %v8594_v32 = vand.u32 4294901760, %v8585_v42  ;;  %v2561_v39 = vand.u32 4294901760, %v2560_v8  ;;  %v2570_v24 = vand.u32 4294901760, %v2569_v14  ;;  %v8595_v26 = vand.u32 4294901760, %v6791_v4  ;;  %v8599_v14 = vld [vmem:[#allocation65_spill] sm:$0xff] }
 0x295   :  { %2971 = vmatmul.mubr.f32.gmra.mxu1 %v8592_v0  ;;  %4272 = vmatpush3.msra.mxu0 %v8593_v47  ;;  %v1973_v36 = vmul.f32 %v1941_v16, %v7185_v3  ;;  %v7323_v0 = vand.u32 4294901760, %v2319_v37  ;;  %v2289_v47 = vadd.f32 1.0, %v2257_v21  ;;  %vm2195_vm14 = vcmp.lt.f32.partialorder %v6921_v34, 0.0  ;;  %v8601_v21 = vld [vmem:[#allocation23_spill] sm:$0xff] }
 0x296   :  { %v2575_v30 = vsub.f32 %v8585_v42, %v8594_v32  ;;  %2976 = vmatprep.mubr.f32.mxu1 %v7231_v40  ;;  %2556 = vmatprep.mubr.f32.mxu0 %v2555_v31  ;;  %v2584_v9 = vsub.f32 %v6791_v4, %v8595_v26  ;;  %v1427_v32 = vmul.f32 0.5, %v6911_v35  ;;  %v2288_v3 = vadd.f32 1.0, %v2256_v62  ;;  %v8600_v40 = vld [vmem:[#allocation52_spill] sm:$0xff] }
 0x297   :  { %8596 = vst [vmem:[#allocation43_spill] sm:$0xff] %v7323_v0  ;;  %4273 = vmatprep.subr.mxu0 %v8597_v25  ;;  %4353 = vmatprep.subr.mxu1 %v8598_v46  ;;  %v2258_v16 = vsel %vm2194_vm13, %v2226_v27, %v2162_v23  ;;  %v2259_v8 = vsel %vm2195_vm14, %v2227_v52, %v2163_v7  ;;  %v2228_v26 = vsub.f32 0.0, %v2164_v1  ;;  %v8602_v34 = vand.u32 4294901760, %v6744_v50 }
 0x298   :  { %v2133_v31 = vmul.f32 %v4713_v6, %v1973_v36  ;;  %2562 = vmatmul.mubr.f32.gmra.mxu0 %v2561_v39  ;;  %4354 = vmatpush3.msra.mxu1 %v8599_v14  ;;  %v2576_v35 = vand.u32 4294901760, %v2575_v30  ;;  %v8603_v62 = vand.u32 4294901760, %v6885_v44  ;;  %v2585_v23 = vand.u32 4294901760, %v2584_v9  ;;  %v8605_v39 = vld [vmem:[#allocation15_spill] sm:$0xff]  ;;  %v8608_v6 = vld [vmem:[#allocation77_spill] sm:$0xff] }
 0x299   :  { %2978 = vmatmul.mubr.f32.gmra.mxu1 %v8600_v40  ;;  %4274 = vmatpush3.msra.mxu0 %v8601_v21  ;;  %v2590_v4 = vsub.f32 %v6744_v50, %v8602_v34  ;;  %v7344_v52 = vsub.f32 %v2319_v37, %v7323_v0  ;;  %v2321_v30 = vmul.f32 %v2289_v47, %v6925_v49  ;;  %v2291_v36 = vadd.f32 1.0, %v2259_v8  ;;  %v8606_v34 = vld [vmem:[#allocation17_spill] sm:$0xff]  ;;  %v8609_v49 = vld [vmem:[#allocation70_spill] sm:$0xff] }
 0x29a   :  { %v2599_v13 = vsub.f32 %v6885_v44, %v8603_v62  ;;  %v2165_v27 = vsub.f32 1.0, %v2133_v31  ;;  %2983 = vmatprep.mubr.f32.mxu1 %v6773_v63  ;;  %2571 = vmatprep.mubr.f32.mxu0 %v2570_v24  ;;  %vm2196_vm15 = vcmp.lt.f32.partialorder %v6972_v58, 0.0  ;;  %v2320_v31 = vmul.f32 %v2288_v3, %v6888_v10  ;;  %v8607_v62 = vld [vmem:[#allocation73_spill] sm:$0xff]  ;;  %v8622_v63 = vld [vmem:[#allocation96_spill] sm:$0xff]  ;;  %v8623_v40 = vld [vmem:[#allocation90_spill] sm:$0xff] }
 0x29b   :  { %8604 = vst [vmem:[#allocation47_spill] sm:$0xff] %v7344_v52  ;;  %4275 = vmatprep.subr.mxu0 %v8605_v39  ;;  %4355 = vmatprep.subr.mxu1 %v8606_v34  ;;  %v2290_v24 = vadd.f32 1.0, %v2258_v16  ;;  %vm2197_vm0 = vcmp.lt.f32.partialorder %v7025_v45, 0.0  ;;  %v2260_v37 = vsel %vm2196_vm15, %v2228_v26, %v2164_v1  ;;  %v2591_v47 = vand.u32 4294901760, %v2590_v4  ;;  %v8613_v4 = vld [vmem:[#allocation82_spill] sm:$0xff]  ;;  %v8618_v16 = vld [vmem:[#allocation71_spill] sm:$0xff] }
 0x29c   :  { %v2229_v9 = vsub.f32 0.0, %v2165_v27  ;;  %2577 = vmatmul.mubr.f32.gmra.mxu0 %v2576_v35  ;;  %4356 = vmatpush3.msra.mxu1 %v8607_v62  ;;  %v2600_v58 = vand.u32 4294901760, %v2599_v13  ;;  %v8610_v10 = vand.u32 4294901760, %v6831_v41  ;;  %v8611_v3 = vand.u32 4294901760, %v6958_v19 }
 0x29d   :  { %2985 = vmatmul.mubr.f32.gmra.mxu1 %v8608_v6  ;;  %4276 = vmatpush3.msra.mxu0 %v8609_v49  ;;  %v7364_v26 = vand.u32 4294901760, %v2321_v30  ;;  %v1426_v35 = vmul.f32 0.5, %v8613_v4  ;;  %v2323_v13 = vmul.f32 %v2291_v36, %v1427_v32  ;;  %v2292_v6 = vadd.f32 1.0, %v2260_v37  ;;  %v8619_v4 = vld [vmem:[#allocation81_spill] sm:$0xff]  ;;  %v8620_v32 = vld [vmem:[#allocation46_spill] sm:$0xff]  ;;  %v8633_v37 = vld [vmem:[#allocation44_spill] sm:$0xff] }
 0x29e   :  { %v2261_v7 = vsel %vm2197_vm0, %v2229_v9, %v2165_v27  ;;  %2990 = vmatprep.mubr.f32.mxu1 %v6861_v11  ;;  %2586 = vmatprep.mubr.f32.mxu0 %v2585_v23  ;;  %v2605_v45 = vsub.f32 %v6831_v41, %v8610_v10  ;;  %v2614_v1 = vsub.f32 %v6958_v19, %v8611_v3  ;;  %v8614_v27 = vld [vmem:[#allocation75_spill] sm:$0xff]  ;;  %v8615_v9 = vld [vmem:[#allocation41_spill] sm:$0xff]  ;;  %v7373_v10 = vand.u32 4294901760, %v2320_v31 }
 0x29f   :  { %8612 = vst [vmem:[#allocation62_spill] sm:$0xff] %v7364_v26  ;;  %v2293_v8 = vadd.f32 1.0, %v2261_v7  ;;  %4277 = vmatprep.subr.mxu0 %v8614_v27  ;;  %4357 = vmatprep.subr.mxu1 %v8615_v9  ;;  %v7371_v23 = vsub.f32 %v7069_v22, %v7298_v57  ;;  %v1429_v3 = vmul.f32 0.5, %v7013_v2  ;;  %v2322_v11 = vmul.f32 %v2290_v24, %v1426_v35  ;;  %v8628_v22 = vld [vmem:[#allocation61_spill] sm:$0xff] }
 0x2a0   :  { %8617 = vst [vmem:[#allocation48_spill] sm:$0xff] %v7373_v10  ;;  %2592 = vmatmul.mubr.f32.gmra.mxu0 %v2591_v47  ;;  %4358 = vmatpush3.msra.mxu1 %v8618_v16  ;;  %v8621_v7 = vand.u32 4294901760, %v6903_v20  ;;  %v2606_v19 = vand.u32 4294901760, %v2605_v45  ;;  %v2615_v2 = vand.u32 4294901760, %v2614_v1  ;;  %v8624_v47 = vand.u32 4294901760, %v7295_v61 }
 0x2a1   :  { %8616 = vst [vmem:[#allocation55_spill] sm:$0xff] %v7371_v23  ;;  %2992 = vmatmul.mubr.f32.gmra.mxu1 %v8619_v4  ;;  %4278 = vmatpush3.msra.mxu0 %v8620_v32  ;;  %v7389_v35 = vsub.f32 %v2321_v30, %v7364_v26  ;;  %v7391_v4 = vand.u32 4294901760, %v2323_v13  ;;  %v8627_v32 = vld [vmem:[#allocation92_spill] sm:$0xff]  ;;  %v7398_v45 = vsub.f32 %v2320_v31, %v7373_v10  ;;  %v7400_v1 = vand.u32 4294901760, %v2322_v11 }
 0x2a2   :  { %v2620_v36 = vsub.f32 %v6903_v20, %v8621_v7  ;;  %2997 = vmatprep.mubr.f32.mxu1 %v8623_v40  ;;  %2601 = vmatprep.mubr.f32.mxu0 %v2600_v58  ;;  %v2629_v24 = vsub.f32 %v7295_v61, %v8624_v47  ;;  %v1428_v7 = vmul.f32 0.5, %v8627_v32  ;;  %v2325_v20 = vmul.f32 %v2293_v8, %v1429_v3  ;;  %v8629_v40 = vld [vmem:[#allocation16_spill] sm:$0xff]  ;;  %v8630_v58 = vld [vmem:[#allocation58_spill] sm:$0xff] }
 0x2a3   :  { %8625 = vst [vmem:[#allocation51_spill] sm:$0xff] %v7389_v35  ;;  %8626 = vst [vmem:[#allocation66_spill] sm:$0xff] %v7391_v4  ;;  %4279 = vmatprep.subr.mxu0 %v8628_v22  ;;  %4359 = vmatprep.subr.mxu1 %v8629_v40  ;;  %v8632_v30 = vld [vmem:[#allocation84_spill] sm:$0xff]  ;;  %v8634_v32 = vand.u32 4294901760, %v8622_v63  ;;  %v8635_v61 = vand.u32 4294901760, %v7344_v52 }
 0x2a4   :  { %2607 = vmatmul.mubr.f32.gmra.mxu0 %v2606_v19  ;;  %4360 = vmatpush3.msra.mxu1 %v8630_v58  ;;  %8631 = vst [vmem:[#allocation57_spill] sm:$0xff] %v7400_v1  ;;  %v2324_v47 = vmul.f32 %v2292_v6, %v1428_v7  ;;  %v2621_v19 = vand.u32 4294901760, %v2620_v36  ;;  %v2630_v3 = vand.u32 4294901760, %v2629_v24  ;;  %v7413_v6 = vsub.f32 %v2323_v13, %v7391_v4  ;;  %v8640_v36 = vld [vmem:[#allocation18_spill] sm:$0xff]  ;;  %v8643_v13 = vld [vmem:[#allocation63_spill] sm:$0xff] }
 0x2a5   :  { %2999 = vmatmul.mubr.f32.gmra.mxu1 %v8632_v30  ;;  %4280 = vmatpush3.msra.mxu0 %v8633_v37  ;;  %v2635_v8 = vsub.f32 %v8622_v63, %v8634_v32  ;;  %v2644_v31 = vsub.f32 %v7344_v52, %v8635_v61  ;;  %v7415_v7 = vand.u32 4294901760, %v2325_v20  ;;  %v8638_v30 = vld [vmem:[#allocation76_spill] sm:$0xff]  ;;  %v8642_v24 = vld [vmem:[#allocation94_spill] sm:$0xff]  ;;  %v8644_v52 = vand.u32 4294901760, %v7371_v23  ;;  %v8646_v63 = vld [vmem:[#allocation67_spill] sm:$0xff] }
 0x2a6   :  { %3004 = vmatprep.mubr.f32.mxu1 %v7053_v51  ;;  %2616 = vmatprep.mubr.f32.mxu0 %v2615_v2  ;;  %8636 = vst [vmem:[#allocation65_spill] sm:$0xff] %v7413_v6  ;;  %v8639_v37 = vld [vmem:[#allocation56_spill] sm:$0xff]  ;;  %v7422_v2 = vsub.f32 %v2322_v11, %v7400_v1  ;;  %v7424_v61 = vand.u32 4294901760, %v2324_v47  ;;  %v8298_v32 = vand.u32 4294901760, %v7398_v45 }
 0x2a7   :  { %8637 = vst [vmem:[#allocation23_spill] sm:$0xff] %v7415_v7  ;;  %4281 = vmatprep.subr.mxu0 %v8638_v30  ;;  %4361 = vmatprep.subr.mxu1 %v8639_v37  ;;  %v2636_v58 = vand.u32 4294901760, %v2635_v8  ;;  %v2645_v51 = vand.u32 4294901760, %v2644_v31  ;;  %v7434_v11 = vsub.f32 %v2325_v20, %v7415_v7 }
 0x2a8   :  { %2622 = vmatmul.mubr.f32.gmra.mxu0 %v2621_v19  ;;  %4362 = vmatpush3.msra.mxu1 %v8640_v36  ;;  %8641 = vst [vmem:[#allocation15_spill] sm:$0xff] %v7424_v61  ;;  %v2650_v19 = vsub.f32 %v7371_v23, %v8644_v52  ;;  %v8647_v36 = vld [vmem:[#allocation21_spill] sm:$0xff]  ;;  %v8650_v52 = vld [vmem:[#allocation22_spill] sm:$0xff]  ;;  %v7446_v20 = vsub.f32 %v2324_v47, %v7424_v61  ;;  %v8659_v23 = vld [vmem:[#allocation95_spill] sm:$0xff] }
 0x2a9   :  { %3006 = vmatmul.mubr.f32.gmra.mxu1 %v8642_v24  ;;  %4282 = vmatpush3.msra.mxu0 %v8643_v13  ;;  %8645 = vst [vmem:[#allocation17_spill] sm:$0xff] %v7434_v11  ;;  %v8648_v24 = vand.u32 4294901760, %v7389_v35 }
 0x2aa   :  { %3011 = vmatprep.mubr.f32.mxu1 %v7323_v0  ;;  %2631 = vmatprep.mubr.f32.mxu0 %v2630_v3  ;;  %v8649_v3 = vld [vmem:[#allocation80_spill] sm:$0xff]  ;;  %8651 = vst [vmem:[#allocation73_spill] sm:$0xff] %v7446_v20  ;;  %v2651_v31 = vand.u32 4294901760, %v2650_v19  ;;  %v8656_v19 = vld [vmem:[#allocation89_spill] sm:$0xff] }
 0x2ab   :  { %4283 = vmatprep.subr.mxu0 %v8646_v63  ;;  %4363 = vmatprep.subr.mxu1 %v8647_v36  ;;  %v2659_v0 = vsub.f32 %v7389_v35, %v8648_v24  ;;  %v2665_v24 = vsub.f32 %v7398_v45, %v8298_v32  ;;  %v8653_v35 = vld [vmem:[#allocation85_spill] sm:$0xff]  ;;  %v8657_v32 = vld [vmem:[#allocation68_spill] sm:$0xff] }
 0x2ac   :  { %2637 = vmatmul.mubr.f32.gmra.mxu0 %v2636_v58  ;;  %4364 = vmatpush3.msra.mxu1 %v8649_v3  ;;  %v8652_v58 = vld [vmem:[#allocation86_spill] sm:$0xff] }
 0x2ad   :  { %3013 = vmatmul.mubr.f32.gmra.mxu1 %v7298_v57  ;;  %4284 = vmatpush3.msra.mxu0 %v8650_v52  ;;  %v2660_v57 = vand.u32 4294901760, %v2659_v0  ;;  %v8654_v52 = vand.u32 4294901760, %v7413_v6  ;;  %v2666_v8 = vand.u32 4294901760, %v2665_v24  ;;  %v8658_v0 = vand.u32 4294901760, %v7422_v2  ;;  %v8662_v24 = vld [vmem:[#allocation24_spill] sm:$0xff] }
 0x2ae   :  { %3018 = vmatprep.mubr.f32.mxu1 %v7364_v26  ;;  %2646 = vmatprep.mubr.f32.mxu0 %v2645_v51  ;;  %v8655_v51 = vld [vmem:[#allocation88_spill] sm:$0xff] }
 0x2af   :  { %4285 = vmatprep.subr.mxu0 %v8652_v58  ;;  %4365 = vmatprep.subr.mxu1 %v8653_v35  ;;  %v2674_v47 = vsub.f32 %v7413_v6, %v8654_v52  ;;  %v2680_v26 = vsub.f32 %v7422_v2, %v8658_v0  ;;  %v8660_v6 = vand.u32 4294901760, %v7434_v11  ;;  %v8663_v0 = vld [vmem:[#allocation97_spill] sm:$0xff] }
 0x2b0   :  { %2652 = vmatmul.mubr.f32.gmra.mxu0 %v2651_v31  ;;  %4366 = vmatpush3.msra.mxu1 %v8655_v51 }
 0x2b1   :  { %3020 = vmatmul.mubr.f32.gmra.mxu1 %v7373_v10  ;;  %4286 = vmatpush3.msra.mxu0 %v8656_v19  ;;  %v2675_v31 = vand.u32 4294901760, %v2674_v47  ;;  %v2689_v10 = vsub.f32 %v7434_v11, %v8660_v6  ;;  %v8661_v19 = vld [vmem:[#allocation91_spill] sm:$0xff]  ;;  %v2681_v52 = vand.u32 4294901760, %v2680_v26  ;;  %v8670_v11 = vld [vmem:[#allocation101_spill] sm:$0xff] }
 0x2b2   :  { %3025 = vmatprep.mubr.f32.mxu1 %v7391_v4  ;;  %4367 = vmatprep.subr.mxu1 %v8657_v32  ;;  %v8665_v4 = vld [vmem:[#allocation99_spill] sm:$0xff] }
 0x2b3   :  { %2661 = vmatprep.mubr.f32.mxu0 %v2660_v57  ;;  %4368 = vmatpush3.msra.mxu1 %v8659_v23  ;;  %v8664_v57 = vand.u32 4294901760, %v7446_v20  ;;  %v2690_v6 = vand.u32 4294901760, %v2689_v10  ;;  %v8672_v10 = vld [vmem:[#allocation28_spill] sm:$0xff] }
 0x2b4   :  { %2667 = vmatmul.mubr.f32.gmra.mxu0 %v2666_v8  ;;  %4287 = vmatprep.subr.mxu0 %v8661_v19  ;;  %v8666_v8 = vld [vmem:[#allocation100_spill] sm:$0xff] }
 0x2b5   :  { %3027 = vmatmul.mubr.f32.gmra.mxu1 %v7400_v1  ;;  %4369 = vmatprep.subr.mxu1 %v8662_v24  ;;  %v2695_v47 = vsub.f32 %v7446_v20, %v8664_v57  ;;  %v8667_v1 = vld [vmem:[#allocation98_spill] sm:$0xff]  ;;  %v8671_v57 = vld [vmem:[#allocation104_spill] sm:$0xff] }
 0x2b6   :  { %3032 = vmatprep.mubr.f32.mxu1 %v7415_v7  ;;  %4288 = vmatpush3.msra.mxu0 %v8663_v0  ;;  %v8668_v7 = vand.u32 4294901760, %v7101_v60  ;;  %v8669_v0 = vld [vmem:[#allocation102_spill] sm:$0xff] }
 0x2b7   :  { %4370 = vmatpush3.msra.mxu1 %v8665_v4  ;;  %2676 = vmatprep.mubr.f32.mxu0 %v2675_v31  ;;  %v2696_v26 = vand.u32 4294901760, %v2695_v47  ;;  %v8673_v31 = vand.u32 4294901760, %v8672_v10  ;;  %v8679_v47 = vld [vmem:[#allocation8_spill] sm:$0xff] }
 0x2b8   :  { %4371 = vmatprep.subr.mxu1 %v8666_v8  ;;  %2682 = vmatmul.mubr.f32.gmra.mxu0 %v2681_v52  ;;  %v8674_v52 = vld [vmem:[#allocation105_spill] sm:$0xff] }
 0x2b9   :  { %3034 = vmatmul.mubr.f32.gmra.mxu1 %v7424_v61  ;;  %4289 = vmatprep.subr.mxu0 %v8667_v1  ;;  %v8675_v61 = vld [vmem:[#allocation106_spill] sm:$0xff] }
 0x2ba   :  { %3411 = vmatprep.mubr.f32.mxu1 %v8668_v7  ;;  %4372 = vmatpush3.msra.mxu1 %v8669_v0  ;;  %v8676_v20 = vand.u32 4294901760, %v8675_v61  ;;  %v8677_v7 = vld [vmem:[#allocation10_spill] sm:$0xff] }
 0x2bb   :  { %4290 = vmatpush3.msra.mxu0 %v8670_v11  ;;  %2691 = vmatprep.mubr.f32.mxu0 %v2690_v6  ;;  %v8678_v1 = vand.u32 4294901760, %v8677_v7  ;;  %v8680_v6 = vld [vmem:[#allocation9_spill] sm:$0xff] }
 0x2bc   :  { %2697 = vmatmul.mubr.f32.gmra.mxu0 %v2696_v26  ;;  %4291 = vmatprep.subr.mxu0 %v8671_v57  ;;  %v8681_v26 = vld [vmem:[#allocation37_spill] sm:$0xff] }
 0x2bd   :  { %3415 = vmatmul.mubr.f32.vlgmr.msra.gmra.mxu1 %v8673_v31  ;;  %4292 = vmatpush3.msra.mxu0 %v8674_v52  ;;  %v8682_v57 = vand.u32 4294901760, %v8681_v26  ;;  %v8683_v31 = vand.u32 4294901760, %v7135_v43 }
 0x2be   :  { %3422 = vmatprep.mubr.f32.mxu1 %v8676_v20  ;;  %3169 = vmatprep.mubr.f32.mxu0 %v7101_v60  ;;  %v8684_v20 = vld [vmem:[#allocation11_spill] sm:$0xff]  ;;  %v8686_v60 = vand.u32 4294901760, %v8554_v17 }
 0x2bf   :  { %4421 = vmatprep.subr.mxu0 %v8678_v1  ;;  %4501 = vmatprep.subr.mxu1 %v8679_v47  ;;  %v8685_v52 = vand.u32 4294901760, %v8684_v20  ;;  %v8687_v1 = vld [vmem:[#allocation12_spill] sm:$0xff] }
 0x2c0   :  { %3172 = vmatmul.mubr.f32.vlgmr.msra.gmra.mxu0 %v8672_v10  ;;  %4502 = vmatpush3.msra.mxu1 %v8680_v6  ;;  %v8688_v10 = vand.u32 4294901760, %v8546_v33  ;;  %v8694_v47 = vld [vmem:[#allocation20_spill] sm:$0xff] }
 0x2c1   :  { %3426 = vmatmul.mubr.f32.gmra.mxu1 %v8682_v57  ;;  %3178 = vmatprep.mubr.f32.mxu0 %v8675_v61  ;;  %v8689_v61 = vand.u32 4294901760, %v7171_v54  ;;  %v8690_v57 = vld [vmem:[#allocation19_spill] sm:$0xff] }
 0x2c2   :  { %3433 = vmatprep.mubr.f32.mxu1 %v8683_v31  ;;  %4422 = vmatpush3.msra.mxu0 %v8685_v52  ;;  %v8691_v7 = vand.u32 4294901760, %v8690_v57  ;;  %v8692_v52 = vld [vmem:[#allocation29_spill] sm:$0xff]  ;;  %v8699_v31 = vand.u32 4294901760, %v8568_v12 }
 0x2c3   :  { %4423 = vmatprep.subr.mxu0 %v8686_v60  ;;  %4503 = vmatprep.subr.mxu1 %v8687_v1  ;;  %v8693_v17 = vand.u32 4294901760, %v8692_v52  ;;  %v8705_v1 = vld [vmem:[#allocation38_spill] sm:$0xff]  ;;  %v8714_v52 = vand.u32 4294901760, %v8583_v48 }
 0x2c4   :  { %3181 = vmatmul.mubr.f32.gmra.mxu0 %v8681_v26  ;;  %4504 = vmatpush3.msra.mxu1 %v8555_v56  ;;  %v8695_v56 = vld [vmem:[#allocation60_spill] sm:$0xff]  ;;  %v8698_v26 = vand.u32 4294901760, %v8564_v55  ;;  %v8706_v55 = vand.u32 4294901760, %v8705_v1  ;;  %v8750_v1 = vand.u32 4294901760, %v8643_v13 }
 0x2c5   :  { %3437 = vmatmul.mubr.f32.gmra.mxu1 %v8688_v10  ;;  %3187 = vmatprep.mubr.f32.mxu0 %v7135_v43  ;;  %v8696_v6 = vand.u32 4294901760, %v8695_v56  ;;  %v8697_v43 = vand.u32 4294901760, %v7200_v38  ;;  %v8707_v10 = vld [vmem:[#allocation45_spill] sm:$0xff] }
 0x2c6   :  { %3444 = vmatprep.mubr.f32.mxu1 %v8689_v61  ;;  %4424 = vmatpush3.msra.mxu0 %v8691_v7  ;;  %v8708_v12 = vand.u32 4294901760, %v8707_v10  ;;  %v8709_v61 = vld [vmem:[#allocation40_spill] sm:$0xff]  ;;  %v8754_v10 = vld [vmem:[#allocation51_spill] sm:$0xff] }
 0x2c7   :  { %4425 = vmatprep.subr.mxu0 %v8693_v17  ;;  %4505 = vmatprep.subr.mxu1 %v8694_v47  ;;  %v8715_v17 = vand.u32 4294901760, %v8589_v18  ;;  %v8717_v47 = vld [vmem:[#allocation36_spill] sm:$0xff]  ;;  %v8721_v18 = vand.u32 4294901760, %v8597_v25  ;;  %v8726_v25 = vand.u32 4294901760, %v8605_v39  ;;  %v8732_v39 = vld [vmem:[#allocation93_spill] sm:$0xff] }
 0x2c8   :  { %3190 = vmatmul.mubr.f32.gmra.mxu0 %v8546_v33  ;;  %4506 = vmatpush3.msra.mxu1 %v8562_v59  ;;  %v8700_v33 = vld [vmem:[#allocation34_spill] sm:$0xff]  ;;  %v8701_v59 = vld [vmem:[#allocation35_spill] sm:$0xff] }
 0x2c9   :  { %3448 = vmatmul.mubr.f32.gmra.mxu1 %v8696_v6  ;;  %3196 = vmatprep.mubr.f32.mxu0 %v7171_v54  ;;  %v8702_v20 = vand.u32 4294901760, %v8701_v59  ;;  %v8703_v54 = vld [vmem:[#allocation13_spill] sm:$0xff]  ;;  %v8719_v6 = vld [vmem:[#allocation54_spill] sm:$0xff] }
 0x2ca   :  { %3455 = vmatprep.mubr.f32.mxu1 %v8697_v43  ;;  %4426 = vmatpush3.msra.mxu0 %v8698_v26  ;;  %v8704_v60 = vand.u32 4294901760, %v8703_v54  ;;  %v8720_v48 = vand.u32 4294901760, %v8719_v6  ;;  %v8725_v26 = vand.u32 4294901760, %v8601_v21  ;;  %v8730_v21 = vand.u32 4294901760, %v8614_v27  ;;  %v8781_v6 = vld [vmem:[#allocation39_spill] sm:$0xff] }
 0x2cb   :  { %4427 = vmatprep.subr.mxu0 %v8699_v31  ;;  %4507 = vmatprep.subr.mxu1 %v8569_v28  ;;  %v8710_v28 = vld [vmem:[#allocation72_spill] sm:$0xff]  ;;  %v8736_v27 = vand.u32 4294901760, %v8628_v22  ;;  %v8744_v22 = vand.u32 4294901760, %v8638_v30  ;;  %v8751_v30 = vand.u32 4294901760, %v8646_v63  ;;  %v8758_v63 = vand.u32 4294901760, %v8652_v58 }
 0x2cc   :  { %3199 = vmatmul.mubr.f32.gmra.mxu0 %v8695_v56  ;;  %4508 = vmatpush3.msra.mxu1 %v8700_v33  ;;  %v8711_v57 = vand.u32 4294901760, %v8710_v28  ;;  %v8718_v56 = vand.u32 4294901760, %v8717_v47  ;;  %v8742_v33 = vld [vmem:[#allocation44_spill] sm:$0xff]  ;;  %v8764_v58 = vand.u32 4294901760, %v8661_v19 }
 0x2cd   :  { %3459 = vmatmul.mubr.f32.gmra.mxu1 %v8702_v20  ;;  %3205 = vmatprep.mubr.f32.mxu0 %v7200_v38  ;;  %v8712_v38 = vld [vmem:[#allocation30_spill] sm:$0xff] }
 0x2ce   :  { %3466 = vmatprep.mubr.f32.mxu1 %v8704_v60  ;;  %4428 = vmatpush3.msra.mxu0 %v8706_v55  ;;  %v8713_v7 = vand.u32 4294901760, %v8712_v38 }
 0x2cf   :  { %4429 = vmatprep.subr.mxu0 %v8708_v12  ;;  %4509 = vmatprep.subr.mxu1 %v8709_v61  ;;  %v8755_v12 = vand.u32 4294901760, %v8754_v10  ;;  %v8756_v61 = vld [vmem:[#allocation22_spill] sm:$0xff] }
 0x2d0   :  { %3208 = vmatmul.mubr.f32.gmra.mxu0 %v8701_v59  ;;  %4510 = vmatpush3.msra.mxu1 %v8581_v29  ;;  %v8716_v29 = vand.u32 4294901760, %v8575_v5  ;;  %v8743_v59 = vand.u32 4294901760, %v8742_v33  ;;  %v8757_v13 = vand.u32 4294901760, %v8756_v61  ;;  %v8806_v33 = vld [vmem:[#allocation48_spill] sm:$0xff] }
 0x2d1   :  { %3470 = vmatmul.mubr.f32.gmra.mxu1 %v8711_v57  ;;  %3214 = vmatprep.mubr.f32.mxu0 %v8703_v54  ;;  %v8748_v54 = vld [vmem:[#allocation47_spill] sm:$0xff]  ;;  %v8762_v57 = vld [vmem:[#allocation89_spill] sm:$0xff] }
 0x2d2   :  { %3477 = vmatprep.mubr.f32.mxu1 %v8713_v7  ;;  %4430 = vmatpush3.msra.mxu0 %v8714_v52  ;;  %v8749_v60 = vand.u32 4294901760, %v8748_v54  ;;  %v8768_v52 = vld [vmem:[#allocation97_spill] sm:$0xff] }
 0x2d3   :  { %4431 = vmatprep.subr.mxu0 %v8715_v17  ;;  %4511 = vmatprep.subr.mxu1 %v8590_v53  ;;  %v8723_v53 = vld [vmem:[#allocation79_spill] sm:$0xff]  ;;  %v8769_v17 = vand.u32 4294901760, %v8768_v52 }
 0x2d4   :  { %3217 = vmatmul.mubr.f32.gmra.mxu0 %v8710_v28  ;;  %4512 = vmatpush3.msra.mxu1 %v8591_v15  ;;  %v8722_v15 = vand.u32 4294901760, %v8585_v42  ;;  %v8724_v43 = vand.u32 4294901760, %v8723_v53 }
 0x2d5   :  { %3481 = vmatmul.mubr.f32.gmra.mxu1 %v8716_v29  ;;  %3223 = vmatprep.mubr.f32.mxu0 %v8712_v38  ;;  %v8763_v38 = vand.u32 4294901760, %v8762_v57  ;;  %v8775_v29 = vand.u32 4294901760, %v8670_v11  ;;  %v8783_v11 = vld [vmem:[#allocation53_spill] sm:$0xff] }
 0x2d6   :  { %3488 = vmatprep.mubr.f32.mxu1 %v8718_v56  ;;  %4432 = vmatpush3.msra.mxu0 %v8720_v48  ;;  %v8784_v48 = vld [vmem:[#allocation42_spill] sm:$0xff] }
 0x2d7   :  { %4433 = vmatprep.subr.mxu0 %v8721_v18  ;;  %4513 = vmatprep.subr.mxu1 %v8598_v46  ;;  %v8728_v46 = vand.u32 4294901760, %v6885_v44  ;;  %v8785_v18 = vld [vmem:[#allocation107_spill] sm:$0xff] }
 0x2d8   :  { %3226 = vmatmul.mubr.f32.gmra.mxu0 %v8575_v5  ;;  %4514 = vmatpush3.msra.mxu1 %v8599_v14  ;;  %v8727_v5 = vand.u32 4294901760, %v6744_v50  ;;  %v8729_v14 = vand.u32 4294901760, %v8609_v49 }
 0x2d9   :  { %3492 = vmatmul.mubr.f32.gmra.mxu1 %v8722_v15  ;;  %3232 = vmatprep.mubr.f32.mxu0 %v8717_v47  ;;  %v8779_v47 = vld [vmem:[#allocation105_spill] sm:$0xff]  ;;  %v8786_v15 = vld [vmem:[#allocation59_spill] sm:$0xff] }
 0x2da   :  { %3499 = vmatprep.mubr.f32.mxu1 %v8724_v43  ;;  %4434 = vmatpush3.msra.mxu0 %v8725_v26  ;;  %v8780_v56 = vand.u32 4294901760, %v8779_v47  ;;  %v8788_v43 = vld [vmem:[#allocation64_spill] sm:$0xff]  ;;  %v8789_v26 = vld [vmem:[#allocation26_spill] sm:$0xff] }
 0x2db   :  { %4435 = vmatprep.subr.mxu0 %v8726_v25  ;;  %4515 = vmatprep.subr.mxu1 %v8606_v34  ;;  %v8733_v34 = vand.u32 4294901760, %v8732_v39  ;;  %v8790_v25 = vld [vmem:[#allocation69_spill] sm:$0xff] }
 0x2dc   :  { %3235 = vmatmul.mubr.f32.gmra.mxu0 %v8585_v42  ;;  %4516 = vmatpush3.msra.mxu1 %v8607_v62  ;;  %v8731_v42 = vand.u32 4294901760, %v6831_v41  ;;  %v8734_v62 = vld [vmem:[#allocation46_spill] sm:$0xff] }
 0x2dd   :  { %3503 = vmatmul.mubr.f32.gmra.mxu1 %v8727_v5  ;;  %3241 = vmatprep.mubr.f32.mxu0 %v8723_v53  ;;  %v8735_v49 = vand.u32 4294901760, %v8734_v62  ;;  %v8787_v53 = vld [vmem:[#allocation49_spill] sm:$0xff]  ;;  %v8791_v5 = vld [vmem:[#allocation14_spill] sm:$0xff] }
 0x2de   :  { %3510 = vmatprep.mubr.f32.mxu1 %v8728_v46  ;;  %4436 = vmatpush3.msra.mxu0 %v8729_v14  ;;  %v8792_v46 = vld [vmem:[#allocation74_spill] sm:$0xff]  ;;  %v8793_v14 = vld [vmem:[#allocation27_spill] sm:$0xff]  ;;  %v8798_v62 = vld [vmem:[#allocation81_spill] sm:$0xff] }
 0x2df   :  { %4437 = vmatprep.subr.mxu0 %v8730_v21  ;;  %4517 = vmatprep.subr.mxu1 %v8615_v9  ;;  %v8794_v21 = vld [vmem:[#allocation52_spill] sm:$0xff] }
 0x2e0   :  { %3244 = vmatmul.mubr.f32.gmra.mxu0 %v6744_v50  ;;  %4518 = vmatpush3.msra.mxu1 %v8618_v16  ;;  %v8737_v50 = vld [vmem:[#allocation58_spill] sm:$0xff]  ;;  %v8738_v16 = vld [vmem:[#allocation87_spill] sm:$0xff] }
 0x2e1   :  { %3514 = vmatmul.mubr.f32.gmra.mxu1 %v8731_v42  ;;  %3250 = vmatprep.mubr.f32.mxu0 %v6885_v44  ;;  %v8739_v9 = vand.u32 4294901760, %v8738_v16  ;;  %v8740_v44 = vld [vmem:[#allocation32_spill] sm:$0xff]  ;;  %v8795_v42 = vld [vmem:[#allocation78_spill] sm:$0xff] }
 0x2e2   :  { %3521 = vmatprep.mubr.f32.mxu1 %v8733_v34  ;;  %4438 = vmatpush3.msra.mxu0 %v8735_v49  ;;  %v8741_v31 = vand.u32 4294901760, %v8740_v44  ;;  %v8797_v34 = vld [vmem:[#allocation83_spill] sm:$0xff]  ;;  %v8799_v49 = vld [vmem:[#allocation90_spill] sm:$0xff] }
 0x2e3   :  { %4439 = vmatprep.subr.mxu0 %v8736_v27  ;;  %4519 = vmatprep.subr.mxu1 %v8629_v40  ;;  %v8746_v40 = vld [vmem:[#allocation96_spill] sm:$0xff] }
 0x2e4   :  { %3253 = vmatmul.mubr.f32.gmra.mxu0 %v6831_v41  ;;  %4520 = vmatpush3.msra.mxu1 %v8737_v50  ;;  %v8745_v41 = vld [vmem:[#allocation18_spill] sm:$0xff]  ;;  %v8747_v20 = vand.u32 4294901760, %v8746_v40  ;;  %v8800_v27 = vld [vmem:[#allocation84_spill] sm:$0xff]  ;;  %v8801_v50 = vld [vmem:[#allocation103_spill] sm:$0xff] }
 0x2e5   :  { %3525 = vmatmul.mubr.f32.gmra.mxu1 %v8739_v9  ;;  %3259 = vmatprep.mubr.f32.mxu0 %v8732_v39  ;;  %v8796_v39 = vld [vmem:[#allocation77_spill] sm:$0xff]  ;;  %v8803_v9 = vld [vmem:[#allocation43_spill] sm:$0xff] }
 0x2e6   :  { %3532 = vmatprep.mubr.f32.mxu1 %v8741_v31  ;;  %4440 = vmatpush3.msra.mxu0 %v8743_v59  ;;  %v8805_v31 = vld [vmem:[#allocation62_spill] sm:$0xff] }
 0x2e7   :  { %4441 = vmatprep.subr.mxu0 %v8744_v22  ;;  %4521 = vmatprep.subr.mxu1 %v8639_v37  ;;  %v8752_v37 = vld [vmem:[#allocation55_spill] sm:$0xff]  ;;  %v8807_v59 = vld [vmem:[#allocation66_spill] sm:$0xff]  ;;  %v8808_v22 = vld [vmem:[#allocation57_spill] sm:$0xff] }
 0x2e8   :  { %3262 = vmatmul.mubr.f32.gmra.mxu0 %v8738_v16  ;;  %4522 = vmatpush3.msra.mxu1 %v8745_v41  ;;  %v8753_v55 = vand.u32 4294901760, %v8752_v37  ;;  %v8802_v16 = vld [vmem:[#allocation94_spill] sm:$0xff]  ;;  %v8809_v41 = vld [vmem:[#allocation23_spill] sm:$0xff] }
 0x2e9   :  { %3536 = vmatmul.mubr.f32.gmra.mxu1 %v8747_v20  ;;  %3268 = vmatprep.mubr.f32.mxu0 %v8740_v44  ;;  %v8804_v44 = vld [vmem:[#allocation50_spill] sm:$0xff] }
 0x2ea   :  { %3543 = vmatprep.mubr.f32.mxu1 %v8749_v60  ;;  %4442 = vmatpush3.msra.mxu0 %v8750_v1 }
 0x2eb   :  { %4443 = vmatprep.subr.mxu0 %v8751_v30  ;;  %4523 = vmatprep.subr.mxu1 %v8647_v36  ;;  %v8759_v36 = vand.u32 4294901760, %v7398_v45 }
 0x2ec   :  { %3271 = vmatmul.mubr.f32.gmra.mxu0 %v8746_v40  ;;  %4524 = vmatpush3.msra.mxu1 %v8649_v3  ;;  %v8760_v3 = vld [vmem:[#allocation65_spill] sm:$0xff]  ;;  %v8810_v40 = vld [vmem:[#allocation15_spill] sm:$0xff] }
 0x2ed   :  { %3547 = vmatmul.mubr.f32.gmra.mxu1 %v8753_v55  ;;  %3277 = vmatprep.mubr.f32.mxu0 %v8748_v54  ;;  %v8761_v28 = vand.u32 4294901760, %v8760_v3 }
 0x2ee   :  { %3554 = vmatprep.mubr.f32.mxu1 %v8755_v12  ;;  %4444 = vmatpush3.msra.mxu0 %v8757_v13 }
 0x2ef   :  { %4445 = vmatprep.subr.mxu0 %v8758_v63  ;;  %4525 = vmatprep.subr.mxu1 %v8653_v35  ;;  %v8765_v35 = vand.u32 4294901760, %v7422_v2 }
 0x2f0   :  { %3280 = vmatmul.mubr.f32.gmra.mxu0 %v8752_v37  ;;  %4526 = vmatpush3.msra.mxu1 %v8655_v51  ;;  %v8766_v51 = vld [vmem:[#allocation17_spill] sm:$0xff]  ;;  %v7747_v37 = vld [vmem:[%s8000_s4] ss:$0 sm:$0xff]  ;;  %s4762_s4 = smov [#allocation5]  }
 0x2f1   :  { %3558 = vmatmul.mubr.f32.gmra.mxu1 %v8759_v36  ;;  %3286 = vmatprep.mubr.f32.mxu0 %v8754_v10  ;;  %v8767_v7 = vand.u32 4294901760, %v8766_v51  ;;  %s4088_s25 = sshll.u32 %s4762_s4, 4  ;;  %s4089_s25 = int_to_ptr.vmem [resolvable:$true] %s4088_s25 }
 0x2f2   :  { %3565 = vmatprep.mubr.f32.mxu1 %v8761_v28  ;;  %4446 = vmatpush3.msra.mxu0 %v8763_v38  ;;  %s4734_s26 = scalar_lea.vmem %s4089_s25, 2048  ;;  %p4739_p6 = scmp.lt.s32.totalorder %s4089_s25, %s4089_s25 }
 0x2f3   :  { %4527 = vmatprep.subr.mxu1 %v8657_v32  ;;  %4447 = vmatprep.subr.mxu0 %v8764_v58  ;;  %v8772_v32 = vld [vmem:[#allocation98_spill] sm:$0xff]  ;;  %p4735_p5 = scmp.ne.s32.totalorder %s4089_s25, %s4734_s26  ;;  %p4740_p7 = scmp.lt.s32.totalorder %s4734_s26, %s4734_s26 }
 0x2f4   :  { %4528 = vmatpush3.msra.mxu1 %v8659_v23  ;;  %3289 = vmatmul.mubr.f32.gmra.mxu0 %v7398_v45  ;;  %v8770_v23 = vld [vmem:[#allocation73_spill] sm:$0xff]  ;;  %v8773_v19 = vand.u32 4294901760, %v8772_v32 }
 0x2f5   :  { %3569 = vmatmul.mubr.f32.gmra.mxu1 %v8765_v35  ;;  %4529 = vmatprep.subr.mxu1 %v8662_v24  ;;  %v8771_v45 = vand.u32 4294901760, %v8770_v23  ;;  %v8774_v24 = vld [vmem:[#allocation33_spill] sm:$0xff]  ;;  %p4741_p8 = por %p4740_p7, %p4739_p6 }
 0x2f6   :  { %3576 = vmatprep.mubr.f32.mxu1 %v8767_v7  ;;  %3295 = vmatprep.mubr.f32.mxu0 %v8760_v3 }
 0x2f7   :  { %4448 = vmatpush3.msra.mxu0 %v8769_v17  ;;  %4530 = vmatpush3.msra.mxu1 %v8665_v4  ;;  %v8776_v4 = vld [vmem:[#allocation104_spill] sm:$0xff]  ;;  %p4742_p9 = pnand %p4741_p8, %p4735_p5 }
 0x2f8   :  { %4531 = vmatprep.subr.mxu1 %v8666_v8  ;;  %3298 = vmatmul.mubr.f32.gmra.mxu0 %v7422_v2  ;;  %v8777_v8 = vand.u32 4294901760, %v8776_v4  ;;  %v8778_v2 = vld [vmem:[#allocation25_spill] sm:$0xff] }
 0x2f9   :  { %3580 = vmatmul.mubr.f32.gmra.mxu1 %v8771_v45  ;;  %4449 = vmatprep.subr.mxu0 %v8773_v19 }
 0x2fa   :  { %3955 = vmatprep.mubr.f32.mxu1 %v8774_v24  ;;  %4532 = vmatpush3.msra.mxu1 %v8669_v0  ;;  %v8782_v0 = vld [vmem:[#allocation31_spill] sm:$0xff] }
 0x2fb   :  { %3304 = vmatprep.mubr.f32.mxu0 %v8766_v51  ;;  %4450 = vmatpush3.msra.mxu0 %v8775_v29 }
 0x2fc   :  { %3307 = vmatmul.mubr.f32.gmra.mxu0 %v8770_v23  ;;  %4451 = vmatprep.subr.mxu0 %v8777_v8 }
 0x2fd   :  { %3957 = vmatmul.mubr.f32.vlgmr.msra.gmra.mxu1 %v8778_v2  ;;  %4452 = vmatpush3.msra.mxu0 %v8780_v56 }
 0x2fe   :  { %3962 = vmatprep.mubr.f32.mxu1 %v8781_v6  ;;  %3746 = vmatprep.mubr.f32.mxu0 %v8774_v24 }
 0x300   :  { %3748 = vmatmul.mubr.f32.vlgmr.msra.gmra.mxu0 %v8778_v2 }
 0x301   :  { %3964 = vmatmul.mubr.f32.gmra.mxu1 %v8782_v0  ;;  %3753 = vmatprep.mubr.f32.mxu0 %v8781_v6 }
 0x302   :  { %3969 = vmatprep.mubr.f32.mxu1 %v8783_v11 }
 0x304   :  { %3755 = vmatmul.mubr.f32.gmra.mxu0 %v8782_v0 }
 0x305   :  { %3971 = vmatmul.mubr.f32.gmra.mxu1 %v8784_v48  ;;  %3760 = vmatprep.mubr.f32.mxu0 %v8783_v11 }
 0x306   :  { %3976 = vmatprep.mubr.f32.mxu1 %v8785_v18 }
 0x308   :  { %3762 = vmatmul.mubr.f32.gmra.mxu0 %v8784_v48 }
 0x309   :  { %3978 = vmatmul.mubr.f32.gmra.mxu1 %v8786_v15  ;;  %3767 = vmatprep.mubr.f32.mxu0 %v8785_v18 }
 0x30a   :  { %3983 = vmatprep.mubr.f32.mxu1 %v8787_v53 }
 0x30c   :  { %3769 = vmatmul.mubr.f32.gmra.mxu0 %v8786_v15 }
 0x30d   :  { %3985 = vmatmul.mubr.f32.gmra.mxu1 %v8788_v43  ;;  %3774 = vmatprep.mubr.f32.mxu0 %v8787_v53 }
 0x30e   :  { %3990 = vmatprep.mubr.f32.mxu1 %v8789_v26 }
 0x310   :  { %3776 = vmatmul.mubr.f32.gmra.mxu0 %v8788_v43 }
 0x311   :  { %3992 = vmatmul.mubr.f32.gmra.mxu1 %v8790_v25  ;;  %3781 = vmatprep.mubr.f32.mxu0 %v8789_v26 }
 0x312   :  { %3997 = vmatprep.mubr.f32.mxu1 %v8791_v5 }
 0x314   :  { %3783 = vmatmul.mubr.f32.gmra.mxu0 %v8790_v25 }
 0x315   :  { %3999 = vmatmul.mubr.f32.gmra.mxu1 %v8792_v46  ;;  %3788 = vmatprep.mubr.f32.mxu0 %v8791_v5 }
 0x316   :  { %4004 = vmatprep.mubr.f32.mxu1 %v8793_v14 }
 0x318   :  { %3790 = vmatmul.mubr.f32.gmra.mxu0 %v8792_v46 }
 0x319   :  { %4006 = vmatmul.mubr.f32.gmra.mxu1 %v8794_v21  ;;  %3795 = vmatprep.mubr.f32.mxu0 %v8793_v14 }
 0x31a   :  { %4011 = vmatprep.mubr.f32.mxu1 %v8795_v42 }
 0x31c   :  { %3797 = vmatmul.mubr.f32.gmra.mxu0 %v8794_v21 }
 0x31d   :  { %4013 = vmatmul.mubr.f32.gmra.mxu1 %v8796_v39  ;;  %3802 = vmatprep.mubr.f32.mxu0 %v8795_v42 }
 0x31e   :  { %4018 = vmatprep.mubr.f32.mxu1 %v8797_v34 }
 0x320   :  { %3804 = vmatmul.mubr.f32.gmra.mxu0 %v8796_v39 }
 0x321   :  { %4020 = vmatmul.mubr.f32.gmra.mxu1 %v8798_v62  ;;  %3809 = vmatprep.mubr.f32.mxu0 %v8797_v34 }
 0x322   :  { %4025 = vmatprep.mubr.f32.mxu1 %v8799_v49 }
 0x324   :  { %3811 = vmatmul.mubr.f32.gmra.mxu0 %v8798_v62 }
 0x325   :  { %4027 = vmatmul.mubr.f32.gmra.mxu1 %v8800_v27  ;;  %3816 = vmatprep.mubr.f32.mxu0 %v8799_v49 }
 0x326   :  { %4032 = vmatprep.mubr.f32.mxu1 %v8801_v50 }
 0x328   :  { %3818 = vmatmul.mubr.f32.gmra.mxu0 %v8800_v27 }
 0x329   :  { %4034 = vmatmul.mubr.f32.gmra.mxu1 %v8802_v16  ;;  %3823 = vmatprep.mubr.f32.mxu0 %v8801_v50 }
 0x32a   :  { %4039 = vmatprep.mubr.f32.mxu1 %v8803_v9 }
 0x32c   :  { %3825 = vmatmul.mubr.f32.gmra.mxu0 %v8802_v16 }
 0x32d   :  { %4041 = vmatmul.mubr.f32.gmra.mxu1 %v8804_v44  ;;  %3830 = vmatprep.mubr.f32.mxu0 %v8803_v9 }
 0x32e   :  { %4046 = vmatprep.mubr.f32.mxu1 %v8805_v31 }
 0x330   :  { %3832 = vmatmul.mubr.f32.gmra.mxu0 %v8804_v44 }
 0x331   :  { %4048 = vmatmul.mubr.f32.gmra.mxu1 %v8806_v33  ;;  %3837 = vmatprep.mubr.f32.mxu0 %v8805_v31 }
 0x332   :  { %4053 = vmatprep.mubr.f32.mxu1 %v8807_v59 }
 0x334   :  { %3839 = vmatmul.mubr.f32.gmra.mxu0 %v8806_v33 }
 0x335   :  { %4055 = vmatmul.mubr.f32.gmra.mxu1 %v8808_v22  ;;  %3844 = vmatprep.mubr.f32.mxu0 %v8807_v59 }
 0x336   :  { %4060 = vmatprep.mubr.f32.mxu1 %v8809_v41 }
 0x338   :  { %3846 = vmatmul.mubr.f32.gmra.mxu0 %v8808_v22 }
 0x339   :  { %4062 = vmatmul.mubr.f32.gmra.mxu1 %v8810_v40  ;;  %3851 = vmatprep.mubr.f32.mxu0 %v8809_v41 }
 0x33b   :  { %v4213_v20 = vpop.f32.mrf.mxu1 }
 0x33c   :  { %3853 = vmatmul.mubr.f32.gmra.mxu0 %v8810_v40 }
 0x33d   :  { %v4214_v54 = vpop.f32.mrf.mxu1 }
 0x33e   :  { %v4215_v60 = vadd.f32 %v4214_v54, %v4213_v20 }
 0x33f   :  { %v4216_v30 = vpop.f32.mrf.mxu1 }
 0x340   :  { %v4133_v1 = vpop.f32.mrf.mxu0 }
 0x341   :  { %v4217_v10 = vpop.f32.mrf.mxu1 }
 0x342   :  { %v4134_v55 = vpop.f32.mrf.mxu0  ;;  %v4218_v61 = vadd.f32 %v4217_v10, %v4216_v30 }
 0x343   :  { %v4135_v12 = vadd.f32 %v4134_v55, %v4133_v1  ;;  %v4219_v63 = vpop.f32.mrf.mxu1 }
 0x344   :  { %v4136_v13 = vpop.f32.mrf.mxu0 }
 0x345   :  { %v2474_v36 = vadd.f32 %v4135_v12, %v7747_v37  ;;  %v4220_v28 = vpop.f32.mrf.mxu1 }
 0x346   :  { %v4137_v3 = vpop.f32.mrf.mxu0  ;;  %v4221_v58 = vadd.f32 %v4220_v28, %v4219_v63 }
 0x347   :  { %v4138_v57 = vadd.f32 %v4137_v3, %v4136_v13  ;;  %v7750_v38 = vadd.f32 %v4215_v60, %v2474_v36 }
 0x348   :  { %v4139_v35 = vpop.f32.mrf.mxu0  ;;  %v4222_v51 = vpop.f32.mrf.mxu1 }
 0x349   :  { %v2489_v7 = vadd.f32 %v4138_v57, %v7747_v37 }
 0x34a   :  { %v4140_v52 = vpop.f32.mrf.mxu0  ;;  %v4223_v17 = vpop.f32.mrf.mxu1 }
 0x34b   :  { %v4141_v23 = vadd.f32 %v4140_v52, %v4139_v35  ;;  %v7753_v45 = vadd.f32 %v4218_v61, %v2489_v7  ;;  %v4224_v32 = vadd.f32 %v4223_v17, %v4222_v51 }
 0x34c   :  { %v4142_v19 = vpop.f32.mrf.mxu0  ;;  %v4225_v24 = vpop.f32.mrf.mxu1 }
 0x34d   :  { %v2504_v29 = vadd.f32 %v4141_v23, %v7747_v37 }
 0x34e   :  { %v4143_v4 = vpop.f32.mrf.mxu0  ;;  %v4226_v8 = vpop.f32.mrf.mxu1 }
 0x34f   :  { %v4144_v2 = vadd.f32 %v4143_v4, %v4142_v19  ;;  %v7756_v47 = vadd.f32 %v4221_v58, %v2504_v29  ;;  %v4227_v56 = vadd.f32 %v4226_v8, %v4225_v24 }
 0x350   :  { %v4145_v6 = vpop.f32.mrf.mxu0 }
 0x351   :  { %v4228_v0 = vpop.f32.mrf.mxu1  ;;  %v2519_v11 = vadd.f32 %v4144_v2, %v7747_v37 }
 0x352   :  { %v4146_v48 = vpop.f32.mrf.mxu0 }
 0x353   :  { %v4229_v18 = vpop.f32.mrf.mxu1  ;;  %v4147_v15 = vadd.f32 %v4146_v48, %v4145_v6  ;;  %v7759_v53 = vadd.f32 %v4224_v32, %v2519_v11 }
 0x354   :  { %v4230_v43 = vadd.f32 %v4229_v18, %v4228_v0  ;;  %v4148_v26 = vpop.f32.mrf.mxu0 }
 0x355   :  { %v4231_v25 = vpop.f32.mrf.mxu1  ;;  %v2534_v5 = vadd.f32 %v4147_v15, %v7747_v37 }
 0x356   :  { %v4149_v46 = vpop.f32.mrf.mxu0 }
 0x357   :  { %v4232_v14 = vpop.f32.mrf.mxu1  ;;  %v4150_v21 = vadd.f32 %v4149_v46, %v4148_v26  ;;  %v7762_v42 = vadd.f32 %v4227_v56, %v2534_v5 }
 0x358   :  { %v4233_v39 = vadd.f32 %v4232_v14, %v4231_v25  ;;  %v4151_v34 = vpop.f32.mrf.mxu0 }
 0x359   :  { %v4234_v62 = vpop.f32.mrf.mxu1  ;;  %v2549_v49 = vadd.f32 %v4150_v21, %v7747_v37 }
 0x35a   :  { %v4152_v27 = vpop.f32.mrf.mxu0 }
 0x35b   :  { %v4235_v50 = vpop.f32.mrf.mxu1  ;;  %v4153_v16 = vadd.f32 %v4152_v27, %v4151_v34  ;;  %v7765_v9 = vadd.f32 %v4230_v43, %v2549_v49 }
 0x35c   :  { %v4236_v44 = vadd.f32 %v4235_v50, %v4234_v62  ;;  %v4154_v31 = vpop.f32.mrf.mxu0 }
 0x35d   :  { %v4237_v33 = vpop.f32.mrf.mxu1  ;;  %v2564_v59 = vadd.f32 %v4153_v16, %v7747_v37 }
 0x35e   :  { %v4155_v22 = vpop.f32.mrf.mxu0 }
 0x35f   :  { %v4238_v41 = vpop.f32.mrf.mxu1  ;;  %v4156_v40 = vadd.f32 %v4155_v22, %v4154_v31  ;;  %v7768_v20 = vadd.f32 %v4233_v39, %v2564_v59 }
 0x360   :  { %v4239_v54 = vadd.f32 %v4238_v41, %v4237_v33  ;;  %v4157_v60 = vpop.f32.mrf.mxu0 }
 0x361   :  { %v4240_v1 = vpop.f32.mrf.mxu1  ;;  %v2579_v30 = vadd.f32 %v4156_v40, %v7747_v37 }
 0x362   :  { %v4158_v55 = vpop.f32.mrf.mxu0 }
 0x363   :  { %v4241_v10 = vpop.f32.mrf.mxu1  ;;  %v4159_v12 = vadd.f32 %v4158_v55, %v4157_v60  ;;  %v7771_v61 = vadd.f32 %v4236_v44, %v2579_v30 }
 0x364   :  { %v4242_v13 = vadd.f32 %v4241_v10, %v4240_v1  ;;  %v4160_v63 = vpop.f32.mrf.mxu0 }
 0x365   :  { %v4243_v36 = vpop.f32.mrf.mxu1  ;;  %v2594_v3 = vadd.f32 %v4159_v12, %v7747_v37 }
 0x366   :  { %v4161_v28 = vpop.f32.mrf.mxu0 }
 0x367   :  { %v4244_v57 = vpop.f32.mrf.mxu1  ;;  %v4162_v58 = vadd.f32 %v4161_v28, %v4160_v63  ;;  %v7774_v35 = vadd.f32 %v4239_v54, %v2594_v3 }
 0x368   :  { %v4245_v51 = vadd.f32 %v4244_v57, %v4243_v36  ;;  %v4163_v7 = vpop.f32.mrf.mxu0 }
 0x369   :  { %v4246_v52 = vpop.f32.mrf.mxu1  ;;  %v2609_v17 = vadd.f32 %v4162_v58, %v7747_v37 }
 0x36a   :  { %v4164_v23 = vpop.f32.mrf.mxu0 }
 0x36b   :  { %v4247_v32 = vpop.f32.mrf.mxu1  ;;  %v4165_v19 = vadd.f32 %v4164_v23, %v4163_v7  ;;  %v7777_v24 = vadd.f32 %v4242_v13, %v2609_v17 }
 0x36c   :  { %v4248_v29 = vadd.f32 %v4247_v32, %v4246_v52  ;;  %v4166_v4 = vpop.f32.mrf.mxu0 }
 0x36d   :  { %8811 = vst [vmem:[#allocation70_spill] sm:$0xff] %v7777_v24  ;;  %v4249_v8 = vpop.f32.mrf.mxu1  ;;  %v2624_v2 = vadd.f32 %v4165_v19, %v7747_v37 }
 0x36e   :  { %v4167_v56 = vpop.f32.mrf.mxu0 }
 0x36f   :  { %v4250_v6 = vpop.f32.mrf.mxu1  ;;  %v4168_v0 = vadd.f32 %v4167_v56, %v4166_v4  ;;  %v7780_v11 = vadd.f32 %v4245_v51, %v2624_v2 }
 0x370   :  { %v4251_v48 = vadd.f32 %v4250_v6, %v4249_v8  ;;  %v4169_v18 = vpop.f32.mrf.mxu0 }
 0x371   :  { %8812 = vst [vmem:[#allocation82_spill] sm:$0xff] %v7780_v11  ;;  %v4252_v15 = vpop.f32.mrf.mxu1  ;;  %v2639_v43 = vadd.f32 %v4168_v0, %v7747_v37 }
 0x372   :  { %v4170_v26 = vpop.f32.mrf.mxu0 }
 0x373   :  { %v4253_v25 = vpop.f32.mrf.mxu1  ;;  %v4171_v5 = vadd.f32 %v4170_v26, %v4169_v18  ;;  %v7783_v46 = vadd.f32 %v4248_v29, %v2639_v43 }
 0x374   :  { %v4254_v14 = vadd.f32 %v4253_v25, %v4252_v15  ;;  %v4172_v21 = vpop.f32.mrf.mxu0 }
 0x375   :  { %8813 = vst [vmem:[#allocation75_spill] sm:$0xff] %v7783_v46  ;;  %v4255_v39 = vpop.f32.mrf.mxu1  ;;  %v2654_v34 = vadd.f32 %v4171_v5, %v7747_v37 }
 0x376   :  { %v4173_v62 = vpop.f32.mrf.mxu0 }
 0x377   :  { %v4256_v49 = vpop.f32.mrf.mxu1  ;;  %v4174_v27 = vadd.f32 %v4173_v62, %v4172_v21  ;;  %v7786_v50 = vadd.f32 %v4251_v48, %v2654_v34 }
 0x378   :  { %v4257_v16 = vadd.f32 %v4256_v49, %v4255_v39  ;;  %v4175_v44 = vpop.f32.mrf.mxu0 }
 0x379   :  { %8814 = vst [vmem:[#allocation41_spill] sm:$0xff] %v7786_v50  ;;  %v4258_v31 = vpop.f32.mrf.mxu1  ;;  %v2669_v33 = vadd.f32 %v4174_v27, %v7747_v37 }
 0x37a   :  { %v4176_v59 = vpop.f32.mrf.mxu0 }
 0x37b   :  { %v4259_v22 = vpop.f32.mrf.mxu1  ;;  %v4177_v41 = vadd.f32 %v4176_v59, %v4175_v44  ;;  %v7789_v40 = vadd.f32 %v4254_v14, %v2669_v33 }
 0x37c   :  { %v4260_v54 = vadd.f32 %v4259_v22, %v4258_v31  ;;  %v4178_v60 = vpop.f32.mrf.mxu0 }
 0x37d   :  { %8815 = vst [vmem:[#allocation71_spill] sm:$0xff] %v7789_v40  ;;  %v7791_v1 = vpop.f32.mrf.mxu1  ;;  %v2684_v30 = vadd.f32 %v4177_v41, %v7747_v37 }
 0x37e   :  { %v4179_v55 = vpop.f32.mrf.mxu0 }
 0x37f   :  { %v7794_v10 = vpop.f32.mrf.mxu1  ;;  %v4180_v12 = vadd.f32 %v4179_v55, %v4178_v60  ;;  %v7796_v13 = vadd.f32 %v4257_v16, %v2684_v30 }
 0x380   :  { %v4293_v63 = vpop.f32.mrf.mxu0 }
 0x381   :  { %8816 = vst [vmem:[#allocation92_spill] sm:$0xff] %v7796_v13  ;;  %v7798_v36 = vpop.f32.mrf.mxu1  ;;  %v2699_v3 = vadd.f32 %v4180_v12, %v7747_v37 }
 0x382   :  { %v4294_v28 = vpop.f32.mrf.mxu0 }
 0x383   :  { %v7801_v57 = vpop.f32.mrf.mxu1  ;;  %v7803_v58 = vadd.f32 %v4260_v54, %v2699_v3 }
 0x384   :  { %v4296_v51 = vpop.f32.mrf.mxu0 }
 0x385   :  { %8817 = vst [vmem:[#allocation61_spill] sm:$0xff] %v7803_v58  ;;  %v7805_v7 = vpop.f32.mrf.mxu1 }
 0x386   :  { %v4297_v52 = vpop.f32.mrf.mxu0 }
 0x387   :  { %v7807_v17 = vpop.f32.mrf.mxu1  ;;  %v4298_v11 = vadd.f32 %v4297_v52, %v4296_v51  ;;  %v4378_v51 = vadd.f32 %v7801_v57, %v7798_v36 }
 0x388   :  { %v7809_v23 = vpop.f32.mrf.mxu0 }
 0x389   :  { %v7811_v32 = vpop.f32.mrf.mxu1 }
 0x38a   :  { %v4300_v19 = vpop.f32.mrf.mxu0 }
 0x38b   :  { %v7813_v29 = vpop.f32.mrf.mxu1 }
 0x38c   :  { %v7815_v4 = vpop.f32.mrf.mxu0 }
 0x38d   :  { %v7817_v37 = vpop.f32.mrf.mxu1 }
 0x38e   :  { %v7819_v8 = vpop.f32.mrf.mxu0 }
 0x38f   :  { %v7821_v2 = vpop.f32.mrf.mxu1 }
 0x390   :  { %v7823_v56 = vpop.f32.mrf.mxu0 }
 0x391   :  { %v7825_v6 = vpop.f32.mrf.mxu1 }
 0x392   :  { %v7827_v0 = vpop.f32.mrf.mxu0 }
 0x393   :  { %v7829_v48 = vpop.f32.mrf.mxu1 }
 0x394   :  { %v7831_v18 = vpop.f32.mrf.mxu0 }
 0x395   :  { %v7833_v15 = vpop.f32.mrf.mxu1 }
 0x396   :  { %v7835_v43 = vpop.f32.mrf.mxu0 }
 0x397   :  { %v7837_v26 = vpop.f32.mrf.mxu1 }
 0x398   :  { %v7839_v25 = vpop.f32.mrf.mxu0 }
 0x399   :  { %v7841_v5 = vpop.f32.mrf.mxu1 }
 0x39a   :  { %v7843_v14 = vpop.f32.mrf.mxu0 }
 0x39b   :  { %v7845_v21 = vpop.f32.mrf.mxu1 }
 0x39c   :  { %v7847_v39 = vpop.f32.mrf.mxu0 }
 0x39d   :  { %v7849_v34 = vpop.f32.mrf.mxu1 }
 0x39e   :  { %v7851_v62 = vpop.f32.mrf.mxu0 }
 0x39f   :  { %v7853_v49 = vpop.f32.mrf.mxu1 }
 0x3a0   :  { %v7855_v27 = vpop.f32.mrf.mxu0 }
 0x3a1   :  { %v7857_v16 = vpop.f32.mrf.mxu1 }
 0x3a2   :  { %8818 = vst [vmem:[#allocation16_spill] sm:$0xff] %v7857_v16  ;;  %v7859_v44 = vpop.f32.mrf.mxu0 }
 0x3a3   :  { %v7861_v31 = vpop.f32.mrf.mxu1 }
 0x3a4   :  { %8819 = vst [vmem:[#allocation76_spill] sm:$0xff] %v7861_v31  ;;  %v7863_v33 = vpop.f32.mrf.mxu0 }
 0x3a5   :  { %v7865_v59 = vpop.f32.mrf.mxu1 }
 0x3a6   :  { %8820 = vst [vmem:[#allocation56_spill] sm:$0xff] %v7865_v59  ;;  %v7867_v22 = vpop.f32.mrf.mxu0 }
 0x3a7   :  { %v7869_v41 = vpop.f32.mrf.mxu1 }
 0x3a8   :  { %8821 = vst [vmem:[#allocation63_spill] sm:$0xff] %v7869_v41  ;;  %v7871_v54 = vpop.f32.mrf.mxu0 }
 0x3a9   :  { %v7873_v60 = vpop.f32.mrf.mxu1 }
 0x3aa   :  { %8822 = vst [vmem:[#allocation67_spill] sm:$0xff] %v7873_v60  ;;  %v7875_v30 = vpop.f32.mrf.mxu0 }
 0x3ab   :  { %v7877_v55 = vpop.f32.mrf.mxu1 }
 0x3ac   :  { %8823 = vst [vmem:[#allocation21_spill] sm:$0xff] %v7877_v55  ;;  %v7879_v12 = vpop.f32.mrf.mxu0 }
 0x3ad   :  { %8824 = vst [vmem:[#allocation80_spill] sm:$0xff] %v7879_v12  ;;  %v7881_v3 = vpop.f32.mrf.mxu1 }
 0x3ae   :  { %8825 = vst [vmem:[#allocation86_spill] sm:$0xff] %v7881_v3  ;;  %v7883_v58 = vpop.f32.mrf.mxu0 }
 0x3af   :  { %8826 = vst [vmem:[#allocation85_spill] sm:$0xff] %v7883_v58  ;;  %v7885_v13 = vpop.f32.mrf.mxu1 }
 0x3b0   :  { %8827 = vst [vmem:[#allocation88_spill] sm:$0xff] %v7885_v13  ;;  %v7887_v40 = vpop.f32.mrf.mxu0 }
 0x3b1   :  { %8828 = vst [vmem:[#allocation68_spill] sm:$0xff] %v7887_v40  ;;  %v7889_v50 = vpop.f32.mrf.mxu1  ;;  %v4295_v40 = vadd.f32 %v4294_v28, %v4293_v63  ;;  %v4301_v63 = vadd.f32 %v4300_v19, %v7809_v23 }
 0x3b2   :  { %8829 = vst [vmem:[#allocation95_spill] sm:$0xff] %v7889_v50  ;;  %v7891_v46 = vpop.f32.mrf.mxu0 }
 0x3b3   :  { %8830 = vst [vmem:[#allocation91_spill] sm:$0xff] %v7891_v46  ;;  %v7893_v41 = vpop.f32.mrf.mxu1 }
 0x3b4   :  { %8831 = vst [vmem:[#allocation24_spill] sm:$0xff] %v7893_v41  ;;  %v7895_v60 = vpop.f32.mrf.mxu0 }
 0x3b5   :  { %8832 = vst [vmem:[#allocation99_spill] sm:$0xff] %v7895_v60  ;;  %v7897_v59 = vpop.f32.mrf.mxu1 }
 0x3b6   :  { %8833 = vst [vmem:[#allocation100_spill] sm:$0xff] %v7897_v59  ;;  %v7899_v55 = vpop.f32.mrf.mxu0  ;;  %v3174_v59 = vadd.f32 %v4295_v40, %v7750_v38 }
 0x3b7   :  { %8834 = vst [vmem:[#allocation102_spill] sm:$0xff] %v7899_v55  ;;  %v7901_v12 = vpop.f32.mrf.mxu1 }
 0x3b8   :  { %8835 = vst [vmem:[#allocation101_spill] sm:$0xff] %v7901_v12  ;;  %v7903_v3 = vpop.f32.mrf.mxu0  ;;  %v4375_v12 = vadd.f32 %v7794_v10, %v7791_v1  ;;  %v3192_v1 = vadd.f32 %v4301_v63, %v7756_v47  ;;  %v4387_v63 = vadd.f32 %v7821_v2, %v7817_v37 }
 0x3b9   :  { %8836 = vst [vmem:[#allocation28_spill] sm:$0xff] %v7903_v3  ;;  %v7905_v58 = vpop.f32.mrf.mxu1 }
 0x3ba   :  { %8837 = vst [vmem:[#allocation106_spill] sm:$0xff] %v7905_v58  ;;  %v7907_v13 = vpop.f32.mrf.mxu0  ;;  %v3183_v58 = vadd.f32 %v4298_v11, %v7753_v45  ;;  %v4304_v45 = vadd.f32 %v7819_v8, %v7815_v4 }
 0x3bb   :  { %8838 = vst [vmem:[#allocation10_spill] sm:$0xff] %v7907_v13  ;;  %v7909_v50 = vpop.f32.mrf.mxu1 }
 0x3bc   :  { %8839 = vst [vmem:[#allocation8_spill] sm:$0xff] %v7909_v50  ;;  %v7911_v46 = vpop.f32.mrf.mxu0  ;;  %v3417_v50 = vadd.f32 %v4375_v12, %v3174_v59  ;;  %v3428_v16 = vadd.f32 %v4378_v51, %v3183_v58  ;;  %v3201_v47 = vadd.f32 %v4304_v45, %v7759_v53 }
 0x3bd   :  { %8840 = vst [vmem:[#allocation9_spill] sm:$0xff] %v7911_v46  ;;  %v4533_v41 = vpop.f32.mrf.mxu1 }
 0x3be   :  { %v7913_v60 = vpop.f32.mrf.mxu0 }
 0x3bf   :  { %8841 = vst [vmem:[#allocation37_spill] sm:$0xff] %v7913_v60  ;;  %v4534_v55 = vpop.f32.mrf.mxu1 }
 0x3c0   :  { %v4453_v31 = vpop.f32.mrf.mxu0  ;;  %v4535_v60 = vadd.f32 %v4534_v55, %v4533_v41 }
 0x3c1   :  { %v4536_v3 = vpop.f32.mrf.mxu1 }
 0x3c2   :  { %v4454_v13 = vpop.f32.mrf.mxu0 }
 0x3c3   :  { %v4537_v28 = vpop.f32.mrf.mxu1  ;;  %v4455_v46 = vadd.f32 %v4454_v13, %v4453_v31  ;;  %v4381_v13 = vadd.f32 %v7807_v17, %v7805_v7 }
 0x3c4   :  { %v4456_v52 = vpop.f32.mrf.mxu0  ;;  %v4538_v31 = vadd.f32 %v4537_v28, %v4536_v3 }
 0x3c5   :  { %v4539_v38 = vpop.f32.mrf.mxu1  ;;  %v3750_v40 = vadd.f32 %v4455_v46, %v3417_v50  ;;  %v4307_v46 = vadd.f32 %v7827_v0, %v7823_v56  ;;  %v3439_v4 = vadd.f32 %v4381_v13, %v3192_v1  ;;  %v4310_v56 = vadd.f32 %v7835_v43, %v7831_v18 }
 0x3c6   :  { %v4457_v24 = vpop.f32.mrf.mxu0 }
 0x3c7   :  { %v3959_v11 = vadd.f32 %v4535_v60, %v3750_v40  ;;  %v4540_v10 = vpop.f32.mrf.mxu1  ;;  %v4458_v23 = vadd.f32 %v4457_v24, %v4456_v52  ;;  %v4384_v24 = vadd.f32 %v7813_v29, %v7811_v32  ;;  %v4313_v40 = vadd.f32 %v7843_v14, %v7839_v25 }
 0x3c8   :  { %v4459_v19 = vpop.f32.mrf.mxu0  ;;  %v4541_v60 = vadd.f32 %v4540_v10, %v4539_v38 }
 0x3c9   :  { %4067 = vst [vmem:[#allocation5] sm:$0xff] %v3959_v11  ;;  %v4542_v36 = vpop.f32.mrf.mxu1  ;;  %v3757_v57 = vadd.f32 %v4458_v23, %v3428_v16  ;;  %v3210_v16 = vadd.f32 %v4307_v46, %v7762_v42  ;;  %v3450_v12 = vadd.f32 %v4384_v24, %v3201_v47  ;;  %v3219_v42 = vadd.f32 %v4310_v56, %v7765_v9 }
 0x3ca   :  { %v4460_v50 = vpop.f32.mrf.mxu0  ;;  %v4390_v11 = vadd.f32 %v7829_v48, %v7825_v6  ;;  %v4316_v23 = vadd.f32 %v7851_v62, %v7847_v39  ;;  %v3228_v9 = vadd.f32 %v4313_v40, %v7768_v20  ;;  %v4319_v39 = vadd.f32 %v7859_v44, %v7855_v27 }
 0x3cb   :  { %v3966_v58 = vadd.f32 %v4538_v31, %v3757_v57  ;;  %v4543_v59 = vpop.f32.mrf.mxu1  ;;  %v4461_v8 = vadd.f32 %v4460_v50, %v4459_v19  ;;  %v3461_v52 = vadd.f32 %v4387_v63, %v3210_v16  ;;  %v4393_v57 = vadd.f32 %v7837_v26, %v7833_v15 }
 0x3cc   :  { %v4462_v41 = vpop.f32.mrf.mxu0  ;;  %v4544_v51 = vadd.f32 %v4543_v59, %v4542_v36  ;;  %v3472_v25 = vadd.f32 %v4390_v11, %v3219_v42  ;;  %v3237_v50 = vadd.f32 %v4316_v23, %v7771_v61  ;;  %v3246_v61 = vadd.f32 %v4319_v39, %v7774_v35 }
 0x3cd   :  { %4068 = vst [vmem:[#allocation5 + $0x8] sm:$0xff] %v3966_v58  ;;  %v4545_v7 = vpop.f32.mrf.mxu1  ;;  %v3764_v17 = vadd.f32 %v4461_v8, %v3439_v4  ;;  %v3483_v58 = vadd.f32 %v4393_v57, %v3228_v9  ;;  %v4396_v4 = vadd.f32 %v7845_v21, %v7841_v5  ;;  %v8851_v57 = vld [vmem:[#allocation68_spill] sm:$0xff] }
 0x3ce   :  { %v4463_v55 = vpop.f32.mrf.mxu0 }
 0x3cf   :  { %v3973_v0 = vadd.f32 %v4541_v60, %v3764_v17  ;;  %v4546_v53 = vpop.f32.mrf.mxu1  ;;  %v4464_v3 = vadd.f32 %v4463_v55, %v4462_v41  ;;  %v3494_v24 = vadd.f32 %v4396_v4, %v3237_v50  ;;  %v4399_v55 = vadd.f32 %v7853_v49, %v7849_v34 }
 0x3d0   :  { %v4465_v28 = vpop.f32.mrf.mxu0  ;;  %v4547_v37 = vadd.f32 %v4546_v53, %v4545_v7  ;;  %v4322_v7 = vadd.f32 %v7867_v22, %v7863_v33 }
 0x3d1   :  { %4069 = vst [vmem:[#allocation5 + $0x10] sm:$0xff] %v3973_v0  ;;  %v4548_v32 = vpop.f32.mrf.mxu1  ;;  %v3771_v29 = vadd.f32 %v4464_v3, %v3450_v12  ;;  %v4325_v0 = vadd.f32 %v7875_v30, %v7871_v54  ;;  %v8842_v12 = vld [vmem:[#allocation70_spill] sm:$0xff]  ;;  %v3505_v33 = vadd.f32 %v4399_v55, %v3246_v61  ;;  %v8847_v54 = vld [vmem:[#allocation85_spill] sm:$0xff] }
 0x3d2   :  { %v4466_v38 = vpop.f32.mrf.mxu0  ;;  %v3255_v35 = vadd.f32 %v4322_v7, %v8842_v12  ;;  %v8858_v55 = vld [vmem:[#allocation86_spill] sm:$0xff]  ;;  %v8860_v12 = vld [vmem:[#allocation71_spill] sm:$0xff] }
 0x3d3   :  { %v3980_v18 = vadd.f32 %v4544_v51, %v3771_v29  ;;  %v4549_v43 = vpop.f32.mrf.mxu1  ;;  %v4467_v1 = vadd.f32 %v4466_v38, %v4465_v28  ;;  %v8843_v51 = vld [vmem:[#allocation16_spill] sm:$0xff]  ;;  %v8845_v38 = vld [vmem:[#allocation82_spill] sm:$0xff] }
 0x3d4   :  { %v4468_v45 = vpop.f32.mrf.mxu0  ;;  %v4550_v46 = vadd.f32 %v4549_v43, %v4548_v32  ;;  %v8844_v32 = vld [vmem:[#allocation76_spill] sm:$0xff]  ;;  %v3264_v42 = vadd.f32 %v4325_v0, %v8845_v38 }
 0x3d5   :  { %4070 = vst [vmem:[#allocation5 + $0x18] sm:$0xff] %v3980_v18  ;;  %v4551_v2 = vpop.f32.mrf.mxu1  ;;  %v3778_v10 = vadd.f32 %v4467_v1, %v3461_v52  ;;  %v4402_v29 = vadd.f32 %v8844_v32, %v8843_v51  ;;  %v8846_v18 = vld [vmem:[#allocation80_spill] sm:$0xff] }
 0x3d6   :  { %v4469_v19 = vpop.f32.mrf.mxu0  ;;  %v4328_v30 = vadd.f32 %v8847_v54, %v8846_v18 }
 0x3d7   :  { %v3987_v13 = vadd.f32 %v4547_v37, %v3778_v10  ;;  %v4552_v31 = vpop.f32.mrf.mxu1  ;;  %v4470_v14 = vadd.f32 %v4469_v19, %v4468_v45  ;;  %v3516_v45 = vadd.f32 %v4402_v29, %v3255_v35  ;;  %v8848_v37 = vld [vmem:[#allocation56_spill] sm:$0xff] }
 0x3d8   :  { %v4471_v36 = vpop.f32.mrf.mxu0  ;;  %v4553_v41 = vadd.f32 %v4552_v31, %v4551_v2  ;;  %v8849_v2 = vld [vmem:[#allocation63_spill] sm:$0xff] }
 0x3d9   :  { %4071 = vst [vmem:[#allocation5 + $0x20] sm:$0xff] %v3987_v13  ;;  %v4554_v6 = vpop.f32.mrf.mxu1  ;;  %v3785_v48 = vadd.f32 %v4470_v14, %v3472_v25  ;;  %v4405_v10 = vadd.f32 %v8849_v2, %v8848_v37  ;;  %v8850_v14 = vld [vmem:[#allocation75_spill] sm:$0xff] }
 0x3da   :  { %v4472_v47 = vpop.f32.mrf.mxu0 }
 0x3db   :  { %v3994_v62 = vadd.f32 %v4550_v46, %v3785_v48  ;;  %v4555_v20 = vpop.f32.mrf.mxu1  ;;  %v4473_v59 = vadd.f32 %v4472_v47, %v4471_v36  ;;  %v3527_v31 = vadd.f32 %v4405_v10, %v3264_v42  ;;  %v3273_v36 = vadd.f32 %v4328_v30, %v8850_v14  ;;  %v8852_v46 = vld [vmem:[#allocation91_spill] sm:$0xff] }
 0x3dc   :  { %v4474_v8 = vpop.f32.mrf.mxu0  ;;  %v4556_v5 = vadd.f32 %v4555_v20, %v4554_v6  ;;  %v4331_v6 = vadd.f32 %v8852_v46, %v8851_v57  ;;  %v8854_v20 = vld [vmem:[#allocation21_spill] sm:$0xff] }
 0x3dd   :  { %4072 = vst [vmem:[#allocation5 + $0x28] sm:$0xff] %v3994_v62  ;;  %v4557_v15 = vpop.f32.mrf.mxu1  ;;  %v3792_v26 = vadd.f32 %v4473_v59, %v3483_v58  ;;  %v8853_v62 = vld [vmem:[#allocation67_spill] sm:$0xff]  ;;  %v8870_v46 = vld [vmem:[#allocation61_spill] sm:$0xff] }
 0x3de   :  { %v4475_v60 = vpop.f32.mrf.mxu0  ;;  %v4408_v58 = vadd.f32 %v8854_v20, %v8853_v62  ;;  %v8871_v62 = vld [vmem:[#allocation106_spill] sm:$0xff]  ;;  %v8872_v20 = vld [vmem:[#allocation8_spill] sm:$0xff] }
 0x3df   :  { %v4001_v27 = vadd.f32 %v4553_v41, %v3792_v26  ;;  %v4558_v44 = vpop.f32.mrf.mxu1  ;;  %v4476_v17 = vadd.f32 %v4475_v60, %v4474_v8  ;;  %v8855_v41 = vld [vmem:[#allocation99_spill] sm:$0xff]  ;;  %v8857_v60 = vld [vmem:[#allocation41_spill] sm:$0xff] }
 0x3e0   :  { %v4477_v16 = vpop.f32.mrf.mxu0  ;;  %v4559_v52 = vadd.f32 %v4558_v44, %v4557_v15  ;;  %v8856_v15 = vld [vmem:[#allocation102_spill] sm:$0xff]  ;;  %v3282_v61 = vadd.f32 %v4331_v6, %v8857_v60  ;;  %v3538_v44 = vadd.f32 %v4408_v58, %v3273_v36  ;;  %v4420_v58 = vadd.f32 %v8872_v20, %v8871_v62 }
 0x3e1   :  { %4073 = vst [vmem:[#allocation5 + $0x30] sm:$0xff] %v4001_v27  ;;  %v4560_v21 = vpop.f32.mrf.mxu1  ;;  %v3799_v56 = vadd.f32 %v4476_v17, %v3494_v24  ;;  %v4334_v26 = vadd.f32 %v8856_v15, %v8855_v41 }
 0x3e2   :  { %v4478_v53 = vpop.f32.mrf.mxu0 }
 0x3e3   :  { %v4008_v3 = vadd.f32 %v4556_v5, %v3799_v56  ;;  %v4561_v63 = vpop.f32.mrf.mxu1  ;;  %v4479_v22 = vadd.f32 %v4478_v53, %v4477_v16  ;;  %v8859_v5 = vld [vmem:[#allocation88_spill] sm:$0xff]  ;;  %v3291_v35 = vadd.f32 %v4334_v26, %v8860_v12 }
 0x3e4   :  { %v4480_v28 = vpop.f32.mrf.mxu0  ;;  %v4562_v19 = vadd.f32 %v4561_v63, %v4560_v21  ;;  %v4411_v21 = vadd.f32 %v8859_v5, %v8858_v55  ;;  %v8861_v63 = vld [vmem:[#allocation28_spill] sm:$0xff] }
 0x3e5   :  { %4074 = vst [vmem:[#allocation5 + $0x38] sm:$0xff] %v4008_v3  ;;  %v4563_v34 = vpop.f32.mrf.mxu1  ;;  %v3806_v49 = vadd.f32 %v4479_v22, %v3505_v33  ;;  %v8862_v33 = vld [vmem:[#allocation10_spill] sm:$0xff] }
 0x3e6   :  { %v4481_v40 = vpop.f32.mrf.mxu0  ;;  %v4337_v22 = vadd.f32 %v8862_v33, %v8861_v63  ;;  %v3549_v32 = vadd.f32 %v4411_v21, %v3282_v61 }
 0x3e7   :  { %v4015_v43 = vadd.f32 %v4559_v52, %v3806_v49  ;;  %v4564_v1 = vpop.f32.mrf.mxu1  ;;  %v4482_v11 = vadd.f32 %v4481_v40, %v4480_v28  ;;  %v8863_v52 = vld [vmem:[#allocation95_spill] sm:$0xff] }
 0x3e8   :  { %v4483_v23 = vpop.f32.mrf.mxu0  ;;  %v4565_v59 = vadd.f32 %v4564_v1, %v4563_v34  ;;  %v8864_v34 = vld [vmem:[#allocation24_spill] sm:$0xff] }
 0x3e9   :  { %4075 = vst [vmem:[#allocation5 + $0x40] sm:$0xff] %v4015_v43  ;;  %v4566_v9 = vpop.f32.mrf.mxu1  ;;  %v3813_v13 = vadd.f32 %v4482_v11, %v3516_v45  ;;  %v4414_v49 = vadd.f32 %v8864_v34, %v8863_v52  ;;  %v8865_v43 = vld [vmem:[#allocation92_spill] sm:$0xff]  ;;  %v8866_v45 = vld [vmem:[#allocation9_spill] sm:$0xff] }
 0x3ea   :  { %v4484_v25 = vpop.f32.mrf.mxu0  ;;  %v3300_v1 = vadd.f32 %v4337_v22, %v8865_v43  ;;  %v8867_v11 = vld [vmem:[#allocation37_spill] sm:$0xff] }
 0x3eb   :  { %v4022_v48 = vadd.f32 %v4562_v19, %v3813_v13  ;;  %v4567_v50 = vpop.f32.mrf.mxu1  ;;  %v4485_v47 = vadd.f32 %v4484_v25, %v4483_v23  ;;  %v3560_v54 = vadd.f32 %v4414_v49, %v3291_v35  ;;  %v4340_v37 = vadd.f32 %v8867_v11, %v8866_v45  ;;  %v8869_v13 = vld [vmem:[#allocation101_spill] sm:$0xff] }
 0x3ec   :  { %v4486_v39 = vpop.f32.mrf.mxu0  ;;  %v4568_v56 = vadd.f32 %v4567_v50, %v4566_v9  ;;  %v8868_v9 = vld [vmem:[#allocation100_spill] sm:$0xff] }
 0x3ed   :  { %4076 = vst [vmem:[#allocation5 + $0x48] sm:$0xff] %v4022_v48  ;;  %v4569_v4 = vpop.f32.mrf.mxu1  ;;  %v3820_v8 = vadd.f32 %v4485_v47, %v3527_v31  ;;  %v4417_v31 = vadd.f32 %v8869_v13, %v8868_v9  ;;  %v3309_v6 = vadd.f32 %v4340_v37, %v8870_v46 }
 0x3ee   :  { %v4487_v24 = vpop.f32.mrf.mxu0 }
 0x3ef   :  { %v4029_v7 = vadd.f32 %v4565_v59, %v3820_v8  ;;  %v4570_v27 = vpop.f32.mrf.mxu1  ;;  %v4488_v17 = vadd.f32 %v4487_v24, %v4486_v39  ;;  %v3571_v50 = vadd.f32 %v4417_v31, %v3300_v1  ;;  %v3582_v26 = vadd.f32 %v4420_v58, %v3309_v6 }
 0x3f0   :  { %v4489_v16 = vpop.f32.mrf.mxu0  ;;  %v4571_v42 = vadd.f32 %v4570_v27, %v4569_v4 }
 0x3f1   :  { %4077 = vst [vmem:[#allocation5 + $0x50] sm:$0xff] %v4029_v7  ;;  %v4572_v0 = vpop.f32.mrf.mxu1  ;;  %v3827_v53 = vadd.f32 %v4488_v17, %v3538_v44 }
 0x3f2   :  { %v4490_v3 = vpop.f32.mrf.mxu0 }
 0x3f3   :  { %v4036_v28 = vadd.f32 %v4568_v56, %v3827_v53  ;;  %v4573_v51 = vpop.f32.mrf.mxu1  ;;  %v4491_v29 = vadd.f32 %v4490_v3, %v4489_v16 }
 0x3f4   :  { %v4492_v38 = vpop.f32.mrf.mxu0  ;;  %v4574_v25 = vadd.f32 %v4573_v51, %v4572_v0 }
 0x3f5   :  { %4078 = vst [vmem:[#allocation5 + $0x58] sm:$0xff] %v4036_v28  ;;  %v4575_v40 = vpop.f32.mrf.mxu1  ;;  %v3834_v18 = vadd.f32 %v4491_v29, %v3549_v32 }
 0x3f6   :  { %v4493_v30 = vpop.f32.mrf.mxu0 }
 0x3f7   :  { %v4043_v2 = vadd.f32 %v4571_v42, %v3834_v18  ;;  %v4576_v10 = vpop.f32.mrf.mxu1  ;;  %v4494_v23 = vadd.f32 %v4493_v30, %v4492_v38 }
 0x3f8   :  { %v4495_v19 = vpop.f32.mrf.mxu0  ;;  %v4577_v59 = vadd.f32 %v4576_v10, %v4575_v40 }
 0x3f9   :  { %4079 = vst [vmem:[#allocation5 + $0x60] sm:$0xff] %v4043_v2  ;;  %v3841_v14 = vadd.f32 %v4494_v23, %v3560_v54  ;;  %v4578_v36 = vpop.f32.mrf.mxu1 }
 0x3fa   :  { %v4496_v57 = vpop.f32.mrf.mxu0 }
 0x3fb   :  { %v4050_v48 = vadd.f32 %v4574_v25, %v3841_v14  ;;  %v4497_v47 = vadd.f32 %v4496_v57, %v4495_v19  ;;  %v4579_v8 = vpop.f32.mrf.mxu1 }
 0x3fc   :  { %v4498_v39 = vpop.f32.mrf.mxu0  ;;  %v4580_v60 = vadd.f32 %v4579_v8, %v4578_v36 }
 0x3fd   :  { %4080 = vst [vmem:[#allocation5 + $0x68] sm:$0xff] %v4050_v48  ;;  %v3848_v4 = vadd.f32 %v4497_v47, %v3571_v50 }
 0x3fe   :  { %v4499_v41 = vpop.f32.mrf.mxu0 }
 0x3ff   :  { %v4057_v15 = vadd.f32 %v4577_v59, %v3848_v4  ;;  %v4500_v24 = vadd.f32 %v4499_v41, %v4498_v39 }
 0x401   :  { %4081 = vst [vmem:[#allocation5 + $0x70] sm:$0xff] %v4057_v15  ;;  %v3855_v61 = vadd.f32 %v4500_v24, %v3582_v26 }
 0x403   :  { %v4064_v7 = vadd.f32 %v4580_v60, %v3855_v61 }
 0x405   :  { %4082 = vst [vmem:[#allocation5 + $0x78] sm:$0xff] %v4064_v7 }
 0x406   :  { %4745 = shalt.err (!%p4742_p9)
}
 0x407   :  { %4094 = dma.vmem_to_hbm [thread:$0]  %s4089_s25, 2048, %s8001_s5, [#allocation4], %s4759_s21, %s4759_s21, %s4760_s22  }
 0x408   :  { %4756 = dma.done.wait [#allocation4], 2048  }
 0x409   :  { %4757 = vsyncadd [#allocation4], 4294965248 }
 0x40a   :  { %4098 = vsyncpa [#allocation3], 1 }
 0x40b   :  { %4099 = vsyncpa [#allocation4], 1 }

</bundles_post_ra>
